<compile_context>
chip_gen: v5e
topology: v5e:2x2
jax: 0.10.0
libtpu: 0.0.40
codegen_flags: <defaults>
</compile_context>

<pallas_src>
import functools

import jax
import jax.numpy as jnp
import numpy as np
from jax import lax
from jax.experimental import pallas as pl
from jax.experimental.pallas import tpu as pltpu

BN_EPS = 1e-5          # cfg.BN.EPS default
LANE = 128             # TPU lane width; Cout is padded to a multiple of this
TARGET_M_ROWS = 512    # im2col rows (TILE_OH * Wo) targeted per grid step


def _round_up(v, m):
    return (v + m - 1) // m * m


def _invariant_spec(block_shape, index_map):
    """BlockSpec for a grid-invariant operand; single-buffered when supported."""
    try:
        return pl.BlockSpec(block_shape, index_map, pipeline_mode=pl.Buffered(1))
    except (TypeError, ValueError):
        # Older Pallas without pipeline_mode support: fall back to default buffering.
        return pl.BlockSpec(block_shape, index_map)


def _sym_conv_bn_relu_kernel(x_ref, w_ref, b_ref, o_ref, acc_ref, *,
                             stride, tile_oh, wo, cin, cout_p):
    """One (image, row-tile) step: 9 shifted-window MXU matmuls + BN bias + ReLU.

    x_ref:   (1, Hin_rows, W+2, Cin)   bf16 zero-padded image (resident across row tiles)
    w_ref:   (9, Cin, Cout_p)          bf16 symmetrized weights, BN scale folded in
    b_ref:   (1, Cout_p)               f32 folded BN bias
    o_ref:   (1, TILE_OH, Wo, Cout_p)  bf16 lane-dense output tile
    acc_ref: (TILE_OH*Wo, Cout_p)      f32 VMEM accumulator scratch
    """
    rb = pl.program_id(1)
    r0 = rb * (tile_oh * stride)          # first padded-input row touched by this tile
    m_t = tile_oh * wo

    acc_ref[...] = jnp.zeros_like(acc_ref)
    for kh in range(3):
        if stride == 1:
            rows = x_ref[0, pl.ds(r0 + kh, tile_oh), :, :]          # (TILE_OH, W+2, Cin)
        else:
            # TODO(synk): stride>1 uses value-level strided slicing; less exercised path.
            span = (tile_oh - 1) * stride + 1
            rows = x_ref[0, pl.ds(r0 + kh, span), :, :]
            rows = lax.slice(rows, (0, 0, 0), (span, rows.shape[1], cin),
                             (stride, 1, 1))                        # (TILE_OH, W+2, Cin)
        for kw in range(3):
            if stride == 1:
                tap = rows[:, kw:kw + wo, :]                        # (TILE_OH, Wo, Cin)
            else:
                tap = lax.slice(rows, (0, kw, 0),
                                (tile_oh, kw + (wo - 1) * stride + 1, cin),
                                (1, stride, 1))
            acc_ref[...] += jnp.dot(tap.reshape(m_t, cin), w_ref[kh * 3 + kw],
                                    preferred_element_type=jnp.float32)

    y = jnp.maximum(acc_ref[...] + b_ref[...], 0.0)
    o_ref[...] = y.reshape(1, tile_oh, wo, cout_p).astype(o_ref.dtype)


@functools.partial(jax.jit, static_argnames=("stride",))
def sym_conv_basic_transform_nhwc(x_nhwc, weight, gamma, beta, run_mean, run_var, *, stride=1):
    """SymConv2d(3x3, pad=1) + BatchNorm(eval) + ReLU. NHWC in, bf16 NHWC out."""
    N, H, W, Cin = x_nhwc.shape
    Cout = weight.shape[0]
    s = int(stride)

    Ho = (H + 2 - 3) // s + 1
    Wo = (W + 2 - 3) // s + 1

    # --- SymConv2d weight symmetrization (both spatial flips) + BN scale fold ---
    w = weight.astype(jnp.float32)                                       # (Cout, Cin, 3, 3)
    w_sym = (w + w[:, :, ::-1, :] + w[:, :, :, ::-1] + w[:, :, ::-1, ::-1]) * 0.25
    scale = gamma / jnp.sqrt(run_var + BN_EPS)                           # (Cout,)
    bias = beta - run_mean * scale                                       # (Cout,)

    Cout_p = _round_up(Cout, LANE)                                       # lane-dense output
    w_taps = jnp.transpose(w_sym, (2, 3, 1, 0)).reshape(9, Cin, Cout)    # [kh*3+kw, cin, cout]
    w_taps = w_taps * scale[None, None, :]                               # BN-scale fold
    w_taps = jnp.pad(w_taps, ((0, 0), (0, 0), (0, Cout_p - Cout))).astype(jnp.bfloat16)
    bias_p = jnp.pad(bias, (0, Cout_p - Cout)).reshape(1, Cout_p).astype(jnp.float32)

    # --- row tiling: each grid step covers TILE_OH output rows (~>=512 im2col rows) ---
    TILE_OH = max(1, min(Ho, -(-TARGET_M_ROWS // Wo)))
    Ho_p = _round_up(Ho, TILE_OH)
    n_rb = Ho_p // TILE_OH
    Hin_rows = max(H + 2, (Ho_p - 1) * s + 3)      # padded-input rows the kernel may touch

    # --- zero halo pad (conv pad=1) in bf16; no 9x im2col expansion in HBM ---
    xp = jnp.pad(x_nhwc.astype(jnp.bfloat16),
                 ((0, 0), (1, Hin_rows - (H + 1)), (1, 1), (0, 0)))      # (N, Hin_rows, W+2, Cin)

    # --- VMEM budget (layout padded: last dim -> 128 lanes, 2nd-last -> 8 sublanes) ---
    def padded_bytes(shape, itemsize):
        r = list(shape)
        r[-1] = _round_up(r[-1], 128)
        if len(r) >= 2:
            r[-2] = _round_up(r[-2], 8)
        return int(np.prod(r)) * itemsize

    x_blk = padded_bytes((Hin_rows, W + 2, Cin), 2)
    w_blk = padded_bytes((9, Cin, Cout_p), 2)
    b_blk = padded_bytes((1, Cout_p), 4)
    o_blk = padded_bytes((TILE_OH, Wo, Cout_p), 2)
    acc_blk = padded_bytes((TILE_OH * Wo, Cout_p), 4)
    vmem_need = 2 * x_blk + w_blk + b_blk + 2 * o_blk + 2 * acc_blk + (4 << 20)
    vmem_limit = int(min(max(vmem_need, 16 << 20), 64 << 20))   # stay under v7x's 64 MiB

    flops = 2 * N * Ho * Wo * 9 * Cin * Cout_p
    bytes_accessed = (xp.size * 2) + (w_taps.size * 2) + (bias_p.size * 4) \
                     + (N * Ho_p * Wo * Cout_p * 2)

    kernel = functools.partial(_sym_conv_bn_relu_kernel, stride=s, tile_oh=TILE_OH,
                               wo=Wo, cin=Cin, cout_p=Cout_p)

    out = pl.pallas_call(
        kernel,
        out_shape=jax.ShapeDtypeStruct((N, Ho_p, Wo, Cout_p), jnp.bfloat16),
        grid=(N, n_rb),
        in_specs=[
            pl.BlockSpec((1, Hin_rows, W + 2, Cin), lambda n, rb: (n, 0, 0, 0)),
            _invariant_spec((9, Cin, Cout_p), lambda n, rb: (0, 0, 0)),
            _invariant_spec((1, Cout_p), lambda n, rb: (0, 0)),
        ],
        out_specs=pl.BlockSpec((1, TILE_OH, Wo, Cout_p), lambda n, rb: (n, rb, 0, 0)),
        scratch_shapes=[pltpu.VMEM((TILE_OH * Wo, Cout_p), jnp.float32)],
        compiler_params=pltpu.CompilerParams(
            dimension_semantics=("parallel", "arbitrary"),   # batch sharded on v7x megacore
            vmem_limit_bytes=vmem_limit,
        ),
        cost_estimate=pl.CostEstimate(flops=flops, transcendentals=0,
                                      bytes_accessed=bytes_accessed),
    )(xp, w_taps, bias_p)

    return out[:, :Ho, :, :Cout]          # strip row / channel padding (bf16 NHWC)


@functools.partial(jax.jit, static_argnames=("stride",))
def sym_conv_basic_transform(x_nchw, weight, gamma, beta, run_mean, run_var, *, stride=1):
    """NCHW-boundary wrapper for parity with the PyTorch module (f32 output).

    Prefer sym_conv_basic_transform_nhwc in production (keep activations NHWC
    across the network) to avoid the two boundary transpose passes.
    """
    x_nhwc = jnp.transpose(x_nchw, (0, 2, 3, 1))
    y = sym_conv_basic_transform_nhwc(x_nhwc, weight, gamma, beta, run_mean, run_var,
                                      stride=stride)
    return jnp.transpose(y, (0, 3, 1, 2)).astype(jnp.float32)


def _reference(x_nchw, weight, gamma, beta, run_mean, run_var, *, stride=1):
    """Pure-JAX reference (XLA conv, f32) for correctness checking."""
    w = weight.astype(jnp.float32)
    w_sym = (w + w[:, :, ::-1, :] + w[:, :, :, ::-1] + w[:, :, ::-1, ::-1]) * 0.25
    y = lax.conv_general_dilated(
        x_nchw.astype(jnp.float32), w_sym,
        window_strides=(stride, stride), padding=((1, 1), (1, 1)),
        dimension_numbers=("NCHW", "OIHW", "NCHW"),
    )
    scale = gamma / jnp.sqrt(run_var + BN_EPS)
    bias = beta - run_mean * scale
    y = y * scale[None, :, None, None] + bias[None, :, None, None]
    return jnp.maximum(y, 0.0)


if __name__ == "__main__":
    # Small deterministic setup: dim_in=4, dim_out=8, stride=1, input (2, 4, 16, 16)
    dim_in, dim_out, stride = 4, 8, 1
    key = jax.random.PRNGKey(0)
    kx, kw, kg, kb, km, kv = jax.random.split(key, 6)

    x = jax.random.normal(kx, (2, dim_in, 16, 16), dtype=jnp.float32)
    fan_in = dim_in * 3 * 3
    weight = jax.random.normal(kw, (dim_out, dim_in, 3, 3), dtype=jnp.float32) * np.sqrt(2.0 / fan_in)
    gamma = 1.0 + 0.1 * jax.random.normal(kg, (dim_out,), dtype=jnp.float32)
    beta = 0.1 * jax.random.normal(kb, (dim_out,), dtype=jnp.float32)
    run_mean = 0.1 * jax.random.normal(km, (dim_out,), dtype=jnp.float32)
    run_var = jax.random.uniform(kv, (dim_out,), minval=0.5, maxval=1.5, dtype=jnp.float32)

    out = sym_conv_basic_transform(x, weight, gamma, beta, run_mean, run_var, stride=stride)
    out = jax.block_until_ready(out)

    ref = jax.block_until_ready(
        _reference(x, weight, gamma, beta, run_mean, run_var, stride=stride)
    )
    # bf16 activations/weights/output (f32 accumulation) vs f32 reference.
    np.testing.assert_allclose(np.asarray(out), np.asarray(ref), rtol=2e-2, atol=2e-2)
    assert out.shape == (2, dim_out, 16, 16)

    print("KERNEL_OK")
</pallas_src>

<mosaic_0001>
module attributes {stable_mosaic.version = 11 : i64} {
  func.func @_sym_conv_bn_relu_kernel(%arg0: i32, %arg1: i32, %arg2: memref<1x18x18x4xbf16, #tpu.memory_space<vmem>>, %arg3: memref<9x4x128xbf16, #tpu.memory_space<vmem>>, %arg4: memref<1x128xf32, #tpu.memory_space<vmem>>, %arg5: memref<1x16x16x128xbf16, #tpu.memory_space<vmem>>, %arg6: memref<256x128xf32, #tpu.memory_space<vmem>>) attributes {dimension_semantics = [#tpu.dimension_semantics<parallel>, #tpu.dimension_semantics<arbitrary>], iteration_bounds = array<i64: 2, 1>, scalar_prefetch = 0 : i64, scratch_operands = 1 : i64, tpu.core_type = #tpu.core_type<tc>, window_params = [{transform_indices = @transform_0, window_bounds = array<i64: 1, 18, 18, 4>}, {pipeline_mode = #tpu.pipeline_mode<synchronous>, transform_indices = @transform_1, window_bounds = array<i64: 9, 4, 128>}, {pipeline_mode = #tpu.pipeline_mode<synchronous>, transform_indices = @transform_2, window_bounds = array<i64: 1, 128>}, {transform_indices = @transform_3, window_bounds = array<i64: 1, 16, 16, 128>}]} {
    %c16_i32 = arith.constant 16 : i32
    %0 = arith.muli %arg1, %c16_i32 : i32
    %cst = arith.constant 0.000000e+00 : f32
    %1 = vector.broadcast %cst : f32 to vector<256x128xf32>
    %c0 = arith.constant 0 : index
    %c0_0 = arith.constant 0 : index
    %2 = vector.load %arg6[%c0, %c0_0] : memref<256x128xf32, #tpu.memory_space<vmem>>, vector<256x128xf32>
    tpu.vector_store %arg6[%c0, %c0_0], %1 {strides = array<i32>} : memref<256x128xf32, #tpu.memory_space<vmem>>, vector<256x128xf32>,
    %c0_i32 = arith.constant 0 : i32
    %3 = arith.addi %0, %c0_i32 : i32
    %c0_1 = arith.constant 0 : index
    %4 = arith.index_cast %3 : i32 to index
    %c0_2 = arith.constant 0 : index
    %c0_3 = arith.constant 0 : index
    %5 = vector.load %arg2[%c0_1, %4, %c0_2, %c0_3] : memref<1x18x18x4xbf16, #tpu.memory_space<vmem>>, vector<1x16x18x4xbf16>
    %6 = vector.shape_cast %5 : vector<1x16x18x4xbf16> to vector<16x18x4xbf16>
    %7 = vector.extract_strided_slice %6 {offsets = [0, 0, 0], sizes = [16, 16, 4], strides = [1, 1, 1]} : vector<16x18x4xbf16> to vector<16x16x4xbf16>
    %c0_4 = arith.constant 0 : index
    %c0_5 = arith.constant 0 : index
    %8 = vector.load %arg6[%c0_4, %c0_5] : memref<256x128xf32, #tpu.memory_space<vmem>>, vector<256x128xf32>
    %9 = vector.shape_cast %7 : vector<16x16x4xbf16> to vector<256x4xbf16>
    %c0_6 = arith.constant 0 : index
    %c0_7 = arith.constant 0 : index
    %c0_8 = arith.constant 0 : index
    %10 = vector.load %arg3[%c0_6, %c0_7, %c0_8] : memref<9x4x128xbf16, #tpu.memory_space<vmem>>, vector<1x4x128xbf16>
    %11 = vector.shape_cast %10 : vector<1x4x128xbf16> to vector<4x128xbf16>
    %cst_9 = arith.constant dense<0.000000e+00> : vector<256x128xf32>
    %12 = tpu.matmul %9, %11, %cst_9 {dimension_numbers = #tpu.dot_dimension_numbers<[1], [0], [0], [1], [0, 0, 1, 1], [], []>} : vector<256x4xbf16>, vector<4x128xbf16>, vector<256x128xf32> -> vector<256x128xf32>
    %13 = arith.addf %8, %12 : vector<256x128xf32>
    %c0_10 = arith.constant 0 : index
    %c0_11 = arith.constant 0 : index
    %14 = vector.load %arg6[%c0_10, %c0_11] : memref<256x128xf32, #tpu.memory_space<vmem>>, vector<256x128xf32>
    tpu.vector_store %arg6[%c0_10, %c0_11], %13 {strides = array<i32>} : memref<256x128xf32, #tpu.memory_space<vmem>>, vector<256x128xf32>,
    %15 = vector.extract_strided_slice %6 {offsets = [0, 1, 0], sizes = [16, 16, 4], strides = [1, 1, 1]} : vector<16x18x4xbf16> to vector<16x16x4xbf16>
    %c0_12 = arith.constant 0 : index
    %c0_13 = arith.constant 0 : index
    %16 = vector.load %arg6[%c0_12, %c0_13] : memref<256x128xf32, #tpu.memory_space<vmem>>, vector<256x128xf32>
    %17 = vector.shape_cast %15 : vector<16x16x4xbf16> to vector<256x4xbf16>
    %c1 = arith.constant 1 : index
    %c0_14 = arith.constant 0 : index
    %c0_15 = arith.constant 0 : index
    %18 = vector.load %arg3[%c1, %c0_14, %c0_15] : memref<9x4x128xbf16, #tpu.memory_space<vmem>>, vector<1x4x128xbf16>
    %19 = vector.shape_cast %18 : vector<1x4x128xbf16> to vector<4x128xbf16>
    %cst_16 = arith.constant dense<0.000000e+00> : vector<256x128xf32>
    %20 = tpu.matmul %17, %19, %cst_16 {dimension_numbers = #tpu.dot_dimension_numbers<[1], [0], [0], [1], [0, 0, 1, 1], [], []>} : vector<256x4xbf16>, vector<4x128xbf16>, vector<256x128xf32> -> vector<256x128xf32>
    %21 = arith.addf %16, %20 : vector<256x128xf32>
    %c0_17 = arith.constant 0 : index
    %c0_18 = arith.constant 0 : index
    %22 = vector.load %arg6[%c0_17, %c0_18] : memref<256x128xf32, #tpu.memory_space<vmem>>, vector<256x128xf32>
    tpu.vector_store %arg6[%c0_17, %c0_18], %21 {strides = array<i32>} : memref<256x128xf32, #tpu.memory_space<vmem>>, vector<256x128xf32>,
    %23 = vector.extract_strided_slice %6 {offsets = [0, 2, 0], sizes = [16, 16, 4], strides = [1, 1, 1]} : vector<16x18x4xbf16> to vector<16x16x4xbf16>
    %c0_19 = arith.constant 0 : index
    %c0_20 = arith.constant 0 : index
    %24 = vector.load %arg6[%c0_19, %c0_20] : memref<256x128xf32, #tpu.memory_space<vmem>>, vector<256x128xf32>
    %25 = vector.shape_cast %23 : vector<16x16x4xbf16> to vector<256x4xbf16>
    %c2 = arith.constant 2 : index
    %c0_21 = arith.constant 0 : index
    %c0_22 = arith.constant 0 : index
    %26 = vector.load %arg3[%c2, %c0_21, %c0_22] : memref<9x4x128xbf16, #tpu.memory_space<vmem>>, vector<1x4x128xbf16>
    %27 = vector.shape_cast %26 : vector<1x4x128xbf16> to vector<4x128xbf16>
    %cst_23 = arith.constant dense<0.000000e+00> : vector<256x128xf32>
    %28 = tpu.matmul %25, %27, %cst_23 {dimension_numbers = #tpu.dot_dimension_numbers<[1], [0], [0], [1], [0, 0, 1, 1], [], []>} : vector<256x4xbf16>, vector<4x128xbf16>, vector<256x128xf32> -> vector<256x128xf32>
    %29 = arith.addf %24, %28 : vector<256x128xf32>
    %c0_24 = arith.constant 0 : index
    %c0_25 = arith.constant 0 : index
    %30 = vector.load %arg6[%c0_24, %c0_25] : memref<256x128xf32, #tpu.memory_space<vmem>>, vector<256x128xf32>
    tpu.vector_store %arg6[%c0_24, %c0_25], %29 {strides = array<i32>} : memref<256x128xf32, #tpu.memory_space<vmem>>, vector<256x128xf32>,
    %c1_i32 = arith.constant 1 : i32
    %31 = arith.addi %0, %c1_i32 : i32
    %c0_26 = arith.constant 0 : index
    %32 = arith.index_cast %31 : i32 to index
    %c0_27 = arith.constant 0 : index
    %c0_28 = arith.constant 0 : index
    %33 = vector.load %arg2[%c0_26, %32, %c0_27, %c0_28] : memref<1x18x18x4xbf16, #tpu.memory_space<vmem>>, vector<1x16x18x4xbf16>
    %34 = vector.shape_cast %33 : vector<1x16x18x4xbf16> to vector<16x18x4xbf16>
    %35 = vector.extract_strided_slice %34 {offsets = [0, 0, 0], sizes = [16, 16, 4], strides = [1, 1, 1]} : vector<16x18x4xbf16> to vector<16x16x4xbf16>
    %c0_29 = arith.constant 0 : index
    %c0_30 = arith.constant 0 : index
    %36 = vector.load %arg6[%c0_29, %c0_30] : memref<256x128xf32, #tpu.memory_space<vmem>>, vector<256x128xf32>
    %37 = vector.shape_cast %35 : vector<16x16x4xbf16> to vector<256x4xbf16>
    %c3 = arith.constant 3 : index
    %c0_31 = arith.constant 0 : index
    %c0_32 = arith.constant 0 : index
    %38 = vector.load %arg3[%c3, %c0_31, %c0_32] : memref<9x4x128xbf16, #tpu.memory_space<vmem>>, vector<1x4x128xbf16>
    %39 = vector.shape_cast %38 : vector<1x4x128xbf16> to vector<4x128xbf16>
    %cst_33 = arith.constant dense<0.000000e+00> : vector<256x128xf32>
    %40 = tpu.matmul %37, %39, %cst_33 {dimension_numbers = #tpu.dot_dimension_numbers<[1], [0], [0], [1], [0, 0, 1, 1], [], []>} : vector<256x4xbf16>, vector<4x128xbf16>, vector<256x128xf32> -> vector<256x128xf32>
    %41 = arith.addf %36, %40 : vector<256x128xf32>
    %c0_34 = arith.constant 0 : index
    %c0_35 = arith.constant 0 : index
    %42 = vector.load %arg6[%c0_34, %c0_35] : memref<256x128xf32, #tpu.memory_space<vmem>>, vector<256x128xf32>
    tpu.vector_store %arg6[%c0_34, %c0_35], %41 {strides = array<i32>} : memref<256x128xf32, #tpu.memory_space<vmem>>, vector<256x128xf32>,
    %43 = vector.extract_strided_slice %34 {offsets = [0, 1, 0], sizes = [16, 16, 4], strides = [1, 1, 1]} : vector<16x18x4xbf16> to vector<16x16x4xbf16>
    %c0_36 = arith.constant 0 : index
    %c0_37 = arith.constant 0 : index
    %44 = vector.load %arg6[%c0_36, %c0_37] : memref<256x128xf32, #tpu.memory_space<vmem>>, vector<256x128xf32>
    %45 = vector.shape_cast %43 : vector<16x16x4xbf16> to vector<256x4xbf16>
    %c4 = arith.constant 4 : index
    %c0_38 = arith.constant 0 : index
    %c0_39 = arith.constant 0 : index
    %46 = vector.load %arg3[%c4, %c0_38, %c0_39] : memref<9x4x128xbf16, #tpu.memory_space<vmem>>, vector<1x4x128xbf16>
    %47 = vector.shape_cast %46 : vector<1x4x128xbf16> to vector<4x128xbf16>
    %cst_40 = arith.constant dense<0.000000e+00> : vector<256x128xf32>
    %48 = tpu.matmul %45, %47, %cst_40 {dimension_numbers = #tpu.dot_dimension_numbers<[1], [0], [0], [1], [0, 0, 1, 1], [], []>} : vector<256x4xbf16>, vector<4x128xbf16>, vector<256x128xf32> -> vector<256x128xf32>
    %49 = arith.addf %44, %48 : vector<256x128xf32>
    %c0_41 = arith.constant 0 : index
    %c0_42 = arith.constant 0 : index
    %50 = vector.load %arg6[%c0_41, %c0_42] : memref<256x128xf32, #tpu.memory_space<vmem>>, vector<256x128xf32>
    tpu.vector_store %arg6[%c0_41, %c0_42], %49 {strides = array<i32>} : memref<256x128xf32, #tpu.memory_space<vmem>>, vector<256x128xf32>,
    %51 = vector.extract_strided_slice %34 {offsets = [0, 2, 0], sizes = [16, 16, 4], strides = [1, 1, 1]} : vector<16x18x4xbf16> to vector<16x16x4xbf16>
    %c0_43 = arith.constant 0 : index
    %c0_44 = arith.constant 0 : index
    %52 = vector.load %arg6[%c0_43, %c0_44] : memref<256x128xf32, #tpu.memory_space<vmem>>, vector<256x128xf32>
    %53 = vector.shape_cast %51 : vector<16x16x4xbf16> to vector<256x4xbf16>
    %c5 = arith.constant 5 : index
    %c0_45 = arith.constant 0 : index
    %c0_46 = arith.constant 0 : index
    %54 = vector.load %arg3[%c5, %c0_45, %c0_46] : memref<9x4x128xbf16, #tpu.memory_space<vmem>>, vector<1x4x128xbf16>
    %55 = vector.shape_cast %54 : vector<1x4x128xbf16> to vector<4x128xbf16>
    %cst_47 = arith.constant dense<0.000000e+00> : vector<256x128xf32>
    %56 = tpu.matmul %53, %55, %cst_47 {dimension_numbers = #tpu.dot_dimension_numbers<[1], [0], [0], [1], [0, 0, 1, 1], [], []>} : vector<256x4xbf16>, vector<4x128xbf16>, vector<256x128xf32> -> vector<256x128xf32>
    %57 = arith.addf %52, %56 : vector<256x128xf32>
    %c0_48 = arith.constant 0 : index
    %c0_49 = arith.constant 0 : index
    %58 = vector.load %arg6[%c0_48, %c0_49] : memref<256x128xf32, #tpu.memory_space<vmem>>, vector<256x128xf32>
    tpu.vector_store %arg6[%c0_48, %c0_49], %57 {strides = array<i32>} : memref<256x128xf32, #tpu.memory_space<vmem>>, vector<256x128xf32>,
    %c2_i32 = arith.constant 2 : i32
    %59 = arith.addi %0, %c2_i32 : i32
    %c0_50 = arith.constant 0 : index
    %60 = arith.index_cast %59 : i32 to index
    %c0_51 = arith.constant 0 : index
    %c0_52 = arith.constant 0 : index
    %61 = vector.load %arg2[%c0_50, %60, %c0_51, %c0_52] : memref<1x18x18x4xbf16, #tpu.memory_space<vmem>>, vector<1x16x18x4xbf16>
    %62 = vector.shape_cast %61 : vector<1x16x18x4xbf16> to vector<16x18x4xbf16>
    %63 = vector.extract_strided_slice %62 {offsets = [0, 0, 0], sizes = [16, 16, 4], strides = [1, 1, 1]} : vector<16x18x4xbf16> to vector<16x16x4xbf16>
    %c0_53 = arith.constant 0 : index
    %c0_54 = arith.constant 0 : index
    %64 = vector.load %arg6[%c0_53, %c0_54] : memref<256x128xf32, #tpu.memory_space<vmem>>, vector<256x128xf32>
    %65 = vector.shape_cast %63 : vector<16x16x4xbf16> to vector<256x4xbf16>
    %c6 = arith.constant 6 : index
    %c0_55 = arith.constant 0 : index
    %c0_56 = arith.constant 0 : index
    %66 = vector.load %arg3[%c6, %c0_55, %c0_56] : memref<9x4x128xbf16, #tpu.memory_space<vmem>>, vector<1x4x128xbf16>
    %67 = vector.shape_cast %66 : vector<1x4x128xbf16> to vector<4x128xbf16>
    %cst_57 = arith.constant dense<0.000000e+00> : vector<256x128xf32>
    %68 = tpu.matmul %65, %67, %cst_57 {dimension_numbers = #tpu.dot_dimension_numbers<[1], [0], [0], [1], [0, 0, 1, 1], [], []>} : vector<256x4xbf16>, vector<4x128xbf16>, vector<256x128xf32> -> vector<256x128xf32>
    %69 = arith.addf %64, %68 : vector<256x128xf32>
    %c0_58 = arith.constant 0 : index
    %c0_59 = arith.constant 0 : index
    %70 = vector.load %arg6[%c0_58, %c0_59] : memref<256x128xf32, #tpu.memory_space<vmem>>, vector<256x128xf32>
    tpu.vector_store %arg6[%c0_58, %c0_59], %69 {strides = array<i32>} : memref<256x128xf32, #tpu.memory_space<vmem>>, vector<256x128xf32>,
    %71 = vector.extract_strided_slice %62 {offsets = [0, 1, 0], sizes = [16, 16, 4], strides = [1, 1, 1]} : vector<16x18x4xbf16> to vector<16x16x4xbf16>
    %c0_60 = arith.constant 0 : index
    %c0_61 = arith.constant 0 : index
    %72 = vector.load %arg6[%c0_60, %c0_61] : memref<256x128xf32, #tpu.memory_space<vmem>>, vector<256x128xf32>
    %73 = vector.shape_cast %71 : vector<16x16x4xbf16> to vector<256x4xbf16>
    %c7 = arith.constant 7 : index
    %c0_62 = arith.constant 0 : index
    %c0_63 = arith.constant 0 : index
    %74 = vector.load %arg3[%c7, %c0_62, %c0_63] : memref<9x4x128xbf16, #tpu.memory_space<vmem>>, vector<1x4x128xbf16>
    %75 = vector.shape_cast %74 : vector<1x4x128xbf16> to vector<4x128xbf16>
    %cst_64 = arith.constant dense<0.000000e+00> : vector<256x128xf32>
    %76 = tpu.matmul %73, %75, %cst_64 {dimension_numbers = #tpu.dot_dimension_numbers<[1], [0], [0], [1], [0, 0, 1, 1], [], []>} : vector<256x4xbf16>, vector<4x128xbf16>, vector<256x128xf32> -> vector<256x128xf32>
    %77 = arith.addf %72, %76 : vector<256x128xf32>
    %c0_65 = arith.constant 0 : index
    %c0_66 = arith.constant 0 : index
    %78 = vector.load %arg6[%c0_65, %c0_66] : memref<256x128xf32, #tpu.memory_space<vmem>>, vector<256x128xf32>
    tpu.vector_store %arg6[%c0_65, %c0_66], %77 {strides = array<i32>} : memref<256x128xf32, #tpu.memory_space<vmem>>, vector<256x128xf32>,
    %79 = vector.extract_strided_slice %62 {offsets = [0, 2, 0], sizes = [16, 16, 4], strides = [1, 1, 1]} : vector<16x18x4xbf16> to vector<16x16x4xbf16>
    %c0_67 = arith.constant 0 : index
    %c0_68 = arith.constant 0 : index
    %80 = vector.load %arg6[%c0_67, %c0_68] : memref<256x128xf32, #tpu.memory_space<vmem>>, vector<256x128xf32>
    %81 = vector.shape_cast %79 : vector<16x16x4xbf16> to vector<256x4xbf16>
    %c8 = arith.constant 8 : index
    %c0_69 = arith.constant 0 : index
    %c0_70 = arith.constant 0 : index
    %82 = vector.load %arg3[%c8, %c0_69, %c0_70] : memref<9x4x128xbf16, #tpu.memory_space<vmem>>, vector<1x4x128xbf16>
    %83 = vector.shape_cast %82 : vector<1x4x128xbf16> to vector<4x128xbf16>
    %cst_71 = arith.constant dense<0.000000e+00> : vector<256x128xf32>
    %84 = tpu.matmul %81, %83, %cst_71 {dimension_numbers = #tpu.dot_dimension_numbers<[1], [0], [0], [1], [0, 0, 1, 1], [], []>} : vector<256x4xbf16>, vector<4x128xbf16>, vector<256x128xf32> -> vector<256x128xf32>
    %85 = arith.addf %80, %84 : vector<256x128xf32>
    %c0_72 = arith.constant 0 : index
    %c0_73 = arith.constant 0 : index
    %86 = vector.load %arg6[%c0_72, %c0_73] : memref<256x128xf32, #tpu.memory_space<vmem>>, vector<256x128xf32>
    tpu.vector_store %arg6[%c0_72, %c0_73], %85 {strides = array<i32>} : memref<256x128xf32, #tpu.memory_space<vmem>>, vector<256x128xf32>,
    %c0_74 = arith.constant 0 : index
    %c0_75 = arith.constant 0 : index
    %87 = vector.load %arg6[%c0_74, %c0_75] : memref<256x128xf32, #tpu.memory_space<vmem>>, vector<256x128xf32>
    %c0_76 = arith.constant 0 : index
    %c0_77 = arith.constant 0 : index
    %88 = vector.load %arg4[%c0_76, %c0_77] : memref<1x128xf32, #tpu.memory_space<vmem>>, vector<1x128xf32>
    %89 = vector.broadcast %88 : vector<1x128xf32> to vector<256x128xf32>
    %90 = arith.addf %87, %89 : vector<256x128xf32>
    %cst_78 = arith.constant 0.000000e+00 : f32
    %91 = vector.broadcast %cst_78 : f32 to vector<256x128xf32>
    %92 = arith.maximumf %90, %91 : vector<256x128xf32>
    %93 = vector.shape_cast %92 : vector<256x128xf32> to vector<1x16x16x128xf32>
    %94 = arith.truncf %93 : vector<1x16x16x128xf32> to vector<1x16x16x128xbf16>
    %c0_79 = arith.constant 0 : index
    %c0_80 = arith.constant 0 : index
    %c0_81 = arith.constant 0 : index
    %c0_82 = arith.constant 0 : index
    %95 = vector.load %arg5[%c0_79, %c0_80, %c0_81, %c0_82] : memref<1x16x16x128xbf16, #tpu.memory_space<vmem>>, vector<1x16x16x128xbf16>
    tpu.vector_store %arg5[%c0_79, %c0_80, %c0_81, %c0_82], %94 {strides = array<i32>} : memref<1x16x16x128xbf16, #tpu.memory_space<vmem>>, vector<1x16x16x128xbf16>,
    return
  }
  func.func @transform_0(%arg0: i32, %arg1: i32) -> (i32, i32, i32, i32) {
    %c0_i32 = arith.constant 0 : i32
    %c0_i32_0 = arith.constant 0 : i32
    %c0_i32_1 = arith.constant 0 : i32
    %c0_i32_2 = arith.constant 0 : i32
    return %arg0, %c0_i32, %c0_i32_0, %c0_i32_1 : i32, i32, i32, i32
  }
  func.func @transform_1(%arg0: i32, %arg1: i32) -> (i32, i32, i32) {
    %c0_i32 = arith.constant 0 : i32
    %c0_i32_0 = arith.constant 0 : i32
    %c0_i32_1 = arith.constant 0 : i32
    %c0_i32_2 = arith.constant 0 : i32
    return %c0_i32, %c0_i32_0, %c0_i32_1 : i32, i32, i32
  }
  func.func @transform_2(%arg0: i32, %arg1: i32) -> (i32, i32) {
    %c0_i32 = arith.constant 0 : i32
    %c0_i32_0 = arith.constant 0 : i32
    %c0_i32_1 = arith.constant 0 : i32
    return %c0_i32, %c0_i32_0 : i32, i32
  }
  func.func @transform_3(%arg0: i32, %arg1: i32) -> (i32, i32, i32, i32) {
    %c0_i32 = arith.constant 0 : i32
    %c0_i32_0 = arith.constant 0 : i32
    %c0_i32_1 = arith.constant 0 : i32
    return %arg0, %arg1, %c0_i32, %c0_i32_0 : i32, i32, i32, i32
  }
}

</mosaic_0001>

<bundles_post_ra>
// kernel: sym_conv_basic_transform_nhwc.1
= control target key start
LH: loop header
LB: loop body
LE: loop exit
PB: predicated region body
PF: predicated region fallthrough
CT: control target
= control target key end

     0   :  { %s5623_s12 = smov 0   ;;  %s5625_s13 = smov 0   ;;  %s7192_s0 = inlined_call_operand.vmem [shape: bf16[2,18,18,4], index: 0, kind: input, shape index: {}]   ;;  %s7193_s1 = inlined_call_operand.vmem [shape: bf16[9,4,128], index: 1, kind: input, shape index: {}]   ;;  %s7194_s2 = inlined_call_operand.vmem [shape: f32[1,128], index: 2, kind: input, shape index: {}]   ;;  %s7195_s3 = inlined_call_operand.vmem [shape: bf16[2,16,16,128], index: 3, kind: output, shape index: {}]  }
   0x1   :  { %s5627_s14 = smov 0  }
   0x2 LB: > { %s25_s15 = sadd.s32 1, %s5597_s13  ;;  %p4863_p0 = scmp.ge.s32.totalorder %s5601_s14, 1  ;;  %s5601_s14 = sphi %s5627_s14, %s13_s14   ;;  %s5597_s13 = sphi %s5625_s13, %s7221_s13   ;;  %s5593_s12 = sphi %s5623_s12, %s7220_s12  }
   0x3   : > { %p27_p1 = scmp.ge.s32.totalorder %s25_s15, 2  ;;  %p151_p2 = scmp.lt.s32.totalorder %s5601_s14, 3 }
   0x5   : > { %s7223_s15 = smov (%p27_p1, %s25_s15), 0  ;;  %p152_p3 = pnand %p4863_p0, %p151_p2 }
   0x7   : > { %155 = sbr.rel (%p152_p3) target bundleno = 733 (0x2dd), region = 32 }
   0xc   : > { %v313_v0 = vld [vmem:[%s7193_s1] sm:$0x3]  ;;  %vm443_vm0 = vcmask 1041408   ;;  %p180_p4 = scmp.lt.s32.totalorder %s5593_s12, 1  ;;  %v4980_v2 = vld [vmem:[%s7193_s1 + $0x4] sm:$0x3] }
   0xd   : > { %v445_v1 = vsel %vm443_vm0, %v313_v0, 0  ;;  %v5045_v3 = vld [vmem:[%s7193_s1 + $0x6] sm:$0x3]  ;;  %v1535_v4 = vsel %vm443_vm0, %v4980_v2, 0  ;;  %v4947_v6 = vld [vmem:[%s7193_s1 + $0x2] sm:$0x3] }
   0xe   : > { %5501 = vmatpush.bf16.msra.mxu1 %v445_v1  ;;  %5502 = vmatpush.bf16.msra.mxu2 %v445_v1  ;;  %s7225_s12 = smov (!%p180_p4, %s5593_s12), 1  ;;  %v1905_v5 = vsel %vm443_vm0, %v5045_v3, 0  ;;  %v1118_v7 = vsel %vm443_vm0, %v4947_v6, 0  ;;  %v5126_v8 = vld [vmem:[%s7193_s1 + $0x8] sm:$0x3]  ;;  %vm394_vm1 = vcmask 31744  }
   0xf   : > { %5503 = vmatpush.bf16.msra.mxu3 %v445_v1  ;;  %454 = vmatpush.bf16.msra.mxu0 %v445_v1  ;;  %s5504_s26 = smul.u32 216, %s7225_s12  ;;  %v2575_v9 = vsel %vm443_vm0, %v5126_v8, 0  ;;  %v5224_v30 = vld [vmem:[%s7193_s1 + $0xc] sm:$0x3]  ;;  %v5305_v34 = vld [vmem:[%s7193_s1 + $0xe] sm:$0x3] }
  0x10   : > { %v3359_v32 = vsel %vm443_vm0, %v5224_v30, 0  ;;  %v5159_v35 = vld [vmem:[%s7193_s1 + $0xa] sm:$0x3]  ;;  %v4029_v38 = vsel %vm443_vm0, %v5305_v34, 0  ;;  %v5338_v40 = vld [vmem:[%s7193_s1 + $0x10] sm:$0x3] }
  0x11   : > { %s5667_s29 = scalar_lea.vmem %s7192_s0, %s5504_s26  ;;  %v2989_v39 = vsel %vm443_vm0, %v5159_v35, 0  ;;  %v4443_v41 = vsel %vm443_vm0, %v5338_v40, 0  ;;  %vm632_vm2 = vsmask.f32 3328  ;;  %vm633_vm3 = vsmask.f32 7440 }
  0x12   : > { %1544 = vmatpush.bf16.msrb.mxu2 %v1535_v4  ;;  %1127 = vmatpush.bf16.msrb.mxu1 %v1118_v7  ;;  %v5362_v10 = vld [vmem:[%s5667_s29 + $0x30] sm:$0xff]  ;;  %v5366_v11 = vld [vmem:[%s5667_s29 + $0x60] sm:$0xff]  ;;  %v5364_v18 = vld [vmem:[%s5667_s29 + $0x48] sm:$0xff]  ;;  %vm1321_vm4 = vcmask 1042432   ;;  %vm1322_vm5 = vcmask 1046532   ;;  %s5357_s17 = sshll.u32 %s7225_s12, 7 }
  0x13   : > { %1914 = vmatpush.bf16.msrb.mxu3 %v1905_v5  ;;  %2584 = vmatpush.bf16.msrb.mxu0 %v2575_v9  ;;  %v5370_v12 = vld [vmem:[%s5667_s29 + $0x90] sm:$0xff]  ;;  %v5358_v13 = vld [vmem:[%s5667_s29] sm:$0xff]  ;;  %v5368_v19 = vld [vmem:[%s5667_s29 + $0x78] sm:$0xff]  ;;  %s6921_s19 = scalar_lea.vmem %s7195_s3, %s5357_s17 }
  0x14   : > { %4935 = vmatmul.msk.bf16.vlgmr.msra.gmra.mxu1 %vm394_vm1, %v5362_v10  ;;  %4939 = vmatmul.msk.bf16.vlgmr.msra.gmra.mxu2 %vm394_vm1, %v5366_v11  ;;  %v5363_v14 = vld [vmem:[%s5667_s29 + $0x3c] sm:$0xff]  ;;  %v5367_v15 = vld [vmem:[%s5667_s29 + $0x6c] sm:$0xff]  ;;  %v5693_v23 = vld [vmem:[%s5667_s29 + $0x4] sm:$0xf] }
  0x15   : > { %4943 = vmatmul.msk.bf16.vlgmr.msra.gmra.mxu3 %vm394_vm1, %v5370_v12  ;;  %4931 = vmatmul.msk.bf16.vlgmr.msra.gmra.mxu0 %vm394_vm1, %v5358_v13  ;;  %v5371_v16 = vld [vmem:[%s5667_s29 + $0x9c] sm:$0xff]  ;;  %v5359_v17 = vld [vmem:[%s5667_s29 + $0xc] sm:$0xff]  ;;  %v645_v28 = vshll.u32 %v5693_v23, 16  ;;  %v649_v29 = vshrl.u32 %v5693_v23, 16  ;;  %v235_v42 = vld [vmem:[%s5667_s29 + $0x8] sm:$0x1] }
  0x16   : > { %v5372_v20 = vld [vmem:[%s5667_s29 + $0xa8] sm:$0xff]  ;;  %v5360_v21 = vld [vmem:[%s5667_s29 + $0x18] sm:$0xff]  ;;  %v5690_v22 = vld [vmem:[%s5667_s29] sm:$0xf]  ;;  %3368 = vmatpush.bf16.msra.mxu2 %v3359_v32  ;;  %2998 = vmatpush.bf16.msra.mxu1 %v2989_v39  ;;  %v655_v52 = vshll.u32 %v235_v42, 16  ;;  %v1326_v55 = vrot.slane %v5693_v23, 5 }
  0x17   : > { %v4997_v24 = vld [vmem:[%s5667_s29 + $0xc] sm:$0xf]  ;;  %v636_v25 = vshrl.u32 %v5690_v22, 16  ;;  %v4998_v26 = vld [vmem:[%s5667_s29 + $0x10] sm:$0xf]  ;;  %v639_v27 = vshll.u32 %v5690_v22, 16  ;;  %4038 = vmatpush.bf16.msra.mxu3 %v4029_v38  ;;  %4452 = vmatpush.bf16.msra.mxu0 %v4443_v41  ;;  %vm5729_vm6 = vmor %vm632_vm2, %vm633_vm3 }
  0x18   : > { %v2093_v31 = vshrl.u32 %v4997_v24, 16  ;;  %v2096_v33 = vshll.u32 %v4997_v24, 16  ;;  %v2102_v36 = vshll.u32 %v4998_v26, 16  ;;  %v2106_v37 = vshrl.u32 %v4998_v26, 16  ;;  %v4999_v51 = vld [vmem:[%s5667_s29 + $0x14] sm:$0x1]  ;;  %vm5735_vm7 = vmor %vm1321_vm4, %vm1322_vm5 }
  0x19   : > { %v638_v43 = vrot.slane %v636_v25, 4  ;;  %v641_v44 = vrot.slane %v639_v27, 5  ;;  %v647_v45 = vrot.slane %v645_v28, 5  ;;  %v651_v46 = vrot.slane %v649_v29, 4  ;;  %v5365_v59 = vld [vmem:[%s5667_s29 + $0x54] sm:$0xff]  ;;  %v5369_v60 = vld [vmem:[%s5667_s29 + $0x84] sm:$0xff] }
  0x1a   : > { %v2095_v47 = vrot.slane %v2093_v31, 4  ;;  %v2098_v48 = vrot.slane %v2096_v33, 5  ;;  %v2104_v49 = vrot.slane %v2102_v36, 5  ;;  %v2108_v50 = vrot.slane %v2106_v37, 4  ;;  %v5373_v61 = vld [vmem:[%s5667_s29 + $0xb4] sm:$0xff]  ;;  %v5361_v62 = vld [vmem:[%s5667_s29 + $0x24] sm:$0xff] }
  0x1b   : > { %v642_v53 = vor.u32 %v641_v44, %v638_v43  ;;  %v652_v54 = vor.u32 %v651_v46, %v647_v45  ;;  %v2112_v58 = vshll.u32 %v4999_v51, 16  ;;  %v657_v63 = vrot.slane %v655_v52, 5  ;;  %v5742_v10 = vld [vmem:[%s5667_s29 + $0xc] sm:$0xf]  ;;  %v5745_v11 = vld [vmem:[%s5667_s29 + $0x10] sm:$0xf] }
  0x1c   : > { %v2099_v56 = vor.u32 %v2098_v48, %v2095_v47  ;;  %v2109_v57 = vor.u32 %v2108_v50, %v2104_v49  ;;  %v4964_v2 = vrot.slane %v5690_v22, 9  ;;  %v1328_v3 = vrot.slane %v1326_v55, 4  ;;  %v238_v34 = vld [vmem:[%s5667_s29 + $0x14] sm:$0x1]  ;;  %v5002_v43 = vld [vmem:[%s5667_s29 + $0x20] sm:$0x1] }
  0x1d   : > { %v643_v0 = vrot.slane %v642_v53, 4  ;;  %v653_v1 = vrot.slane %v652_v54, 4  ;;  %v1329_v5 = vrot.slane %v235_v42, 5  ;;  %v2114_v8 = vrot.slane %v2112_v58, 5  ;;  %v5374_v50 = vld [vmem:[%s5667_s29 + $0xc] sm:$0xff] }
  0x1e   : > { %v2100_v6 = vrot.slane %v2099_v56, 4  ;;  %v2110_v7 = vrot.slane %v2109_v57, 4  ;;  %v669_v22 = vshll.u32 %v5745_v11, 16  ;;  %v673_v23 = vshrl.u32 %v5745_v11, 16  ;;  %v5770_v56 = vld [vmem:[%s5667_s29 + $0x18] sm:$0xf] }
  0x1f   : > { %v648_v12 = vsel %vm5729_vm6, %v643_v0, %v647_v45  ;;  %v658_v13 = vsel %vm5729_vm6, %v653_v1, %v657_v63  ;;  %v679_v45 = vshll.u32 %v238_v34, 16  ;;  %v2136_v54 = vshll.u32 %v5002_v43, 16  ;;  %v5773_v57 = vld [vmem:[%s5667_s29 + $0x1c] sm:$0xf] }
  0x20   : > { %v1021_v28 = vunpack.c.l.b16 %v648_v12  ;;  %v1022_v29 = vunpack.c.l.b16 %v658_v13  ;;  %v671_v37 = vrot.slane %v669_v22, 5  ;;  %v675_v38 = vrot.slane %v673_v23, 4 }
  0x22   : > { %v1053_v44 = vpack.c.b16 %v1022_v29, %v1021_v28  ;;  %v676_v51 = vor.u32 %v675_v38, %v671_v37 }
  0x24   : > { %4936 = vmatmul.msk.bf16.gmra.mxu1 %vm394_vm1, %v5363_v14  ;;  %4940 = vmatmul.msk.bf16.gmra.mxu2 %vm394_vm1, %v5367_v15  ;;  %v5000_v14 = vld [vmem:[%s5667_s29 + $0x18] sm:$0xf]  ;;  %v5001_v15 = vld [vmem:[%s5667_s29 + $0x1c] sm:$0xf]  ;;  %v677_v63 = vrot.slane %v676_v51, 4 }
  0x25   : > { %4944 = vmatmul.msk.bf16.gmra.mxu3 %vm394_vm1, %v5371_v16  ;;  %4932 = vmatmul.msk.bf16.gmra.mxu0 %vm394_vm1, %v5359_v17  ;;  %v1327_v16 = vsel %vm5735_vm7, %v4964_v2, %v1326_v55  ;;  %v1330_v17 = vsel %vm5735_vm7, %v1328_v3, %v1329_v5  ;;  %v2117_v24 = vshrl.u32 %v5000_v14, 16  ;;  %v2120_v25 = vshll.u32 %v5000_v14, 16  ;;  %v5004_v3 = vld [vmem:[%s5667_s29 + $0x28] sm:$0xf] }
  0x26   : > { %v2126_v26 = vshll.u32 %v5001_v15, 16  ;;  %v2130_v27 = vshrl.u32 %v5001_v15, 16  ;;  %v1438_v30 = vunpack.c.l.b16 %v1327_v16  ;;  %v1439_v31 = vunpack.c.l.b16 %v1330_v17 }
  0x27   : > { %v2119_v39 = vrot.slane %v2117_v24, 4  ;;  %v2122_v40 = vrot.slane %v2120_v25, 5  ;;  %v681_v55 = vrot.slane %v679_v45, 5  ;;  %v2138_v2 = vrot.slane %v2136_v54, 5  ;;  %v5375_v45 = vld [vmem:[%s5667_s29 + $0x18] sm:$0xff] }
  0x28   : > { %v2128_v41 = vrot.slane %v2126_v26, 5  ;;  %v2132_v42 = vrot.slane %v2130_v27, 4  ;;  %v1470_v46 = vpack.c.b16 %v1439_v31, %v1438_v30  ;;  %v684_v5 = vshrl.u32 %v5770_v56, 16  ;;  %v241_v26 = vld [vmem:[%s5667_s29 + $0x20] sm:$0x1] }
  0x29   : > { %v2123_v52 = vor.u32 %v2122_v40, %v2119_v39  ;;  %v2150_v14 = vshll.u32 %v5004_v3, 16  ;;  %v2154_v15 = vshrl.u32 %v5004_v3, 16  ;;  %v682_v17 = vsel %vm5729_vm6, %v677_v63, %v681_v55 }
  0x2a   : > { %v2133_v53 = vor.u32 %v2132_v42, %v2128_v41  ;;  %v1024_v30 = vunpack.c.l.b16 %v682_v17  ;;  %v703_v38 = vshll.u32 %v241_v26, 16  ;;  %v1340_v39 = vrot.slane %v5773_v57, 5 }
  0x2b   : > { %v2124_v0 = vrot.slane %v2123_v52, 4  ;;  %v2152_v31 = vrot.slane %v2150_v14, 5  ;;  %v1343_v52 = vrot.slane %v241_v26, 5  ;;  %v244_v14 = vld [vmem:[%s5667_s29 + $0x2c] sm:$0x1] }
  0x2c   : > { %v2134_v1 = vrot.slane %v2133_v53, 4  ;;  %v1342_v51 = vrot.slane %v1340_v39, 4 }
  0x2e   : > { %v1344_v3 = vsel %vm5735_vm7, %v1342_v51, %v1343_v52 }
  0x34   : > { %4937 = vmatmul.msk.bf16.gmra.mxu1 %vm394_vm1, %v5364_v18  ;;  %4941 = vmatmul.msk.bf16.gmra.mxu2 %vm394_vm1, %v5368_v19  ;;  %v2105_v18 = vsel %vm5729_vm6, %v2100_v6, %v2104_v49  ;;  %v2115_v19 = vsel %vm5729_vm6, %v2110_v7, %v2114_v8  ;;  %v1333_v49 = vrot.slane %v5745_v11, 5  ;;  %v687_v6 = vshll.u32 %v5770_v56, 16 }
  0x35   : > { %4945 = vmatmul.msk.bf16.gmra.mxu3 %vm394_vm1, %v5372_v20  ;;  %4933 = vmatmul.msk.bf16.gmra.mxu0 %vm394_vm1, %v5360_v21  ;;  %v660_v20 = vshrl.u32 %v5742_v10, 16  ;;  %v663_v21 = vshll.u32 %v5742_v10, 16  ;;  %v2478_v32 = vunpack.c.l.b16 %v2105_v18  ;;  %v2479_v33 = vunpack.c.l.b16 %v2115_v19 }
  0x36   : > { %v693_v7 = vshll.u32 %v5773_v57, 16  ;;  %v697_v8 = vshrl.u32 %v5773_v57, 16  ;;  %v2129_v18 = vsel %vm5729_vm6, %v2124_v0, %v2128_v41  ;;  %v2139_v19 = vsel %vm5729_vm6, %v2134_v1, %v2138_v2  ;;  %v5806_v57 = vld [vmem:[%s5667_s29 + $0x24] sm:$0xf] }
  0x37   : > { %v662_v35 = vrot.slane %v660_v20, 4  ;;  %v665_v36 = vrot.slane %v663_v21, 5  ;;  %v2510_v47 = vpack.c.b16 %v2479_v33, %v2478_v32  ;;  %v686_v20 = vrot.slane %v684_v5, 4 }
  0x38   : > { %v689_v21 = vrot.slane %v687_v6, 5  ;;  %v695_v22 = vrot.slane %v693_v7, 5  ;;  %v699_v23 = vrot.slane %v697_v8, 4  ;;  %v2156_v32 = vrot.slane %v2154_v15, 4 }
  0x39   : > { %v666_v48 = vor.u32 %v665_v36, %v662_v35  ;;  %v2480_v33 = vunpack.c.l.b16 %v2129_v18  ;;  %v5005_v35 = vld [vmem:[%s5667_s29 + $0x2c] sm:$0x1]  ;;  %v711_v63 = vshll.u32 %v5806_v57, 16 }
  0x3a   : > { %v690_v36 = vor.u32 %v689_v21, %v686_v20  ;;  %v2157_v43 = vor.u32 %v2156_v32, %v2152_v31  ;;  %v1443_v20 = vunpack.c.l.b16 %v1344_v3 }
  0x3b   : > { %v667_v58 = vrot.slane %v666_v48, 4 }
  0x3c   : > { %v2158_v54 = vrot.slane %v2157_v43, 4  ;;  %v5839_v43 = vld [vmem:[%s5667_s29 + $0x34] sm:$0xf] }
  0x3d   : > { %v672_v16 = vsel %vm5729_vm6, %v667_v58, %v671_v37  ;;  %v700_v37 = vor.u32 %v699_v23, %v695_v22  ;;  %v5809_v58 = vld [vmem:[%s5667_s29 + $0x28] sm:$0xf] }
  0x3e   : > { %v1023_v29 = vunpack.c.l.b16 %v672_v16  ;;  %v717_v0 = vshll.u32 %v5809_v58, 16  ;;  %v721_v1 = vshrl.u32 %v5809_v58, 16  ;;  %v713_v16 = vrot.slane %v711_v63, 5 }
  0x3f   : > { %v701_v48 = vrot.slane %v700_v37, 4 }
  0x40   : > { %v1054_v41 = vpack.c.b16 %v1024_v30, %v1023_v29  ;;  %v719_v17 = vrot.slane %v717_v0, 5  ;;  %v723_v18 = vrot.slane %v721_v1, 4 }
  0x42   : > { %v724_v30 = vor.u32 %v723_v18, %v719_v17 }
  0x44   : > { %4938 = vmatmul.msk.bf16.gmra.mxu1 %vm394_vm1, %v5365_v59  ;;  %4942 = vmatmul.msk.bf16.gmra.mxu2 %vm394_vm1, %v5369_v60  ;;  %v4965_v59 = vrot.slane %v5742_v10, 9  ;;  %v1335_v60 = vrot.slane %v1333_v49, 4 }
  0x45   : > { %4946 = vmatmul.msk.bf16.gmra.mxu3 %vm394_vm1, %v5373_v61  ;;  %4934 = vmatmul.msk.bf16.gmra.mxu0 %vm394_vm1, %v5361_v62  ;;  %v1336_v61 = vrot.slane %v238_v34, 5  ;;  %v5003_v62 = vld [vmem:[%s5667_s29 + $0x24] sm:$0xf]  ;;  %v2481_v34 = vunpack.c.l.b16 %v2139_v19 }
  0x46   : > { %v2141_v10 = vshrl.u32 %v5003_v62, 16  ;;  %v2144_v11 = vshll.u32 %v5003_v62, 16  ;;  %v1334_v12 = vsel %vm5735_vm7, %v4965_v59, %v1333_v49  ;;  %v705_v49 = vrot.slane %v703_v38, 5 }
  0x47   : > { %v1337_v13 = vsel %vm5735_vm7, %v1335_v60, %v1336_v61  ;;  %v1440_v24 = vunpack.c.l.b16 %v1334_v12  ;;  %v5006_v60 = vld [vmem:[%s5667_s29 + $0x30] sm:$0xf]  ;;  %v5007_v61 = vld [vmem:[%s5667_s29 + $0x34] sm:$0xf]  ;;  %v708_v62 = vshrl.u32 %v5806_v57, 16 }
  0x48   : > { %v1441_v25 = vunpack.c.l.b16 %v1337_v13  ;;  %v2143_v27 = vrot.slane %v2141_v10, 4  ;;  %v2146_v28 = vrot.slane %v2144_v11, 5  ;;  %v706_v59 = vsel %vm5729_vm6, %v701_v48, %v705_v49 }
  0x49   : > { %v2165_v7 = vshrl.u32 %v5006_v60, 16  ;;  %v2168_v8 = vshll.u32 %v5006_v60, 16  ;;  %v2174_v10 = vshll.u32 %v5007_v61, 16  ;;  %v2178_v11 = vshrl.u32 %v5007_v61, 16 }
  0x4a   : > { %v2147_v40 = vor.u32 %v2146_v28, %v2143_v27  ;;  %v1471_v42 = vpack.c.b16 %v1441_v25, %v1440_v24  ;;  %v1026_v13 = vunpack.c.l.b16 %v706_v59  ;;  %v710_v15 = vrot.slane %v708_v62, 4  ;;  %v5008_v28 = vld [vmem:[%s5667_s29 + $0x38] sm:$0x1] }
  0x4b   : > { %v2167_v23 = vrot.slane %v2165_v7, 4  ;;  %v2170_v24 = vrot.slane %v2168_v8, 5  ;;  %v2176_v25 = vrot.slane %v2174_v10, 5  ;;  %v2180_v26 = vrot.slane %v2178_v11, 4  ;;  %v247_v10 = vld [vmem:[%s5667_s29 + $0x38] sm:$0x1] }
  0x4c   : > { %v2148_v53 = vrot.slane %v2147_v40, 4  ;;  %v727_v27 = vshll.u32 %v244_v14, 16  ;;  %v714_v29 = vor.u32 %v713_v16, %v710_v15  ;;  %v2184_v38 = vshll.u32 %v5008_v28, 16 }
  0x4d   : > { %v2181_v37 = vor.u32 %v2180_v26, %v2176_v25 }
  0x4e   : > { %v2153_v5 = vsel %vm5729_vm6, %v2148_v53, %v2152_v31  ;;  %v715_v40 = vrot.slane %v714_v29, 4  ;;  %v2186_v49 = vrot.slane %v2184_v38, 5  ;;  %v741_v53 = vshll.u32 %v5839_v43, 16  ;;  %v5873_v38 = vld [vmem:[%s5667_s29 + $0x40] sm:$0xf] }
  0x4f   : > { %v2482_v21 = vunpack.c.l.b16 %v2153_v5  ;;  %v2182_v48 = vrot.slane %v2181_v37, 4  ;;  %v5870_v37 = vld [vmem:[%s5667_s29 + $0x3c] sm:$0xf] }
  0x50   : > { %v743_v5 = vrot.slane %v741_v53, 5 }
  0x51   : > { %v2187_v63 = vsel %vm5729_vm6, %v2182_v48, %v2186_v49 }
  0x52   : > { %v2485_v16 = vunpack.c.l.b16 %v2187_v63 }
  0x54   : > { %4948 = vmatmul.msk.bf16.vlgmr.msrb.gmra.mxu1 %vm394_vm1, %v1053_v44  ;;  %4981 = vmatmul.msk.bf16.vlgmr.msrb.gmra.mxu2 %vm394_vm1, %v1470_v46  ;;  %v2160_v44 = vshll.u32 %v5005_v35, 16  ;;  %v2511_v46 = vpack.c.b16 %v2481_v34, %v2480_v33  ;;  %v1347_v33 = vrot.slane %v5809_v58, 5  ;;  %v5376_v34 = vld [vmem:[%s5667_s29 + $0x24] sm:$0xff] }
  0x55   : > { %5110 = vmatmul.msk.bf16.vlgmr.msrb.gmra.mxu3 %vm394_vm1, %v5374_v50  ;;  %5127 = vmatmul.msk.bf16.vlgmr.msrb.gmra.mxu0 %vm394_vm1, %v2510_v47  ;;  %v691_v47 = vrot.slane %v690_v36, 4  ;;  %v4966_v50 = vrot.slane %v5770_v56, 9  ;;  %v2171_v36 = vor.u32 %v2170_v24, %v2167_v23  ;;  %v1354_v23 = vrot.slane %v5839_v43, 5 }
  0x56   : > { %v2162_v55 = vrot.slane %v2160_v44, 5  ;;  %v4967_v44 = vrot.slane %v5806_v57, 9  ;;  %v720_v57 = vsel %vm5729_vm6, %v715_v40, %v719_v17 }
  0x57   : > { %v696_v56 = vsel %vm5729_vm6, %v691_v47, %v695_v22  ;;  %v1341_v2 = vsel %vm5735_vm7, %v4966_v50, %v1340_v39  ;;  %v729_v39 = vrot.slane %v727_v27, 5  ;;  %v2172_v47 = vrot.slane %v2171_v36, 4  ;;  %v5009_v50 = vld [vmem:[%s5667_s29 + $0x3c] sm:$0xf]  ;;  %v5377_v27 = vld [vmem:[%s5667_s29 + $0x30] sm:$0xff] }
  0x58   : > { %v2163_v6 = vsel %vm5729_vm6, %v2158_v54, %v2162_v55  ;;  %v1025_v12 = vunpack.c.l.b16 %v696_v56  ;;  %v1442_v19 = vunpack.c.l.b16 %v1341_v2  ;;  %v745_v54 = vshrl.u32 %v5839_v43, 16  ;;  %v5010_v55 = vld [vmem:[%s5667_s29 + $0x40] sm:$0xf]  ;;  %v5012_v43 = vld [vmem:[%s5667_s29 + $0x48] sm:$0xf] }
  0x59   : > { %v2483_v22 = vunpack.c.l.b16 %v2163_v6  ;;  %v1348_v56 = vsel %vm5735_vm7, %v4967_v44, %v1347_v33  ;;  %v2189_v60 = vshrl.u32 %v5009_v50, 16  ;;  %v2192_v61 = vshll.u32 %v5009_v50, 16  ;;  %v5013_v44 = vld [vmem:[%s5667_s29 + $0x4c] sm:$0xf] }
  0x5a   : > { %v1055_v31 = vpack.c.b16 %v1026_v13, %v1025_v12  ;;  %v1472_v32 = vpack.c.b16 %v1443_v20, %v1442_v19  ;;  %v2177_v62 = vsel %vm5729_vm6, %v2172_v47, %v2176_v25  ;;  %v2198_v0 = vshll.u32 %v5010_v55, 16 }
  0x5b   : > { %v2512_v35 = vpack.c.b16 %v2483_v22, %v2482_v21  ;;  %v2202_v1 = vshrl.u32 %v5010_v55, 16  ;;  %v747_v6 = vrot.slane %v745_v54, 4  ;;  %v1027_v7 = vunpack.c.l.b16 %v720_v57  ;;  %v5011_v22 = vld [vmem:[%s5667_s29 + $0x44] sm:$0x1] }
  0x5c   : > { %v1444_v11 = vunpack.c.l.b16 %v1348_v56  ;;  %v2191_v13 = vrot.slane %v2189_v60, 4  ;;  %v2484_v15 = vunpack.c.l.b16 %v2177_v62  ;;  %v2200_v17 = vrot.slane %v2198_v0, 5 }
  0x5d   : > { %v2204_v18 = vrot.slane %v2202_v1, 4  ;;  %v748_v20 = vor.u32 %v747_v6, %v743_v5  ;;  %v751_v21 = vshll.u32 %v247_v10, 16  ;;  %v1357_v36 = vrot.slane %v247_v10, 5 }
  0x5e   : > { %v2513_v28 = vpack.c.b16 %v2485_v16, %v2484_v15  ;;  %v769_v47 = vshrl.u32 %v5873_v38, 16  ;;  %v2216_v53 = vshll.u32 %v5012_v43, 16  ;;  %v2222_v54 = vshll.u32 %v5013_v44, 16 }
  0x5f   : > { %v2205_v29 = vor.u32 %v2204_v18, %v2200_v17  ;;  %v2226_v55 = vshrl.u32 %v5013_v44, 16  ;;  %v1361_v16 = vrot.slane %v5873_v38, 5 }
  0x60   : > { %v2224_v6 = vrot.slane %v2222_v54, 5 }
  0x61   : > { %v2206_v40 = vrot.slane %v2205_v29, 4  ;;  %v1363_v29 = vrot.slane %v1361_v16, 4 }
  0x64   : > { %4949 = vmatmul.msk.bf16.gmra.mxu1 %vm394_vm1, %v1054_v41  ;;  %4982 = vmatmul.msk.bf16.gmra.mxu2 %vm394_vm1, %v1471_v42  ;;  %v725_v41 = vrot.slane %v724_v30, 4  ;;  %v5836_v42 = vld [vmem:[%s5667_s29 + $0x30] sm:$0xf]  ;;  %v2208_v30 = vshll.u32 %v5011_v22, 16  ;;  %v5378_v22 = vld [vmem:[%s5667_s29 + $0x3c] sm:$0xff] }
  0x65   : > { %5111 = vmatmul.msk.bf16.gmra.mxu3 %vm394_vm1, %v5375_v45  ;;  %5128 = vmatmul.msk.bf16.gmra.mxu0 %vm394_vm1, %v2511_v46  ;;  %v1349_v45 = vrot.slane %v1347_v33, 4  ;;  %v1350_v46 = vrot.slane %v244_v14, 5  ;;  %v732_v51 = vshrl.u32 %v5836_v42, 16  ;;  %v735_v52 = vshll.u32 %v5836_v42, 16 }
  0x66   : > { %v730_v58 = vsel %vm5729_vm6, %v725_v41, %v729_v39  ;;  %v2194_v14 = vrot.slane %v2192_v61, 5  ;;  %v753_v33 = vrot.slane %v751_v21, 5  ;;  %v2210_v41 = vrot.slane %v2208_v30, 5 }
  0x67   : > { %v1351_v59 = vsel %vm5735_vm7, %v1349_v45, %v1350_v46  ;;  %v734_v2 = vrot.slane %v732_v51, 4  ;;  %v737_v3 = vrot.slane %v735_v52, 5  ;;  %v1028_v8 = vunpack.c.l.b16 %v730_v58 }
  0x68   : > { %v1445_v12 = vunpack.c.l.b16 %v1351_v59  ;;  %v2195_v26 = vor.u32 %v2194_v14, %v2191_v13  ;;  %v759_v45 = vshll.u32 %v5870_v37, 16  ;;  %v765_v46 = vshll.u32 %v5873_v38, 16  ;;  %v5015_v38 = vld [vmem:[%s5667_s29 + $0x54] sm:$0xf] }
  0x69   : > { %v738_v19 = vor.u32 %v737_v3, %v734_v2  ;;  %v1056_v24 = vpack.c.b16 %v1028_v8, %v1027_v7  ;;  %v2213_v52 = vshrl.u32 %v5012_v43, 16  ;;  %v2211_v58 = vsel %vm5729_vm6, %v2206_v40, %v2210_v41  ;;  %v250_v2 = vld [vmem:[%s5667_s29 + $0x44] sm:$0x1] }
  0x6a   : > { %v1473_v25 = vpack.c.b16 %v1445_v12, %v1444_v11  ;;  %v2196_v39 = vrot.slane %v2195_v26, 4  ;;  %v761_v59 = vrot.slane %v759_v45, 5  ;;  %v767_v60 = vrot.slane %v765_v46, 5  ;;  %v5014_v11 = vld [vmem:[%s5667_s29 + $0x50] sm:$0x1] }
  0x6b   : > { %v771_v61 = vrot.slane %v769_v47, 4  ;;  %v2215_v3 = vrot.slane %v2213_v52, 4  ;;  %v2228_v7 = vrot.slane %v2226_v55, 4  ;;  %v2487_v10 = vunpack.c.l.b16 %v2211_v58 }
  0x6c   : > { %v2201_v57 = vsel %vm5729_vm6, %v2196_v39, %v2200_v17  ;;  %v775_v14 = vshll.u32 %v250_v2, 16  ;;  %v1364_v30 = vrot.slane %v250_v2, 5  ;;  %v5016_v39 = vld [vmem:[%s5667_s29 + $0x58] sm:$0xf]  ;;  %v2240_v52 = vshll.u32 %v5015_v38, 16 }
  0x6d   : > { %v2486_v8 = vunpack.c.l.b16 %v2201_v57  ;;  %v772_v13 = vor.u32 %v771_v61, %v767_v60  ;;  %v2250_v54 = vshrl.u32 %v5016_v39, 16  ;;  %v253_v2 = vld [vmem:[%s5667_s29 + $0x50] sm:$0x1] }
  0x6e   : > { %v1365_v43 = vsel %vm5735_vm7, %v1363_v29, %v1364_v30  ;;  %v5961_v29 = vld [vmem:[%s5667_s29 + $0x58] sm:$0xf] }
  0x6f   : > { %v773_v26 = vrot.slane %v772_v13, 4 }
  0x74   : > { %4950 = vmatmul.msk.bf16.gmra.mxu1 %vm394_vm1, %v1055_v31  ;;  %4983 = vmatmul.msk.bf16.gmra.mxu2 %vm394_vm1, %v1472_v32  ;;  %v739_v31 = vrot.slane %v738_v19, 4  ;;  %v749_v32 = vrot.slane %v748_v20, 4  ;;  %v2229_v19 = vor.u32 %v2228_v7, %v2224_v6  ;;  %v2232_v20 = vshll.u32 %v5014_v11, 16 }
  0x75   : > { %5112 = vmatmul.msk.bf16.gmra.mxu3 %vm394_vm1, %v5376_v34  ;;  %5129 = vmatmul.msk.bf16.gmra.mxu0 %vm394_vm1, %v2512_v35  ;;  %v4968_v34 = vrot.slane %v5836_v42, 9  ;;  %v1356_v35 = vrot.slane %v1354_v23, 4  ;;  %v756_v42 = vshrl.u32 %v5870_v37, 16  ;;  %v2252_v7 = vrot.slane %v2250_v54, 4 }
  0x76   : > { %v744_v48 = vsel %vm5729_vm6, %v739_v31, %v743_v5  ;;  %v754_v49 = vsel %vm5729_vm6, %v749_v32, %v753_v33  ;;  %v2218_v5 = vrot.slane %v2216_v53, 5  ;;  %v2230_v32 = vrot.slane %v2229_v19, 4  ;;  %v5379_v19 = vld [vmem:[%s5667_s29 + $0x48] sm:$0xff] }
  0x77   : > { %v1355_v50 = vsel %vm5735_vm7, %v4968_v34, %v1354_v23  ;;  %v1358_v51 = vsel %vm5735_vm7, %v1356_v35, %v1357_v36  ;;  %v758_v56 = vrot.slane %v756_v42, 4  ;;  %v1029_v62 = vunpack.c.l.b16 %v744_v48  ;;  %v5909_v34 = vld [vmem:[%s5667_s29 + $0x48] sm:$0xf]  ;;  %v5914_v35 = vld [vmem:[%s5667_s29 + $0x4c] sm:$0xf] }
  0x78   : > { %v1030_v63 = vunpack.c.l.b16 %v754_v49  ;;  %v1446_v0 = vunpack.c.l.b16 %v1355_v50  ;;  %v1447_v1 = vunpack.c.l.b16 %v1358_v51  ;;  %v2219_v18 = vor.u32 %v2218_v5, %v2215_v3 }
  0x79   : > { %v762_v12 = vor.u32 %v761_v59, %v758_v56  ;;  %v2514_v23 = vpack.c.b16 %v2487_v10, %v2486_v8  ;;  %v2234_v33 = vrot.slane %v2232_v20, 5  ;;  %v780_v44 = vshrl.u32 %v5909_v34, 16  ;;  %v5017_v8 = vld [vmem:[%s5667_s29 + $0x5c] sm:$0x1] }
  0x7a   : > { %v1057_v15 = vpack.c.b16 %v1030_v63, %v1029_v62  ;;  %v1474_v17 = vpack.c.b16 %v1447_v1, %v1446_v0  ;;  %v2220_v31 = vrot.slane %v2219_v18, 4  ;;  %v783_v42 = vshll.u32 %v5909_v34, 16 }
  0x7b   : > { %v2235_v47 = vsel %vm5729_vm6, %v2230_v32, %v2234_v33  ;;  %v789_v48 = vshll.u32 %v5914_v35, 16  ;;  %v793_v49 = vshrl.u32 %v5914_v35, 16  ;;  %v2237_v51 = vshrl.u32 %v5015_v38, 16 }
  0x7c   : > { %v2225_v46 = vsel %vm5729_vm6, %v2220_v31, %v2224_v6  ;;  %v2246_v53 = vshll.u32 %v5016_v39, 16  ;;  %v1449_v59 = vunpack.c.l.b16 %v1365_v43  ;;  %v785_v61 = vrot.slane %v783_v42, 5 }
  0x7d   : > { %v2488_v62 = vunpack.c.l.b16 %v2225_v46  ;;  %v2489_v63 = vunpack.c.l.b16 %v2235_v47  ;;  %v791_v0 = vrot.slane %v789_v48, 5  ;;  %v795_v1 = vrot.slane %v793_v49, 4 }
  0x7e   : > { %v2239_v3 = vrot.slane %v2237_v51, 4  ;;  %v2242_v5 = vrot.slane %v2240_v52, 5  ;;  %v5943_v6 = vrot.slane %v2246_v53, 5  ;;  %v4970_v32 = vrot.slane %v5909_v34, 9 }
  0x7f   : > { %v2515_v20 = vpack.c.b16 %v2489_v63, %v2488_v62  ;;  %v813_v42 = vshll.u32 %v5961_v29, 16  ;;  %v817_v46 = vshrl.u32 %v5961_v29, 16 }
  0x84   : > { %4951 = vmatmul.msk.bf16.gmra.mxu1 %vm394_vm1, %v1056_v24  ;;  %4984 = vmatmul.msk.bf16.gmra.mxu2 %vm394_vm1, %v1473_v25  ;;  %v763_v25 = vrot.slane %v762_v12, 4 }
  0x85   : > { %5113 = vmatmul.msk.bf16.gmra.mxu3 %vm394_vm1, %v5377_v27  ;;  %5130 = vmatmul.msk.bf16.gmra.mxu0 %vm394_vm1, %v2513_v28  ;;  %v777_v27 = vrot.slane %v775_v14, 5  ;;  %v4969_v28 = vrot.slane %v5870_v37, 9 }
  0x86   : > { %v768_v36 = vsel %vm5729_vm6, %v763_v25, %v767_v60  ;;  %v782_v60 = vrot.slane %v780_v44, 4  ;;  %v2256_v25 = vshll.u32 %v5017_v8, 16 }
  0x87   : > { %v778_v37 = vsel %vm5729_vm6, %v773_v26, %v777_v27  ;;  %v1362_v41 = vsel %vm5735_vm7, %v4969_v28, %v1361_v16  ;;  %v1031_v57 = vunpack.c.l.b16 %v768_v36  ;;  %v799_v16 = vshll.u32 %v253_v2, 16  ;;  %v5958_v28 = vld [vmem:[%s5667_s29 + $0x54] sm:$0xf] }
  0x88   : > { %v1032_v58 = vunpack.c.l.b16 %v778_v37  ;;  %v1448_v56 = vunpack.c.l.b16 %v1362_v41  ;;  %v786_v12 = vor.u32 %v785_v61, %v782_v60  ;;  %v1371_v36 = vrot.slane %v253_v2, 5  ;;  %v5019_v41 = vld [vmem:[%s5667_s29 + $0x64] sm:$0xf] }
  0x89   : > { %v801_v31 = vrot.slane %v799_v16, 5  ;;  %v2258_v39 = vrot.slane %v2256_v25, 5  ;;  %v804_v43 = vshrl.u32 %v5958_v28, 16  ;;  %v807_v44 = vshll.u32 %v5958_v28, 16 }
  0x8a   : > { %v1058_v11 = vpack.c.b16 %v1032_v58, %v1031_v57  ;;  %v1475_v14 = vpack.c.b16 %v1449_v59, %v1448_v56  ;;  %v787_v27 = vrot.slane %v786_v12, 4  ;;  %v2270_v53 = vshll.u32 %v5019_v41, 16 }
  0x8b   : > { %v2274_v54 = vshrl.u32 %v5019_v41, 16  ;;  %v806_v62 = vrot.slane %v804_v43, 4  ;;  %v809_v63 = vrot.slane %v807_v44, 5  ;;  %v1375_v25 = vrot.slane %v5961_v29, 5  ;;  %v6017_v29 = vld [vmem:[%s5667_s29 + $0x64] sm:$0xf] }
  0x8c   : > { %v792_v51 = vsel %vm5729_vm6, %v787_v27, %v791_v0 }
  0x8d   : > { %v1033_v2 = vunpack.c.l.b16 %v792_v51 }
  0x91   : > { %v5900_v21 = vpop.f32.mrf.mxu1 }
  0x92   : > { %v5903_v24 = vpop.f32.mrf.mxu0 }
  0x94   : > { %4952 = vmatmul.msk.bf16.gmra.mxu1 %vm394_vm1, %v1057_v15  ;;  %4985 = vmatmul.msk.bf16.gmra.mxu2 %vm394_vm1, %v1474_v17  ;;  %v796_v15 = vor.u32 %v795_v1, %v791_v0  ;;  %v1368_v17 = vrot.slane %v5914_v35, 5  ;;  %v5018_v35 = vld [vmem:[%s5667_s29 + $0x60] sm:$0xf]  ;;  %v5995_v0 = vrot.slane %v813_v42, 5  ;;  %v819_v1 = vrot.slane %v817_v46, 4 }
  0x95   : > { %5114 = vmatmul.msk.bf16.gmra.mxu3 %vm394_vm1, %v5378_v22  ;;  %5131 = vmatmul.msk.bf16.gmra.mxu0 %vm394_vm1, %v2514_v23  ;;  %v2243_v22 = vor.u32 %v2242_v5, %v2239_v3  ;;  %v2253_v23 = vor.u32 %v2252_v7, %v5943_v6  ;;  %v2261_v47 = vshrl.u32 %v5018_v35, 16  ;;  %v2264_v48 = vshll.u32 %v5018_v35, 16  ;;  %v256_v5 = vld [vmem:[%s5667_s29 + $0x5c] sm:$0x1] }
  0x96   : > { %v797_v30 = vrot.slane %v796_v15, 4  ;;  %v1370_v33 = vrot.slane %v1368_v17, 4  ;;  %v1369_v58 = vsel %vm5735_vm7, %v4970_v32, %v1368_v17  ;;  %v5020_v17 = vld [vmem:[%s5667_s29 + $0x68] sm:$0x1]  ;;  %v4971_v46 = vrot.slane %v5958_v28, 9 }
  0x97   : > { %v5922_v40 = vpop.f32.mrf.mxu2  ;;  %v2244_v37 = vrot.slane %v2243_v22, 4  ;;  %v2254_v38 = vrot.slane %v2253_v23, 4  ;;  %v2263_v7 = vrot.slane %v2261_v47, 4  ;;  %v2266_v8 = vrot.slane %v2264_v48, 5 }
  0x98   : > { %v5930_v45 = vpop.f32.mrf.mxu3  ;;  %v802_v52 = vsel %vm5729_vm6, %v797_v30, %v801_v31  ;;  %v1372_v56 = vsel %vm5735_vm7, %v1370_v33, %v1371_v36  ;;  %v823_v22 = vshll.u32 %v256_v5, 16  ;;  %v2280_v35 = vshll.u32 %v5020_v17, 16 }
  0x99   : > { %v5938_v50 = vpop.f32.mrf.mxu1  ;;  %v2249_v59 = vsel %vm5729_vm6, %v2244_v37, %v5943_v6  ;;  %v2259_v60 = vsel %vm5729_vm6, %v2254_v38, %v2258_v39  ;;  %v1034_v3 = vunpack.c.l.b16 %v802_v52  ;;  %v1451_v12 = vunpack.c.l.b16 %v1372_v56  ;;  %v5380_v37 = vld [vmem:[%s5667_s29 + $0x54] sm:$0xff]  ;;  %v6012_v39 = vld [vmem:[%s5667_s29 + $0x60] sm:$0xf] }
  0x9a   : > { %v5940_v55 = vpop.f32.mrf.mxu0  ;;  %v2276_v6 = vrot.slane %v2274_v54, 4  ;;  %v2490_v15 = vunpack.c.l.b16 %v2249_v59  ;;  %v2491_v16 = vunpack.c.l.b16 %v2259_v60  ;;  %v2267_v27 = vor.u32 %v2266_v8, %v2263_v7  ;;  %v5021_v59 = vld [vmem:[%s5667_s29 + $0x6c] sm:$0xf] }
  0x9b   : > { %v1059_v31 = vpack.c.b16 %v1034_v3, %v1033_v2  ;;  %v825_v42 = vrot.slane %v823_v22, 5  ;;  %v1377_v47 = vrot.slane %v1375_v25, 4  ;;  %v1378_v48 = vrot.slane %v256_v5, 5  ;;  %v5022_v3 = vld [vmem:[%s5667_s29 + $0x70] sm:$0xf] }
  0x9c   : > { %v2516_v38 = vpack.c.b16 %v2491_v16, %v2490_v15  ;;  %v2268_v51 = vrot.slane %v2267_v27, 4  ;;  %v828_v54 = vshrl.u32 %v6012_v39, 16  ;;  %v837_v28 = vshll.u32 %v6017_v29, 16 }
  0x9d   : > { %v841_v56 = vshrl.u32 %v6017_v29, 16  ;;  %v1379_v2 = vsel %vm5735_vm7, %v1377_v47, %v1378_v48  ;;  %v2285_v16 = vshrl.u32 %v5021_v59, 16  ;;  %v2288_v17 = vshll.u32 %v5021_v59, 16  ;;  %v5381_v59 = vld [vmem:[%s5667_s29 + $0x60] sm:$0xff] }
  0x9e   : > { %v830_v8 = vrot.slane %v828_v54, 4  ;;  %v2294_v22 = vshll.u32 %v5022_v3, 16 }
  0x9f   : > { %v5946_v10 = vpop.f32.mrf.mxu2  ;;  %v843_v15 = vrot.slane %v841_v56, 4 }
  0xa0   : > { %v5948_v13 = vpop.f32.mrf.mxu3 }
  0xa1   : > { %v5951_v18 = vpop.f32.mrf.mxu1 }
  0xa2   : > { %v5955_v26 = vpop.f32.mrf.mxu0 }
  0xa4   : > { %4953 = vmatmul.msk.bf16.gmra.mxu1 %vm394_vm1, %v1058_v11  ;;  %4986 = vmatmul.msk.bf16.gmra.mxu2 %vm394_vm1, %v1475_v14  ;;  %v1450_v11 = vunpack.c.l.b16 %v1369_v58  ;;  %v5998_v14 = vrot.slane %v2270_v53, 5  ;;  %v2282_v53 = vrot.slane %v2280_v35, 5  ;;  %v831_v58 = vshll.u32 %v6012_v39, 16 }
  0xa5   : > { %5115 = vmatmul.msk.bf16.gmra.mxu3 %vm394_vm1, %v5379_v19  ;;  %5132 = vmatmul.msk.bf16.gmra.mxu0 %vm394_vm1, %v2515_v20  ;;  %v810_v19 = vor.u32 %v809_v63, %v806_v62  ;;  %v820_v20 = vor.u32 %v819_v1, %v5995_v0  ;;  %v1376_v1 = vsel %vm5735_vm7, %v4971_v46, %v1375_v25  ;;  %v2298_v25 = vshrl.u32 %v5022_v3, 16 }
  0xa6   : > { %v1476_v32 = vpack.c.b16 %v1451_v12, %v1450_v11  ;;  %v2277_v33 = vor.u32 %v2276_v6, %v5998_v14  ;;  %v2273_v7 = vsel %vm5729_vm6, %v2268_v51, %v5998_v14  ;;  %v833_v11 = vrot.slane %v831_v58, 5 }
  0xa7   : > { %v5974_v34 = vpop.f32.mrf.mxu2  ;;  %v811_v43 = vrot.slane %v810_v19, 4  ;;  %v821_v44 = vrot.slane %v820_v20, 4  ;;  %v6050_v6 = vrot.slane %v837_v28, 5  ;;  %v259_v20 = vld [vmem:[%s5667_s29 + $0x68] sm:$0x1]  ;;  %v6056_v46 = vrot.slane %v2294_v22, 5 }
  0xa8   : > { %v5976_v49 = vpop.f32.mrf.mxu3  ;;  %v2278_v52 = vrot.slane %v2277_v33, 4  ;;  %v2492_v33 = vunpack.c.l.b16 %v2273_v7  ;;  %v2300_v47 = vrot.slane %v2298_v25, 4  ;;  %v1382_v51 = vrot.slane %v6017_v29, 5  ;;  %v5024_v22 = vld [vmem:[%s5667_s29 + $0x78] sm:$0xf] }
  0xa9   : > { %v5982_v57 = vpop.f32.mrf.mxu1  ;;  %v816_v62 = vsel %vm5729_vm6, %v811_v43, %v5995_v0  ;;  %v826_v63 = vsel %vm5729_vm6, %v821_v44, %v825_v42  ;;  %v847_v43 = vshll.u32 %v259_v20, 16  ;;  %v2287_v44 = vrot.slane %v2285_v16, 4  ;;  %v6077_v16 = vld [vmem:[%s5667_s29 + $0x70] sm:$0xf]  ;;  %v5025_v25 = vld [vmem:[%s5667_s29 + $0x7c] sm:$0xf] }
  0xaa   : > { %v5993_v61 = vpop.f32.mrf.mxu0  ;;  %v2283_v0 = vsel %vm5729_vm6, %v2278_v52, %v2282_v53  ;;  %v1035_v27 = vunpack.c.l.b16 %v816_v62  ;;  %v1036_v14 = vunpack.c.l.b16 %v826_v63  ;;  %v2290_v42 = vrot.slane %v2288_v17, 5  ;;  %v5023_v52 = vld [vmem:[%s5667_s29 + $0x74] sm:$0x1] }
  0xab   : > { %v2493_v35 = vunpack.c.l.b16 %v2283_v0  ;;  %v2301_v29 = vor.u32 %v2300_v47, %v6056_v46  ;;  %v2304_v7 = vshll.u32 %v5023_v52, 16  ;;  %v4972_v0 = vrot.slane %v6012_v39, 9 }
  0xac   : > { %v1060_v54 = vpack.c.b16 %v1036_v14, %v1035_v27  ;;  %v2318_v47 = vshll.u32 %v5025_v25, 16  ;;  %v2322_v52 = vshrl.u32 %v5025_v25, 16 }
  0xad   : > { %v2517_v28 = vpack.c.b16 %v2493_v35, %v2492_v33  ;;  %v2302_v27 = vrot.slane %v2301_v29, 4  ;;  %v2306_v14 = vrot.slane %v2304_v7, 5  ;;  %v1383_v35 = vsel %vm5735_vm7, %v4972_v0, %v1382_v51 }
  0xaf   : > { %v6002_v23 = vpop.f32.mrf.mxu2 }
  0xb0   : > { %v6005_v30 = vpop.f32.mrf.mxu3 }
  0xb1   : > { %7200 = vst [vmem:[#allocation3_spill] sm:$0xff] %v6005_v30  ;;  %v6008_v36 = vpop.f32.mrf.mxu1 }
  0xb2   : > { %v6014_v41 = vpop.f32.mrf.mxu0 }
  0xb4   : > { %4954 = vmatmul.msk.bf16.gmra.mxu1 %vm394_vm1, %v1059_v31  ;;  %4987 = vmatmul.msk.bf16.gmra.mxu2 %vm394_vm1, %v1476_v32  ;;  %v1452_v31 = vunpack.c.l.b16 %v1376_v1  ;;  %v1453_v32 = vunpack.c.l.b16 %v1379_v2  ;;  %v849_v1 = vrot.slane %v847_v43, 5  ;;  %v2291_v2 = vor.u32 %v2290_v42, %v2287_v44 }
  0xb5   : > { %5116 = vmatmul.msk.bf16.gmra.mxu3 %vm394_vm1, %v5380_v37  ;;  %5133 = vmatmul.msk.bf16.gmra.mxu0 %vm394_vm1, %v2516_v38  ;;  %v834_v37 = vor.u32 %v833_v11, %v830_v8  ;;  %v844_v38 = vor.u32 %v843_v15, %v6050_v6  ;;  %v1384_v8 = vrot.slane %v1382_v51, 4  ;;  %v1385_v11 = vrot.slane %v259_v20, 5  ;;  %v6072_v15 = vld [vmem:[%s5667_s29 + $0x6c] sm:$0xf] }
  0xb6   : > { %v1477_v58 = vpack.c.b16 %v1453_v32, %v1452_v31  ;;  %v2292_v20 = vrot.slane %v2291_v2, 4  ;;  %v852_v31 = vshrl.u32 %v6072_v15, 16  ;;  %v855_v32 = vshll.u32 %v6072_v15, 16 }
  0xb7   : > { %v6029_v60 = vpop.f32.mrf.mxu2  ;;  %v835_v62 = vrot.slane %v834_v37, 4  ;;  %v845_v63 = vrot.slane %v844_v38, 4  ;;  %v861_v37 = vshll.u32 %v6077_v16, 16  ;;  %v865_v38 = vshrl.u32 %v6077_v16, 16 }
  0xb8   : > { %v6041_v5 = vpop.f32.mrf.mxu3  ;;  %v2309_v44 = vshrl.u32 %v5024_v22, 16  ;;  %v2312_v42 = vshll.u32 %v5024_v22, 16  ;;  %v2297_v51 = vsel %vm5729_vm6, %v2292_v20, %v6056_v46  ;;  %v1454_v2 = vunpack.c.l.b16 %v1383_v35  ;;  %v5026_v46 = vld [vmem:[%s5667_s29 + $0x80] sm:$0x1] }
  0xb9   : > { %7201 = vst [vmem:[#allocation4_spill] sm:$0xff] %v6041_v5  ;;  %v6048_v12 = vpop.f32.mrf.mxu1  ;;  %v840_v17 = vsel %vm5729_vm6, %v835_v62, %v6050_v6  ;;  %v850_v39 = vsel %vm5729_vm6, %v845_v63, %v849_v1  ;;  %v1386_v6 = vsel %vm5735_vm7, %v1384_v8, %v1385_v11  ;;  %v2307_v62 = vsel %vm5729_vm6, %v2302_v27, %v2306_v14  ;;  %v262_v8 = vld [vmem:[%s5667_s29 + $0x74] sm:$0x1] }
  0xba   : > { %v6052_v19 = vpop.f32.mrf.mxu0  ;;  %v854_v63 = vrot.slane %v852_v31, 4  ;;  %v857_v1 = vrot.slane %v855_v32, 5  ;;  %v1455_v29 = vunpack.c.l.b16 %v1386_v6  ;;  %v6109_v7 = vrot.slane %v861_v37, 5 }
  0xbb   : > { %v867_v0 = vrot.slane %v865_v38, 4  ;;  %v2311_v11 = vrot.slane %v2309_v44, 4  ;;  %v2324_v22 = vrot.slane %v2322_v52, 4  ;;  %v2494_v25 = vunpack.c.l.b16 %v2297_v51 }
  0xbc   : > { %v858_v20 = vor.u32 %v857_v1, %v854_v63  ;;  %v871_v31 = vshll.u32 %v262_v8, 16  ;;  %v1389_v32 = vrot.slane %v6077_v16, 5  ;;  %v1478_v6 = vpack.c.b16 %v1455_v29, %v1454_v2  ;;  %v6128_v2 = vld [vmem:[%s5667_s29 + $0x78] sm:$0xf] }
  0xbd   : > { %v868_v14 = vor.u32 %v867_v0, %v6109_v7  ;;  %v2328_v44 = vshll.u32 %v5026_v46, 16  ;;  %v4973_v16 = vrot.slane %v6072_v15, 9  ;;  %v1392_v29 = vrot.slane %v262_v8, 5  ;;  %v5028_v46 = vld [vmem:[%s5667_s29 + $0x88] sm:$0xf] }
  0xbe   : > { %v873_v63 = vrot.slane %v871_v31, 5  ;;  %v1391_v1 = vrot.slane %v1389_v32, 4 }
  0xbf   : > { %v6058_v48 = vpop.f32.mrf.mxu2 }
  0xc0   : > { %v6062_v53 = vpop.f32.mrf.mxu3 }
  0xc1   : > { %7202 = vst [vmem:[#allocation5_spill] sm:$0xff] %v6062_v53  ;;  %v6064_v56 = vpop.f32.mrf.mxu1 }
  0xc2   : > { %v6067_v3 = vpop.f32.mrf.mxu0 }
  0xc4   : > { %4955 = vmatmul.msk.bf16.gmra.mxu1 %vm394_vm1, %v1060_v54  ;;  %4988 = vmatmul.msk.bf16.gmra.mxu2 %vm394_vm1, %v1477_v58  ;;  %v1037_v58 = vunpack.c.l.b16 %v840_v17  ;;  %v2314_v17 = vrot.slane %v2312_v42, 5 }
  0xc5   : > { %5117 = vmatmul.msk.bf16.gmra.mxu3 %vm394_vm1, %v5381_v59  ;;  %5134 = vmatmul.msk.bf16.gmra.mxu0 %vm394_vm1, %v2517_v28  ;;  %v1038_v28 = vunpack.c.l.b16 %v850_v39  ;;  %v6112_v39 = vrot.slane %v2318_v47, 5  ;;  %v5382_v47 = vld [vmem:[%s5667_s29 + $0x6c] sm:$0xff] }
  0xc6   : > { %v2315_v37 = vor.u32 %v2314_v17, %v2311_v11  ;;  %v6133_v11 = vld [vmem:[%s5667_s29 + $0x7c] sm:$0xf]  ;;  %v876_v17 = vshrl.u32 %v6128_v2, 16 }
  0xc7   : > { %v6090_v33 = vpop.f32.mrf.mxu2  ;;  %v1061_v27 = vpack.c.b16 %v1038_v28, %v1037_v58  ;;  %v2325_v38 = vor.u32 %v2324_v22, %v6112_v39  ;;  %v859_v28 = vrot.slane %v858_v20, 4  ;;  %v879_v22 = vshll.u32 %v6128_v2, 16 }
  0xc8   : > { %v6098_v43 = vpop.f32.mrf.mxu3  ;;  %v889_v31 = vshrl.u32 %v6133_v11, 16 }
  0xc9   : > { %7203 = vst [vmem:[#allocation6_spill] sm:$0xff] %v6098_v43  ;;  %v6100_v54 = vpop.f32.mrf.mxu1  ;;  %v2495_v43 = vunpack.c.l.b16 %v2307_v62  ;;  %v869_v62 = vrot.slane %v868_v14, 4  ;;  %v2326_v0 = vrot.slane %v2325_v38, 4  ;;  %v864_v15 = vsel %vm5729_vm6, %v859_v28, %v6109_v7 }
  0xca   : > { %v6102_v59 = vpop.f32.mrf.mxu0  ;;  %v885_v14 = vshll.u32 %v6133_v11, 16  ;;  %v1393_v7 = vsel %vm5735_vm7, %v1391_v1, %v1392_v29  ;;  %v2346_v28 = vshrl.u32 %v5028_v46, 16  ;;  %v881_v1 = vrot.slane %v879_v22, 5 }
  0xcb   : > { %v2518_v52 = vpack.c.b16 %v2495_v43, %v2494_v25  ;;  %v2316_v43 = vrot.slane %v2315_v37, 4  ;;  %v5027_v25 = vld [vmem:[%s5667_s29 + $0x84] sm:$0xf]  ;;  %v874_v20 = vsel %vm5729_vm6, %v869_v62, %v873_v63  ;;  %v1039_v29 = vunpack.c.l.b16 %v864_v15 }
  0xcd   : > { %v2321_v38 = vsel %vm5729_vm6, %v2316_v43, %v6112_v39  ;;  %v891_v39 = vrot.slane %v889_v31, 4 }
  0xcf   : > { %v6115_v53 = vpop.f32.mrf.mxu2 }
  0xd0   : > { %v6119_v35 = vpop.f32.mrf.mxu3 }
  0xd1   : > { %7204 = vst [vmem:[#allocation7_spill] sm:$0xff] %v6119_v35  ;;  %v1129_v42 = vpop.f32.mrf.mxu1  ;;  %v6158_v35 = vrot.slane %v885_v14, 5 }
  0xd2   : > { %v1209_v51 = vadd.f32 %v1129_v42, %v5903_v24  ;;  %v6124_v58 = vpop.f32.mrf.mxu0  ;;  %v2330_v24 = vrot.slane %v2328_v44, 5 }
  0xd3   : > { %v892_v15 = vor.u32 %v891_v39, %v6158_v35 }
  0xd4   : > { %4956 = vmatmul.msk.bf16.gmra.mxu1 %vm394_vm1, %v1061_v27  ;;  %4989 = vmatmul.msk.bf16.gmra.mxu2 %vm394_vm1, %v1478_v6  ;;  %v1390_v27 = vsel %vm5735_vm7, %v4973_v16, %v1389_v32  ;;  %v2331_v44 = vsel %vm5729_vm6, %v2326_v0, %v2330_v24  ;;  %v2342_v32 = vshll.u32 %v5028_v46, 16  ;;  %v878_v16 = vrot.slane %v876_v17, 4  ;;  %v5029_v17 = vld [vmem:[%s5667_s29 + $0x8c] sm:$0x1] }
  0xd5   : > { %5118 = vmatmul.msk.bf16.gmra.mxu3 %vm394_vm1, %v5382_v47  ;;  %5135 = vmatmul.msk.bf16.gmra.mxu0 %vm394_vm1, %v2518_v52  ;;  %v2333_v47 = vshrl.u32 %v5027_v25, 16  ;;  %v2336_v52 = vshll.u32 %v5027_v25, 16  ;;  %v1456_v43 = vunpack.c.l.b16 %v1390_v27  ;;  %v1457_v0 = vunpack.c.l.b16 %v1393_v7  ;;  %v265_v25 = vld [vmem:[%s5667_s29 + $0x80] sm:$0x1] }
  0xd6   : > { %v2496_v24 = vunpack.c.l.b16 %v2321_v38  ;;  %v2497_v5 = vunpack.c.l.b16 %v2331_v44  ;;  %v895_v22 = vshll.u32 %v265_v25, 16  ;;  %v1396_v7 = vrot.slane %v6133_v11, 5  ;;  %v5383_v44 = vld [vmem:[%s5667_s29 + $0x78] sm:$0xff]  ;;  %v6173_v11 = vld [vmem:[%s5667_s29 + $0x84] sm:$0xf] }
  0xd7   : > { %v1546_v8 = vpop.f32.mrf.mxu2  ;;  %v2335_v30 = vrot.slane %v2333_v47, 4  ;;  %v2338_v46 = vrot.slane %v2336_v52, 5  ;;  %v1479_v27 = vpack.c.b16 %v1457_v0, %v1456_v43  ;;  %v6181_v43 = vld [vmem:[%s5667_s29 + $0x88] sm:$0xf] }
  0xd8   : > { %v1626_v6 = vadd.f32 %v1546_v8, %v1209_v51  ;;  %v1916_v37 = vpop.f32.mrf.mxu3  ;;  %v1040_v8 = vunpack.c.l.b16 %v874_v20  ;;  %v2519_v47 = vpack.c.b16 %v2497_v5, %v2496_v24 }
  0xd9   : > { %v1131_v42 = vpop.f32.mrf.mxu1  ;;  %v2339_v52 = vor.u32 %v2338_v46, %v2335_v30  ;;  %v1398_v30 = vrot.slane %v1396_v7, 4 }
  0xda   : > { %v1996_v62 = vadd.f32 %v1916_v37, %v1626_v6  ;;  %v1210_v51 = vadd.f32 %v1131_v42, %v5940_v55  ;;  %v2588_v63 = vpop.f32.mrf.mxu0  ;;  %v6161_v6 = vrot.slane %v2342_v32, 5  ;;  %v2348_v55 = vrot.slane %v2346_v28, 4 }
  0xdb   : > { %v882_v37 = vor.u32 %v881_v1, %v878_v16  ;;  %v1062_v31 = vpack.c.b16 %v1040_v8, %v1039_v29  ;;  %v2352_v28 = vshll.u32 %v5029_v17, 16  ;;  %v897_v29 = vrot.slane %v895_v22, 5 }
  0xdc   : > { %v2349_v32 = vor.u32 %v2348_v55, %v6161_v6  ;;  %v4974_v8 = vrot.slane %v6128_v2, 9  ;;  %v6176_v5 = vadd.f32 %v6124_v58, %v1996_v62  ;;  %v2340_v2 = vrot.slane %v2339_v52, 4  ;;  %v5030_v58 = vld [vmem:[%s5667_s29 + $0x90] sm:$0xf] }
  0xdd   : > { %v2354_v46 = vrot.slane %v2352_v28, 5  ;;  %v900_v55 = vshrl.u32 %v6173_v11, 16  ;;  %v909_v22 = vshll.u32 %v6181_v43, 16 }
  0xde   : > { %v2350_v24 = vrot.slane %v2349_v32, 4 }
  0xdf   : > { %v1548_v42 = vpop.f32.mrf.mxu2 }
  0xe0   : > { %v1627_v20 = vadd.f32 %v1548_v42, %v1210_v51  ;;  %v1918_v14 = vpop.f32.mrf.mxu3  ;;  %v883_v51 = vrot.slane %v882_v37, 4  ;;  %v893_v42 = vrot.slane %v892_v15, 4  ;;  %v5031_v37 = vld [vmem:[%s5667_s29 + $0x94] sm:$0xf]  ;;  %v1397_v15 = vsel %vm5735_vm7, %v4974_v8, %v1396_v7 }
  0xe1   : > { %v1134_v38 = vpop.f32.mrf.mxu1  ;;  %v2355_v7 = vsel %vm5729_vm6, %v2350_v24, %v2354_v46  ;;  %v2366_v52 = vshll.u32 %v5031_v37, 16  ;;  %v2370_v32 = vshrl.u32 %v5031_v37, 16 }
  0xe2   : > { %v1997_v16 = vadd.f32 %v1918_v14, %v1627_v20  ;;  %v1211_v1 = vadd.f32 %v1134_v38, %v5955_v26  ;;  %v6169_v39 = vpop.f32.mrf.mxu0  ;;  %v1399_v26 = vrot.slane %v265_v25, 5  ;;  %v888_v62 = vsel %vm5729_vm6, %v883_v51, %v6158_v35 }
  0xe3   : > { %v903_v25 = vshll.u32 %v6173_v11, 16  ;;  %v913_v20 = vshrl.u32 %v6181_v43, 16  ;;  %v2360_v38 = vshll.u32 %v5030_v58, 16  ;;  %v902_v51 = vrot.slane %v900_v55, 4  ;;  %v5032_v55 = vld [vmem:[%s5667_s29 + $0x98] sm:$0x1] }
  0xe4   : > { %4957 = vmatmul.msk.bf16.gmra.mxu1 %vm394_vm1, %v1062_v31  ;;  %4990 = vmatmul.msk.bf16.gmra.mxu2 %vm394_vm1, %v1479_v27  ;;  %v6183_v0 = vadd.f32 %v2588_v63, %v1997_v16  ;;  %v898_v63 = vsel %vm5729_vm6, %v893_v42, %v897_v29  ;;  %v1400_v35 = vsel %vm5735_vm7, %v1398_v30, %v1399_v26  ;;  %v2357_v27 = vshrl.u32 %v5030_v58, 16 }
  0xe5   : > { %5119 = vmatmul.msk.bf16.gmra.mxu3 %vm394_vm1, %v5383_v44  ;;  %5136 = vmatmul.msk.bf16.gmra.mxu0 %vm394_vm1, %v2519_v47  ;;  %v2345_v47 = vsel %vm5729_vm6, %v2340_v2, %v6161_v6  ;;  %v905_v42 = vrot.slane %v903_v25, 5  ;;  %v1041_v29 = vunpack.c.l.b16 %v888_v62  ;;  %v1042_v8 = vunpack.c.l.b16 %v898_v63  ;;  %v268_v6 = vld [vmem:[%s5667_s29 + $0x8c] sm:$0x1] }
  0xe6   : > { %7205 = vst [vmem:[#allocation8_spill] sm:$0xff] %v6183_v0  ;;  %v6208_v30 = vrot.slane %v909_v22, 5  ;;  %v915_v26 = vrot.slane %v913_v20, 4  ;;  %v1458_v58 = vunpack.c.l.b16 %v1397_v15  ;;  %v2359_v2 = vrot.slane %v2357_v27, 4 }
  0xe7   : > { %v1551_v17 = vpop.f32.mrf.mxu2  ;;  %v2362_v0 = vrot.slane %v2360_v38, 5  ;;  %v2498_v24 = vunpack.c.l.b16 %v2345_v47  ;;  %v2499_v46 = vunpack.c.l.b16 %v2355_v7  ;;  %v6211_v37 = vrot.slane %v2366_v52, 5 }
  0xe8   : > { %v1628_v14 = vadd.f32 %v1551_v17, %v1211_v1  ;;  %v1921_v31 = vpop.f32.mrf.mxu3  ;;  %v1459_v17 = vunpack.c.l.b16 %v1400_v35  ;;  %v916_v62 = vor.u32 %v915_v26, %v6208_v30  ;;  %v919_v25 = vshll.u32 %v268_v6, 16 }
  0xe9   : > { %v1136_v44 = vpop.f32.mrf.mxu1  ;;  %v1403_v63 = vrot.slane %v6181_v43, 5  ;;  %v1063_v20 = vpack.c.b16 %v1042_v8, %v1041_v29  ;;  %v2363_v27 = vor.u32 %v2362_v0, %v2359_v2  ;;  %v2520_v47 = vpack.c.b16 %v2499_v46, %v2498_v24  ;;  %v5033_v24 = vld [vmem:[%s5667_s29 + $0x9c] sm:$0xf] }
  0xea   : > { %v1998_v28 = vadd.f32 %v1921_v31, %v1628_v14  ;;  %v1212_v16 = vadd.f32 %v1136_v44, %v5993_v61  ;;  %v2593_v1 = vpop.f32.mrf.mxu0  ;;  %v2372_v61 = vrot.slane %v2370_v32, 4  ;;  %v906_v14 = vor.u32 %v905_v42, %v902_v51  ;;  %v5384_v44 = vld [vmem:[%s5667_s29 + $0x84] sm:$0xff] }
  0xeb   : > { %v1480_v35 = vpack.c.b16 %v1459_v17, %v1458_v58  ;;  %v2376_v52 = vshll.u32 %v5032_v55, 16  ;;  %v917_v29 = vrot.slane %v916_v62, 4  ;;  %v921_v8 = vrot.slane %v919_v25, 5  ;;  %v6226_v58 = vld [vmem:[%s5667_s29 + $0x94] sm:$0xf] }
  0xec   : > { %v2373_v7 = vor.u32 %v2372_v61, %v6211_v37  ;;  %v907_v43 = vrot.slane %v906_v14, 4  ;;  %v4975_v0 = vrot.slane %v6173_v11, 9  ;;  %v1405_v26 = vrot.slane %v1403_v63, 4 }
  0xed   : > { %v1406_v17 = vrot.slane %v268_v6, 5  ;;  %v2364_v2 = vrot.slane %v2363_v27, 4  ;;  %v6233_v46 = vadd.f32 %v6169_v39, %v1998_v28  ;;  %v2378_v14 = vrot.slane %v2376_v52, 5 }
  0xee   : > { %v2374_v11 = vrot.slane %v2373_v7, 4  ;;  %v912_v6 = vsel %vm5729_vm6, %v907_v43, %v6208_v30  ;;  %v933_v62 = vshll.u32 %v6226_v58, 16  ;;  %v937_v39 = vshrl.u32 %v6226_v58, 16 }
  0xef   : > { %v1553_v31 = vpop.f32.mrf.mxu2  ;;  %v2384_v25 = vshll.u32 %v5033_v24, 16  ;;  %v922_v27 = vsel %vm5729_vm6, %v917_v29, %v921_v8  ;;  %v1407_v30 = vsel %vm5735_vm7, %v1405_v26, %v1406_v17  ;;  %v271_v8 = vld [vmem:[%s5667_s29 + $0x98] sm:$0x1] }
  0xf0   : > { %v1629_v15 = vadd.f32 %v1553_v31, %v1212_v16  ;;  %v1923_v22 = vpop.f32.mrf.mxu3  ;;  %v6222_v16 = vld [vmem:[%s5667_s29 + $0x90] sm:$0xf]  ;;  %v2379_v7 = vsel %vm5729_vm6, %v2374_v11, %v2378_v14  ;;  %v1461_v11 = vunpack.c.l.b16 %v1407_v30  ;;  %v5035_v14 = vld [vmem:[%s5667_s29 + $0xa4] sm:$0x1] }
  0xf1   : > { %v1139_v38 = vpop.f32.mrf.mxu1  ;;  %v924_v55 = vshrl.u32 %v6222_v16, 16  ;;  %v927_v31 = vshll.u32 %v6222_v16, 16  ;;  %v2386_v17 = vrot.slane %v2384_v25, 5  ;;  %v4976_v30 = vrot.slane %v6222_v16, 9 }
  0xf2   : > { %v1999_v32 = vadd.f32 %v1923_v22, %v1629_v15  ;;  %v1213_v51 = vadd.f32 %v1139_v38, %v6014_v41  ;;  %v6219_v42 = vpop.f32.mrf.mxu0  ;;  %v5034_v41 = vld [vmem:[%s5667_s29 + $0xa0] sm:$0xf]  ;;  %v1404_v38 = vsel %vm5735_vm7, %v4975_v0, %v1403_v63  ;;  %v6259_v63 = vrot.slane %v933_v62, 5 }
  0xf3   : > { %v2390_v15 = vshll.u32 %v5034_v41, 16  ;;  %v2394_v22 = vshrl.u32 %v5034_v41, 16  ;;  %v926_v52 = vrot.slane %v924_v55, 4  ;;  %v939_v0 = vrot.slane %v937_v39, 4 }
  0xf4   : > { %4958 = vmatmul.msk.bf16.gmra.mxu1 %vm394_vm1, %v1063_v20  ;;  %4991 = vmatmul.msk.bf16.gmra.mxu2 %vm394_vm1, %v1480_v35  ;;  %v6235_v61 = vadd.f32 %v2593_v1, %v1999_v32  ;;  %v2381_v1 = vshrl.u32 %v5033_v24, 16  ;;  %v929_v32 = vrot.slane %v927_v31, 5  ;;  %v2501_v31 = vunpack.c.l.b16 %v2379_v7 }
  0xf5   : > { %5120 = vmatmul.msk.bf16.gmra.mxu3 %vm394_vm1, %v5384_v44  ;;  %5137 = vmatmul.msk.bf16.gmra.mxu0 %vm394_vm1, %v2520_v47  ;;  %v2369_v47 = vsel %vm5729_vm6, %v2364_v2, %v6211_v37  ;;  %v6261_v24 = vrot.slane %v2390_v15, 5  ;;  %v2396_v41 = vrot.slane %v2394_v22, 4  ;;  %v1043_v37 = vunpack.c.l.b16 %v912_v6 }
  0xf6   : > { %7206 = vst [vmem:[#allocation9_spill] sm:$0xff] %v6235_v61  ;;  %v2383_v26 = vrot.slane %v2381_v1, 4  ;;  %v1044_v2 = vunpack.c.l.b16 %v922_v27  ;;  %v2500_v55 = vunpack.c.l.b16 %v2369_v47  ;;  %v940_v62 = vor.u32 %v939_v0, %v6259_v63  ;;  %v5385_v47 = vld [vmem:[%s5667_s29 + $0x90] sm:$0xff] }
  0xf7   : > { %v1556_v28 = vpop.f32.mrf.mxu2  ;;  %v2397_v25 = vor.u32 %v2396_v41, %v6261_v24  ;;  %v2400_v15 = vshll.u32 %v5035_v14, 16 }
  0xf8   : > { %v1630_v20 = vadd.f32 %v1556_v28, %v1213_v51  ;;  %v1926_v35 = vpop.f32.mrf.mxu3  ;;  %v1460_v28 = vunpack.c.l.b16 %v1404_v38  ;;  %v2387_v1 = vor.u32 %v2386_v17, %v2383_v26  ;;  %v1064_v27 = vpack.c.b16 %v1044_v2, %v1043_v37  ;;  %v6277_v2 = vld [vmem:[%s5667_s29 + $0x9c] sm:$0xf] }
  0xf9   : > { %v1141_v44 = vpop.f32.mrf.mxu1  ;;  %v2521_v7 = vpack.c.b16 %v2501_v31, %v2500_v55  ;;  %v2398_v37 = vrot.slane %v2397_v25, 4  ;;  %v2402_v16 = vrot.slane %v2400_v15, 5 }
  0xfa   : > { %v2000_v51 = vadd.f32 %v1926_v35, %v1630_v20  ;;  %v1214_v43 = vadd.f32 %v1141_v44, %v6052_v19  ;;  %v2598_v29 = vpop.f32.mrf.mxu0  ;;  %v943_v20 = vshll.u32 %v271_v8, 16  ;;  %v1410_v19 = vrot.slane %v6226_v58, 5 }
  0xfb   : > { %v930_v35 = vor.u32 %v929_v32, %v926_v52  ;;  %v1481_v38 = vpack.c.b16 %v1461_v11, %v1460_v28  ;;  %v1413_v52 = vrot.slane %v271_v8, 5  ;;  %v2388_v41 = vrot.slane %v2387_v1, 4  ;;  %v6287_v11 = vld [vmem:[%s5667_s29 + $0xa0] sm:$0xf] }
  0xfc   : > { %v945_v61 = vrot.slane %v943_v20, 5  ;;  %v1412_v58 = vrot.slane %v1410_v19, 4  ;;  %v1411_v8 = vsel %vm5735_vm7, %v4976_v30, %v1410_v19  ;;  %v957_v1 = vshll.u32 %v6287_v11, 16 }
  0xfd   : > { %v931_v17 = vrot.slane %v930_v35, 4  ;;  %v1462_v20 = vunpack.c.l.b16 %v1411_v8  ;;  %v2393_v19 = vsel %vm5729_vm6, %v2388_v41, %v6261_v24  ;;  %v2403_v35 = vsel %vm5729_vm6, %v2398_v37, %v2402_v16 }
  0xfe   : > { %v1414_v31 = vsel %vm5735_vm7, %v1412_v58, %v1413_v52  ;;  %v961_v25 = vshrl.u32 %v6287_v11, 16  ;;  %v2502_v52 = vunpack.c.l.b16 %v2393_v19  ;;  %v6309_v41 = vrot.slane %v957_v1, 5 }
  0xff   : > { %v1558_v39 = vpop.f32.mrf.mxu2  ;;  %v936_v14 = vsel %vm5729_vm6, %v931_v17, %v6259_v63  ;;  %v274_v17 = vld [vmem:[%s5667_s29 + $0xa4] sm:$0x1]  ;;  %v1417_v16 = vrot.slane %v6287_v11, 5  ;;  %v4977_v11 = vrot.slane %v6277_v2, 9 }
 0x100   : > { %v1631_v22 = vadd.f32 %v1558_v39, %v1214_v43  ;;  %v1928_v6 = vpop.f32.mrf.mxu3  ;;  %v941_v43 = vrot.slane %v940_v62, 4  ;;  %v948_v62 = vshrl.u32 %v6277_v2, 16  ;;  %v963_v37 = vrot.slane %v961_v25, 4  ;;  %v5386_v25 = vld [vmem:[%s5667_s29 + $0x9c] sm:$0xff] }
 0x101   : > { %v1144_v44 = vpop.f32.mrf.mxu1  ;;  %v967_v19 = vshll.u32 %v274_v17, 16 }
 0x102   : > { %v2001_v32 = vadd.f32 %v1928_v6, %v1631_v22  ;;  %v1215_v0 = vadd.f32 %v1144_v44, %v6067_v3  ;;  %v6270_v26 = vpop.f32.mrf.mxu0  ;;  %v6280_v3 = vadd.f32 %v6219_v42, %v2000_v51  ;;  %v946_v55 = vsel %vm5729_vm6, %v941_v43, %v945_v61  ;;  %v5036_v42 = vld [vmem:[%s5667_s29 + $0xa8] sm:$0xf]  ;;  %v5037_v51 = vld [vmem:[%s5667_s29 + $0xac] sm:$0xf] }
 0x103   : > { %v951_v61 = vshll.u32 %v6277_v2, 16  ;;  %v2405_v22 = vshrl.u32 %v5036_v42, 16  ;;  %v2408_v6 = vshll.u32 %v5036_v42, 16  ;;  %v1046_v58 = vunpack.c.l.b16 %v946_v55 }
 0x104   : > { %4959 = vmatmul.msk.bf16.gmra.mxu1 %vm394_vm1, %v1064_v27  ;;  %4992 = vmatmul.msk.bf16.gmra.mxu2 %vm394_vm1, %v1481_v38  ;;  %v6282_v28 = vadd.f32 %v2598_v29, %v2001_v32  ;;  %v2414_v27 = vshll.u32 %v5037_v51, 16  ;;  %v2418_v38 = vshrl.u32 %v5037_v51, 16  ;;  %v2503_v32 = vunpack.c.l.b16 %v2403_v35  ;;  %v5038_v35 = vld [vmem:[%s5667_s29 + $0xb0] sm:$0x1] }
 0x105   : > { %5121 = vmatmul.msk.bf16.gmra.mxu3 %vm394_vm1, %v5385_v47  ;;  %5138 = vmatmul.msk.bf16.gmra.mxu0 %vm394_vm1, %v2521_v7  ;;  %v1045_v47 = vunpack.c.l.b16 %v936_v14  ;;  %v1463_v7 = vunpack.c.l.b16 %v1414_v31  ;;  %v953_v43 = vrot.slane %v951_v61, 5  ;;  %v2407_v8 = vrot.slane %v2405_v22, 4 }
 0x106   : > { %v2410_v42 = vrot.slane %v2408_v6, 5  ;;  %v6312_v51 = vrot.slane %v2414_v27, 5  ;;  %v964_v61 = vor.u32 %v963_v37, %v6309_v41  ;;  %v1420_v22 = vrot.slane %v274_v17, 5 }
 0x107   : > { %v1561_v29 = vpop.f32.mrf.mxu2  ;;  %v1065_v31 = vpack.c.b16 %v1046_v58, %v1045_v47  ;;  %v1482_v55 = vpack.c.b16 %v1463_v7, %v1462_v20  ;;  %v2424_v47 = vshll.u32 %v5038_v35, 16  ;;  %v6322_v7 = vld [vmem:[%s5667_s29 + $0xa8] sm:$0xf] }
 0x108   : > { %v1632_v63 = vadd.f32 %v1561_v29, %v1215_v0  ;;  %v1931_v39 = vpop.f32.mrf.mxu3  ;;  %v950_v0 = vrot.slane %v948_v62, 4  ;;  %v2522_v29 = vpack.c.b16 %v2503_v32, %v2502_v52  ;;  %v2411_v6 = vor.u32 %v2410_v42, %v2407_v8  ;;  %v6327_v52 = vld [vmem:[%s5667_s29 + $0xac] sm:$0xf]  ;;  %v5039_v32 = vld [vmem:[%s5667_s29 + $0xb4] sm:$0xf] }
 0x109   : > { %v1146_v15 = vpop.f32.mrf.mxu1  ;;  %v965_v58 = vrot.slane %v964_v61, 4 }
 0x10a   : > { %v2002_v24 = vadd.f32 %v1931_v39, %v1632_v63  ;;  %v1216_v30 = vadd.f32 %v1146_v15, %v6102_v59  ;;  %v2603_v44 = vpop.f32.mrf.mxu0  ;;  %v2420_v59 = vrot.slane %v2418_v38, 4  ;;  %v954_v39 = vor.u32 %v953_v43, %v950_v0 }
 0x10b   : > { %v1419_v15 = vrot.slane %v1417_v16, 4  ;;  %v1418_v43 = vsel %vm5735_vm7, %v4977_v11, %v1417_v16  ;;  %v2412_v8 = vrot.slane %v2411_v6, 4  ;;  %v2432_v16 = vshll.u32 %v5039_v32, 16 }
 0x10c   : > { %v2421_v20 = vor.u32 %v2420_v59, %v6312_v51  ;;  %v955_v2 = vrot.slane %v954_v39, 4  ;;  %v6331_v0 = vadd.f32 %v6270_v26, %v2002_v24  ;;  %v5040_v59 = vld [vmem:[%s5667_s29 + $0xb8] sm:$0xf]  ;;  %v972_v26 = vshrl.u32 %v6322_v7, 16 }
 0x10d   : > { %v1421_v37 = vsel %vm5735_vm7, %v1419_v15, %v1420_v22  ;;  %v975_v24 = vshll.u32 %v6322_v7, 16  ;;  %v2442_v39 = vshrl.u32 %v5040_v59, 16  ;;  %v2417_v15 = vsel %vm5729_vm6, %v2412_v8, %v6312_v51 }
 0x10e   : > { %v2422_v42 = vrot.slane %v2421_v20, 4  ;;  %v2504_v51 = vunpack.c.l.b16 %v2417_v15 }
 0x10f   : > { %v1563_v14 = vpop.f32.mrf.mxu2 }
 0x110   : > { %v1633_v62 = vadd.f32 %v1563_v14, %v1216_v30  ;;  %v1933_v63 = vpop.f32.mrf.mxu3  ;;  %v969_v30 = vrot.slane %v967_v19, 5  ;;  %v2429_v19 = vshrl.u32 %v5039_v32, 16 }
 0x111   : > { %v1149_v1 = vpop.f32.mrf.mxu1 }
 0x112   : > { %v2003_v27 = vadd.f32 %v1933_v63, %v1633_v62  ;;  %v6319_v38 = vpop.f32.mrf.mxu0  ;;  %v1217_v14 = vadd.f32 %v1149_v1, %v5900_v21  ;;  %v960_v63 = vsel %vm5729_vm6, %v955_v2, %v6309_v41  ;;  %v2438_v21 = vshll.u32 %v5040_v59, 16 }
 0x113   : > { %v970_v11 = vsel %vm5729_vm6, %v965_v58, %v969_v30  ;;  %v1464_v1 = vunpack.c.l.b16 %v1418_v43  ;;  %v977_v41 = vrot.slane %v975_v24, 5  ;;  %v2431_v59 = vrot.slane %v2429_v19, 4 }
 0x114   : > { %4960 = vmatmul.msk.bf16.gmra.mxu1 %vm394_vm1, %v1065_v31  ;;  %4993 = vmatmul.msk.bf16.gmra.mxu2 %vm394_vm1, %v1482_v55  ;;  %v6333_v17 = vadd.f32 %v2603_v44, %v2003_v27  ;;  %v2426_v31 = vrot.slane %v2424_v47, 5  ;;  %v981_v55 = vshll.u32 %v6327_v52, 16  ;;  %v974_v27 = vrot.slane %v972_v26, 4  ;;  %v277_v47 = vld [vmem:[%s5667_s29 + $0xb0] sm:$0x1] }
 0x115   : > { %5122 = vmatmul.msk.bf16.gmra.mxu3 %vm394_vm1, %v5386_v25  ;;  %5139 = vmatmul.msk.bf16.gmra.mxu0 %vm394_vm1, %v2522_v29  ;;  %v985_v29 = vshrl.u32 %v6327_v52, 16  ;;  %v1465_v25 = vunpack.c.l.b16 %v1421_v37  ;;  %v2434_v30 = vrot.slane %v2432_v16, 5  ;;  %v1047_v58 = vunpack.c.l.b16 %v960_v63 }
 0x116   : > { %v2427_v20 = vsel %vm5729_vm6, %v2422_v42, %v2426_v31  ;;  %v6358_v2 = vrot.slane %v981_v55, 5  ;;  %v1048_v43 = vunpack.c.l.b16 %v970_v11  ;;  %v6360_v37 = vrot.slane %v2438_v21, 5 }
 0x117   : > { %v1566_v44 = vpop.f32.mrf.mxu2  ;;  %v987_v32 = vrot.slane %v985_v29, 4  ;;  %v2505_v8 = vunpack.c.l.b16 %v2427_v20  ;;  %v1483_v42 = vpack.c.b16 %v1465_v25, %v1464_v1  ;;  %v991_v31 = vshll.u32 %v277_v47, 16  ;;  %v5387_v20 = vld [vmem:[%s5667_s29 + $0xa8] sm:$0xff] }
 0x118   : > { %v1634_v35 = vadd.f32 %v1566_v44, %v1217_v14  ;;  %v1936_v62 = vpop.f32.mrf.mxu3  ;;  %v2444_v14 = vrot.slane %v2442_v39, 4  ;;  %v5041_v44 = vld [vmem:[%s5667_s29 + $0xbc] sm:$0x1]  ;;  %v1424_v26 = vrot.slane %v6327_v52, 5  ;;  %v978_v55 = vor.u32 %v977_v41, %v974_v27 }
 0x119   : > { %v1151_v61 = vpop.f32.mrf.mxu1  ;;  %v988_v29 = vor.u32 %v987_v32, %v6358_v2  ;;  %v4978_v19 = vrot.slane %v6322_v7, 9  ;;  %v2435_v16 = vor.u32 %v2434_v30, %v2431_v59  ;;  %v1066_v21 = vpack.c.b16 %v1048_v43, %v1047_v58 }
 0x11a   : > { %v2004_v22 = vadd.f32 %v1936_v62, %v1634_v35  ;;  %v2608_v6 = vpop.f32.mrf.mxu0  ;;  %v1218_v35 = vadd.f32 %v1151_v61, %v5938_v50  ;;  %v2445_v39 = vor.u32 %v2444_v14, %v6360_v37  ;;  %v2448_v11 = vshll.u32 %v5041_v44, 16  ;;  %v5530_v14 = vld [vmem:[%s5667_s29 + $0xc] sm:$0xf]  ;;  %v5531_v44 = vld [vmem:[%s5667_s29 + $0x10] sm:$0xf] }
 0x11b   : > { %v2523_v50 = vpack.c.b16 %v2505_v8, %v2504_v51  ;;  %v993_v52 = vrot.slane %v991_v31, 5  ;;  %v1426_v25 = vrot.slane %v1424_v26, 4  ;;  %v1427_v27 = vrot.slane %v277_v47, 5  ;;  %v6382_v8 = vld [vmem:[%s5667_s29 + $0xb4] sm:$0xf] }
 0x11c   : > { %v979_v41 = vrot.slane %v978_v55, 4  ;;  %v989_v7 = vrot.slane %v988_v29, 4  ;;  %v1425_v32 = vsel %vm5735_vm7, %v4978_v19, %v1424_v26  ;;  %v2436_v59 = vrot.slane %v2435_v16, 4 }
 0x11d   : > { %v2446_v30 = vrot.slane %v2445_v39, 4  ;;  %v2450_v58 = vrot.slane %v2448_v11, 5  ;;  %v6374_v43 = vadd.f32 %v6319_v38, %v2004_v22  ;;  %v5143_v51 = vrot.slane %v5530_v14, 9  ;;  %v6390_v22 = vld [vmem:[%s5667_s29 + $0xb8] sm:$0xf] }
 0x11e   : > { %v1428_v38 = vsel %vm5735_vm7, %v1426_v25, %v1427_v27  ;;  %v984_v55 = vsel %vm5729_vm6, %v979_v41, %v6358_v2  ;;  %v994_v29 = vsel %vm5729_vm6, %v989_v7, %v993_v52  ;;  %v1466_v19 = vunpack.c.l.b16 %v1425_v32  ;;  %v6409_v14 = vld [vmem:[%s5667_s29 + $0xbc] sm:$0x1] }
 0x11f   : > { %v1568_v24 = vpop.f32.mrf.mxu2  ;;  %v2441_v16 = vsel %vm5729_vm6, %v2436_v59, %v6360_v37  ;;  %v996_v39 = vshrl.u32 %v6382_v8, 16  ;;  %v999_v11 = vshll.u32 %v6382_v8, 16  ;;  %v1049_v7 = vunpack.c.l.b16 %v984_v55 }
 0x120   : > { %v1635_v62 = vadd.f32 %v1568_v24, %v1218_v35  ;;  %v1938_v63 = vpop.f32.mrf.mxu3  ;;  %v2780_v35 = vrot.slane %v5531_v44, 5  ;;  %v1050_v32 = vunpack.c.l.b16 %v994_v29  ;;  %v2506_v59 = vunpack.c.l.b16 %v2441_v16 }
 0x121   : > { %v1154_v15 = vpop.f32.mrf.mxu1  ;;  %v998_v44 = vrot.slane %v996_v39, 4  ;;  %v1015_v39 = vshll.u32 %v6409_v14, 16 }
 0x122   : > { %v2005_v61 = vadd.f32 %v1938_v63, %v1635_v62  ;;  %v2611_v1 = vpop.f32.mrf.mxu0  ;;  %v1219_v26 = vadd.f32 %v1154_v15, %v5951_v18  ;;  %v5043_v18 = vld [vmem:[%s5667_s29 + $0xc4] sm:$0xf]  ;;  %v1467_v15 = vunpack.c.l.b16 %v1428_v38 }
 0x123   : > { %v2462_v27 = vshll.u32 %v5043_v18, 16  ;;  %v2466_v41 = vshrl.u32 %v5043_v18, 16 }
 0x124   : > { %4961 = vmatmul.msk.bf16.gmra.mxu1 %vm394_vm1, %v1066_v21  ;;  %4994 = vmatmul.msk.bf16.gmra.mxu2 %vm394_vm1, %v1483_v42  ;;  %v6376_v47 = vadd.f32 %v2608_v6, %v2005_v61  ;;  %v5532_v42 = vld [vmem:[%s5667_s29 + $0x14] sm:$0x1]  ;;  %v5042_v6 = vld [vmem:[%s5667_s29 + $0xc0] sm:$0xf]  ;;  %v2451_v21 = vsel %vm5729_vm6, %v2446_v30, %v2450_v58  ;;  %v2782_v58 = vrot.slane %v2780_v35, 4  ;;  %v1484_v38 = vpack.c.b16 %v1467_v15, %v1466_v19 }
 0x125   : > { %5123 = vmatmul.msk.bf16.gmra.mxu3 %vm394_vm1, %v5387_v20  ;;  %5140 = vmatmul.msk.bf16.gmra.mxu0 %vm394_vm1, %v2523_v50  ;;  %v2783_v31 = vrot.slane %v5532_v42, 5  ;;  %v1005_v20 = vshll.u32 %v6390_v22, 16  ;;  %v1009_v50 = vshrl.u32 %v6390_v22, 16  ;;  %v2453_v61 = vshrl.u32 %v5042_v6, 16 }
 0x126   : > { %7207 = vst [vmem:[#allocation10_spill] sm:$0xff] %v6376_v47  ;;  %v2456_v25 = vshll.u32 %v5042_v6, 16  ;;  %v2507_v30 = vunpack.c.l.b16 %v2451_v21  ;;  %v1001_v42 = vrot.slane %v999_v11, 5  ;;  %v6416_v29 = vrot.slane %v2462_v27, 5  ;;  %v5044_v11 = vld [vmem:[%s5667_s29 + $0xc8] sm:$0x1] }
 0x127   : > { %v1571_v24 = vpop.f32.mrf.mxu2  ;;  %v2468_v16 = vrot.slane %v2466_v41, 4  ;;  %v1067_v21 = vpack.c.b16 %v1050_v32, %v1049_v7 }
 0x128   : > { %v1636_v62 = vadd.f32 %v1571_v24, %v1219_v26  ;;  %v1941_v63 = vpop.f32.mrf.mxu3  ;;  %v6413_v24 = vrot.slane %v1005_v20, 5  ;;  %v2458_v55 = vrot.slane %v2456_v25, 5  ;;  %v2524_v47 = vpack.c.b16 %v2507_v30, %v2506_v59 }
 0x129   : > { %v1156_v2 = vpop.f32.mrf.mxu1  ;;  %v1002_v20 = vor.u32 %v1001_v42, %v998_v44  ;;  %v4979_v25 = vrot.slane %v6382_v8, 9  ;;  %v2469_v59 = vor.u32 %v2468_v16, %v6416_v29  ;;  %v2472_v30 = vshll.u32 %v5044_v11, 16  ;;  %v6437_v44 = vld [vmem:[%s5667_s29 + $0x1c] sm:$0xf] }
 0x12a   : > { %v2006_v52 = vadd.f32 %v1941_v63, %v1636_v62  ;;  %v2613_v37 = vpop.f32.mrf.mxu0  ;;  %v1011_v62 = vrot.slane %v1009_v50, 4  ;;  %v2455_v63 = vrot.slane %v2453_v61, 4  ;;  %v1220_v6 = vadd.f32 %v1156_v2, %v5982_v57  ;;  %v5388_v61 = vld [vmem:[%s5667_s29 + $0xb4] sm:$0xff] }
 0x12b   : > { %v2781_v50 = vsel %vm5735_vm7, %v5143_v51, %v2780_v35  ;;  %v2784_v57 = vsel %vm5735_vm7, %v2782_v58, %v2783_v31  ;;  %v1017_v35 = vrot.slane %v1015_v39, 5  ;;  %v6434_v58 = vld [vmem:[%s5667_s29 + $0x18] sm:$0xf]  ;;  %v1003_v42 = vrot.slane %v1002_v20, 4 }
 0x12c   : > { %v6411_v26 = vadd.f32 %v2611_v1, %v2006_v52  ;;  %v1431_v1 = vrot.slane %v6390_v22, 5  ;;  %v1012_v52 = vor.u32 %v1011_v62, %v6413_v24  ;;  %v2892_v27 = vunpack.c.l.b16 %v2781_v50 }
 0x12d   : > { %v2893_v22 = vunpack.c.l.b16 %v2784_v57  ;;  %v2459_v32 = vor.u32 %v2458_v55, %v2455_v63  ;;  %v2470_v16 = vrot.slane %v2469_v59, 4  ;;  %v3550_v39 = vshll.u32 %v6434_v58, 16 }
 0x12e   : > { %v1433_v31 = vrot.slane %v1431_v1, 4  ;;  %v1013_v62 = vrot.slane %v1012_v52, 4  ;;  %v1432_v63 = vsel %vm5735_vm7, %v4979_v25, %v1431_v1  ;;  %v3556_v11 = vshll.u32 %v6437_v44, 16 }
 0x12f   : > { %v1573_v18 = vpop.f32.mrf.mxu2  ;;  %v6429_v51 = vpack.c.b16 %v2893_v22, %v2892_v27  ;;  %v2460_v55 = vrot.slane %v2459_v32, 4  ;;  %v3552_v27 = vrot.slane %v3550_v39, 5 }
 0x130   : > { %v1637_v19 = vadd.f32 %v1573_v18, %v1220_v6  ;;  %v1943_v15 = vpop.f32.mrf.mxu3  ;;  %v1434_v6 = vrot.slane %v6409_v14, 5  ;;  %v2474_v18 = vrot.slane %v2472_v30, 5  ;;  %v1018_v14 = vsel %vm5729_vm6, %v1013_v62, %v1017_v35  ;;  %v5178_v30 = vld [vmem:[%s5667_s29 + $0x20] sm:$0x1] }
 0x131   : > { %v1159_v2 = vpop.f32.mrf.mxu1  ;;  %v3558_v22 = vrot.slane %v3556_v11, 5  ;;  %v1052_v32 = vunpack.c.l.b16 %v1018_v14  ;;  %v5389_v11 = vld [vmem:[%s5667_s29 + $0xc0] sm:$0xff] }
 0x132   : > { %v2007_v41 = vadd.f32 %v1943_v15, %v1637_v19  ;;  %v2616_v7 = vpop.f32.mrf.mxu0  ;;  %v1435_v1 = vsel %vm5735_vm7, %v1433_v31, %v1434_v6  ;;  %v2475_v52 = vsel %vm5729_vm6, %v2470_v16, %v2474_v18 }
 0x133   : > { %v1469_v59 = vunpack.c.l.b16 %v1435_v1  ;;  %v4237_v1 = vrot.slane %v5178_v30, 5 }
 0x134   : > { %4962 = vmatmul.msk.bf16.gmra.mxu1 %vm394_vm1, %v1067_v21  ;;  %4995 = vmatmul.msk.bf16.gmra.mxu2 %vm394_vm1, %v1484_v38  ;;  %v6439_v8 = vadd.f32 %v2613_v37, %v2007_v41  ;;  %v1221_v38 = vadd.f32 %v1159_v2, %v6008_v36  ;;  %v3547_v37 = vshrl.u32 %v6434_v58, 16  ;;  %v1008_v36 = vsel %vm5729_vm6, %v1003_v42, %v6413_v24 }
 0x135   : > { %5124 = vmatmul.msk.bf16.gmra.mxu3 %vm394_vm1, %v5388_v61  ;;  %5141 = vmatmul.msk.bf16.gmra.mxu0 %vm394_vm1, %v2524_v47  ;;  %v3560_v47 = vshrl.u32 %v6437_v44, 16  ;;  %v1468_v2 = vunpack.c.l.b16 %v1432_v63  ;;  %v2465_v61 = vsel %vm5729_vm6, %v2460_v55, %v6416_v29  ;;  %v1051_v41 = vunpack.c.l.b16 %v1008_v36 }
 0x136   : > { %v3549_v25 = vrot.slane %v3547_v37, 4  ;;  %v2508_v31 = vunpack.c.l.b16 %v2465_v61  ;;  %v2509_v42 = vunpack.c.l.b16 %v2475_v52  ;;  %v4234_v37 = vrot.slane %v6437_v44, 5  ;;  %v6481_v61 = vld [vmem:[%s5667_s29 + $0x28] sm:$0xf] }
 0x137   : > { %v1576_v21 = vpop.f32.mrf.mxu2  ;;  %v3562_v24 = vrot.slane %v3560_v47, 4  ;;  %v1068_v18 = vpack.c.b16 %v1052_v32, %v1051_v41 }
 0x138   : > { %v1638_v19 = vadd.f32 %v1576_v21, %v1221_v38  ;;  %v1946_v15 = vpop.f32.mrf.mxu3  ;;  %v3553_v29 = vor.u32 %v3552_v27, %v3549_v25  ;;  %v3566_v38 = vshll.u32 %v5178_v30, 16  ;;  %v1485_v21 = vpack.c.b16 %v1469_v59, %v1468_v2  ;;  %v6478_v2 = vld [vmem:[%s5667_s29 + $0x24] sm:$0xf] }
 0x139   : > { %v1161_v20 = vpop.f32.mrf.mxu1  ;;  %v3563_v6 = vor.u32 %v3562_v24, %v3558_v22  ;;  %v2525_v47 = vpack.c.b16 %v2509_v42, %v2508_v31  ;;  %v4236_v14 = vrot.slane %v4234_v37, 4  ;;  %v3571_v32 = vshrl.u32 %v6478_v2, 16 }
 0x13a   : > { %v2008_v50 = vadd.f32 %v1946_v15, %v1638_v19  ;;  %v2618_v57 = vpop.f32.mrf.mxu0  ;;  %v1222_v62 = vadd.f32 %v1161_v20, %v6048_v12  ;;  %v3554_v15 = vrot.slane %v3553_v29, 4  ;;  %v3568_v12 = vrot.slane %v3566_v38, 5 }
 0x13b   : > { %v3564_v36 = vrot.slane %v3563_v6, 4  ;;  %v5322_v20 = vrot.slane %v6434_v58, 9  ;;  %v4238_v41 = vsel %vm5735_vm7, %v4236_v14, %v4237_v1  ;;  %v3574_v59 = vshll.u32 %v6478_v2, 16 }
 0x13c   : > { %v6464_v35 = vadd.f32 %v2616_v7, %v2008_v50  ;;  %v3559_v25 = vsel %vm5729_vm6, %v3554_v15, %v3558_v22  ;;  %v3580_v30 = vshll.u32 %v6481_v61, 16  ;;  %v3584_v22 = vshrl.u32 %v6481_v61, 16  ;;  %v5390_v15 = vld [vmem:[%s5667_s29 + $0x18] sm:$0xff] }
 0x13d   : > { %v4235_v24 = vsel %vm5735_vm7, %v5322_v20, %v4234_v37  ;;  %v4347_v6 = vunpack.c.l.b16 %v4238_v41 }
 0x13e   : > { %v4346_v29 = vunpack.c.l.b16 %v4235_v24  ;;  %v5535_v24 = vld [vmem:[%s5667_s29 + $0x18] sm:$0xf] }
 0x13f   : > { %v1578_v63 = vpop.f32.mrf.mxu2  ;;  %v5144_v41 = vrot.slane %v5535_v24, 9 }
 0x140   : > { %v1639_v55 = vadd.f32 %v1578_v63, %v1222_v62  ;;  %v1948_v16 = vpop.f32.mrf.mxu3  ;;  %v3932_v62 = vunpack.c.l.b16 %v3559_v25 }
 0x141   : > { %v1164_v39 = vpop.f32.mrf.mxu1 }
 0x142   : > { %v2009_v7 = vadd.f32 %v1948_v16, %v1639_v55  ;;  %v2621_v19 = vpop.f32.mrf.mxu0  ;;  %v1223_v44 = vadd.f32 %v1164_v39, %v6064_v56  ;;  %v3573_v55 = vrot.slane %v3571_v32, 4  ;;  %v3576_v16 = vrot.slane %v3574_v59, 5  ;;  %v5181_v39 = vld [vmem:[%s5667_s29 + $0x2c] sm:$0x1]  ;;  %v6511_v32 = vld [vmem:[%s5667_s29 + $0x34] sm:$0xf] }
 0x144   : > { %4963 = vmatmul.msk.bf16.gmra.mxu1 %vm394_vm1, %v1068_v18  ;;  %4996 = vmatmul.msk.bf16.gmra.mxu2 %vm394_vm1, %v1485_v21  ;;  %v6472_v50 = vadd.f32 %v2618_v57, %v2009_v7  ;;  %v3569_v57 = vsel %vm5729_vm6, %v3564_v36, %v3568_v12  ;;  %v3582_v18 = vrot.slane %v3580_v30, 5  ;;  %v3586_v21 = vrot.slane %v3584_v22, 4 }
 0x145   : > { %5125 = vmatmul.msk.bf16.gmra.mxu3 %vm394_vm1, %v5389_v11  ;;  %5142 = vmatmul.msk.bf16.gmra.mxu0 %vm394_vm1, %v2525_v47  ;;  %v3933_v63 = vunpack.c.l.b16 %v3569_v57  ;;  %v4378_v12 = vpack.c.b16 %v4347_v6, %v4346_v29  ;;  %v3577_v1 = vor.u32 %v3576_v16, %v3573_v55  ;;  %v4244_v29 = vrot.slane %v5181_v39, 5 }
 0x146   : > { %v3604_v16 = vshll.u32 %v6511_v32, 16 }
 0x147   : > { %v1581_v52 = vpop.f32.mrf.mxu2  ;;  %v3964_v36 = vpack.c.b16 %v3933_v63, %v3932_v62  ;;  %v3578_v30 = vrot.slane %v3577_v1, 4  ;;  %v5323_v62 = vrot.slane %v6478_v2, 9 }
 0x148   : > { %v1640_v27 = vadd.f32 %v1581_v52, %v1223_v44  ;;  %v1951_v58 = vpop.f32.mrf.mxu3  ;;  %v3587_v44 = vor.u32 %v3586_v21, %v3582_v18  ;;  %v3590_v52 = vshll.u32 %v5181_v39, 16  ;;  %v3608_v21 = vshrl.u32 %v6511_v32, 16 }
 0x149   : > { %v1166_v56 = vpop.f32.mrf.mxu1  ;;  %v3583_v39 = vsel %vm5729_vm6, %v3578_v30, %v3582_v18  ;;  %v6535_v1 = vrot.slane %v3604_v16, 5  ;;  %v5184_v18 = vld [vmem:[%s5667_s29 + $0x38] sm:$0x1] }
 0x14a   : > { %v2010_v31 = vadd.f32 %v1951_v58, %v1640_v27  ;;  %v2623_v42 = vpop.f32.mrf.mxu0  ;;  %v1224_v37 = vadd.f32 %v1166_v56, %v6100_v54  ;;  %v4241_v54 = vrot.slane %v6481_v61, 5  ;;  %v5534_v58 = vld [vmem:[%s5667_s29 + $0x20] sm:$0x1]  ;;  %v6508_v56 = vld [vmem:[%s5667_s29 + $0x30] sm:$0xf]  ;;  %v3588_v22 = vrot.slane %v3587_v44, 4 }
 0x14b   : > { %v2790_v57 = vrot.slane %v5534_v58, 5  ;;  %v3595_v55 = vshrl.u32 %v6508_v56, 16  ;;  %v3610_v44 = vrot.slane %v3608_v21, 4 }
 0x14c   : > { %v6495_v38 = vadd.f32 %v2621_v19, %v2010_v31  ;;  %v5533_v19 = vld [vmem:[%s5667_s29 + $0x1c] sm:$0xf]  ;;  %v3592_v31 = vrot.slane %v3590_v52, 5  ;;  %v4243_v63 = vrot.slane %v4241_v54, 4 }
 0x14d   : > { %v2787_v14 = vrot.slane %v5533_v19, 5  ;;  %v3597_v19 = vrot.slane %v3595_v55, 4 }
 0x14f   : > { %v1583_v11 = vpop.f32.mrf.mxu2  ;;  %v2789_v61 = vrot.slane %v2787_v14, 4 }
 0x150   : > { %v1641_v47 = vadd.f32 %v1583_v11, %v1224_v37  ;;  %v1953_v7 = vpop.f32.mrf.mxu3 }
 0x151   : > { %v1169_v20 = vpop.f32.mrf.mxu1  ;;  %v2791_v2 = vsel %vm5735_vm7, %v2789_v61, %v2790_v57  ;;  %v3934_v57 = vunpack.c.l.b16 %v3583_v39 }
 0x152   : > { %v2011_v25 = vadd.f32 %v1953_v7, %v1641_v47  ;;  %v2626_v27 = vpop.f32.mrf.mxu0 }
 0x154   : > { %5160 = vmatmul.msk.bf16.vlgmr.msra.gmra.mxu1 %vm394_vm1, %v6429_v51  ;;  %5289 = vmatmul.msk.bf16.vlgmr.msra.gmra.mxu2 %vm394_vm1, %v5390_v15  ;;  %v6513_v59 = vadd.f32 %v2623_v42, %v2011_v25  ;;  %v1225_v51 = vadd.f32 %v1169_v20, %v5922_v40  ;;  %v3598_v42 = vshll.u32 %v6508_v56, 16  ;;  %v2788_v40 = vsel %vm5735_vm7, %v5144_v41, %v2787_v14 }
 0x155   : > { %5306 = vmatmul.msk.bf16.vlgmr.msra.gmra.mxu3 %vm394_vm1, %v3964_v36  ;;  %5339 = vmatmul.msk.bf16.vlgmr.msra.gmra.mxu0 %vm394_vm1, %v4378_v12  ;;  %v3593_v36 = vsel %vm5729_vm6, %v3588_v22, %v3592_v31  ;;  %v4242_v12 = vsel %vm5735_vm7, %v5323_v62, %v4241_v54  ;;  %v4245_v20 = vsel %vm5735_vm7, %v4243_v63, %v4244_v29  ;;  %v2894_v52 = vunpack.c.l.b16 %v2788_v40  ;;  %v5536_v22 = vld [vmem:[%s5667_s29 + $0x28] sm:$0xf] }
 0x156   : > { %v3600_v14 = vrot.slane %v3598_v42, 5  ;;  %v2895_v25 = vunpack.c.l.b16 %v2791_v2  ;;  %v3935_v24 = vunpack.c.l.b16 %v3593_v36  ;;  %v4348_v41 = vunpack.c.l.b16 %v4242_v12  ;;  %v5538_v2 = vld [vmem:[%s5667_s29 + $0x24] sm:$0xf] }
 0x157   : > { %v1586_v6 = vpop.f32.mrf.mxu2  ;;  %v4349_v61 = vunpack.c.l.b16 %v4245_v20  ;;  %v2794_v31 = vrot.slane %v5536_v22, 5  ;;  %v3611_v62 = vor.u32 %v3610_v44, %v6535_v1  ;;  %v3614_v63 = vshll.u32 %v5184_v18, 16 }
 0x158   : > { %v1642_v37 = vadd.f32 %v1586_v6, %v1225_v51  ;;  %v1956_v11 = vpop.f32.mrf.mxu3  ;;  %v3601_v51 = vor.u32 %v3600_v14, %v3597_v19  ;;  %v2925_v55 = vpack.c.b16 %v2895_v25, %v2894_v52  ;;  %v4248_v42 = vrot.slane %v6511_v32, 5  ;;  %v6556_v25 = vld [vmem:[%s5667_s29 + $0x3c] sm:$0xf] }
 0x159   : > { %v1171_v47 = vpop.f32.mrf.mxu1  ;;  %v3965_v21 = vpack.c.b16 %v3935_v24, %v3934_v57  ;;  %v5145_v39 = vrot.slane %v5538_v2, 9  ;;  %v3612_v12 = vrot.slane %v3611_v62, 4  ;;  %v3616_v20 = vrot.slane %v3614_v63, 5  ;;  %v6559_v57 = vld [vmem:[%s5667_s29 + $0x40] sm:$0xf] }
 0x15a   : > { %v2012_v7 = vadd.f32 %v1956_v11, %v1642_v37  ;;  %v2628_v15 = vpop.f32.mrf.mxu0  ;;  %v1226_v54 = vadd.f32 %v1171_v47, %v5946_v10  ;;  %v4379_v37 = vpack.c.b16 %v4349_v61, %v4348_v41  ;;  %v5537_v11 = vld [vmem:[%s5667_s29 + $0x2c] sm:$0x1]  ;;  %v3602_v36 = vrot.slane %v3601_v51, 4 }
 0x15b   : > { %v2797_v40 = vrot.slane %v5537_v11, 5  ;;  %v5324_v32 = vrot.slane %v6508_v56, 9  ;;  %v4250_v19 = vrot.slane %v4248_v42, 4  ;;  %v4251_v14 = vrot.slane %v5184_v18, 5 }
 0x15c   : > { %v6538_v58 = vadd.f32 %v2626_v27, %v2012_v7  ;;  %v5391_v27 = vld [vmem:[%s5667_s29 + $0x24] sm:$0xff]  ;;  %v2796_v7 = vrot.slane %v2794_v31, 4  ;;  %v2795_v41 = vsel %vm5735_vm7, %v5145_v39, %v2794_v31  ;;  %v3619_v31 = vshrl.u32 %v6556_v25, 16 }
 0x15d   : > { %v3622_v51 = vshll.u32 %v6556_v25, 16  ;;  %v3628_v62 = vshll.u32 %v6559_v57, 16 }
 0x15e   : > { %v2798_v56 = vsel %vm5735_vm7, %v2796_v7, %v2797_v40  ;;  %v3621_v11 = vrot.slane %v3619_v31, 4  ;;  %v5187_v7 = vld [vmem:[%s5667_s29 + $0x44] sm:$0x1] }
 0x15f   : > { %v1588_v30 = vpop.f32.mrf.mxu2  ;;  %v3624_v40 = vrot.slane %v3622_v51, 5  ;;  %v6593_v51 = vld [vmem:[%s5667_s29 + $0x48] sm:$0xf] }
 0x160   : > { %v1643_v29 = vadd.f32 %v1588_v30, %v1226_v54  ;;  %v1958_v6 = vpop.f32.mrf.mxu3  ;;  %v4249_v54 = vsel %vm5735_vm7, %v5324_v32, %v4248_v42  ;;  %v4252_v30 = vsel %vm5735_vm7, %v4250_v19, %v4251_v14  ;;  %v5392_v19 = vld [vmem:[%s5667_s29 + $0x30] sm:$0xff] }
 0x161   : > { %v1174_v16 = vpop.f32.mrf.mxu1 }
 0x162   : > { %v2013_v10 = vadd.f32 %v1958_v6, %v1643_v29  ;;  %v2631_v47 = vpop.f32.mrf.mxu0  ;;  %v1227_v52 = vadd.f32 %v1174_v16, %v5974_v34  ;;  %v3617_v34 = vsel %vm5729_vm6, %v3612_v12, %v3616_v20  ;;  %v2896_v6 = vunpack.c.l.b16 %v2795_v41 }
 0x163   : > { %v3937_v42 = vunpack.c.l.b16 %v3617_v34  ;;  %v4350_v16 = vunpack.c.l.b16 %v4249_v54  ;;  %v4255_v34 = vrot.slane %v6559_v57, 5  ;;  %v5540_v54 = vld [vmem:[%s5667_s29 + $0x38] sm:$0x1] }
 0x164   : > { %5161 = vmatmul.msk.bf16.gmra.mxu1 %vm394_vm1, %v2925_v55  ;;  %5290 = vmatmul.msk.bf16.gmra.mxu2 %vm394_vm1, %v5391_v27  ;;  %v6550_v44 = vadd.f32 %v2628_v15, %v2013_v10  ;;  %v3607_v15 = vsel %vm5729_vm6, %v3602_v36, %v6535_v1  ;;  %v3632_v1 = vshrl.u32 %v6559_v57, 16  ;;  %v2897_v55 = vunpack.c.l.b16 %v2798_v56 }
 0x165   : > { %5307 = vmatmul.msk.bf16.gmra.mxu3 %vm394_vm1, %v3965_v21  ;;  %5340 = vmatmul.msk.bf16.gmra.mxu0 %vm394_vm1, %v4379_v37  ;;  %v3936_v27 = vunpack.c.l.b16 %v3607_v15  ;;  %v4351_v21 = vunpack.c.l.b16 %v4252_v30  ;;  %v6580_v10 = vrot.slane %v3628_v62, 5  ;;  %v3625_v56 = vor.u32 %v3624_v40, %v3621_v11  ;;  %v6596_v62 = vld [vmem:[%s5667_s29 + $0x4c] sm:$0xf] }
 0x166   : > { %v3634_v2 = vrot.slane %v3632_v1, 4  ;;  %v2926_v32 = vpack.c.b16 %v2897_v55, %v2896_v6  ;;  %v2804_v30 = vrot.slane %v5540_v54, 5  ;;  %v3643_v40 = vshrl.u32 %v6593_v51, 16 }
 0x167   : > { %v1591_v24 = vpop.f32.mrf.mxu2  ;;  %v3966_v14 = vpack.c.b16 %v3937_v42, %v3936_v27  ;;  %v3626_v57 = vrot.slane %v3625_v56, 4  ;;  %v5325_v42 = vrot.slane %v6556_v25, 9 }
 0x168   : > { %v1644_v18 = vadd.f32 %v1591_v24, %v1227_v52  ;;  %v1961_v61 = vpop.f32.mrf.mxu3  ;;  %v4380_v52 = vpack.c.b16 %v4351_v21, %v4350_v16  ;;  %v5539_v24 = vld [vmem:[%s5667_s29 + $0x34] sm:$0xf]  ;;  %v3635_v15 = vor.u32 %v3634_v2, %v6580_v10  ;;  %v4257_v16 = vrot.slane %v4255_v34, 4 }
 0x169   : > { %v1176_v22 = vpop.f32.mrf.mxu1  ;;  %v2801_v41 = vrot.slane %v5539_v24, 5  ;;  %v4258_v21 = vrot.slane %v5187_v7, 5  ;;  %v3652_v2 = vshll.u32 %v6596_v62, 16  ;;  %v3645_v24 = vrot.slane %v3643_v40, 4 }
 0x16a   : > { %v2014_v63 = vadd.f32 %v1961_v61, %v1644_v18  ;;  %v2633_v29 = vpop.f32.mrf.mxu0  ;;  %v1228_v39 = vadd.f32 %v1176_v22, %v6002_v23  ;;  %v3638_v18 = vshll.u32 %v5187_v7, 16  ;;  %v5541_v22 = vld [vmem:[%s5667_s29 + $0x30] sm:$0xf]  ;;  %v3636_v6 = vrot.slane %v3635_v15, 4 }
 0x16b   : > { %v5146_v31 = vrot.slane %v5541_v22, 9  ;;  %v3631_v7 = vsel %vm5729_vm6, %v3626_v57, %v6580_v10  ;;  %v6621_v56 = vrot.slane %v3652_v2, 5  ;;  %v5190_v10 = vld [vmem:[%s5667_s29 + $0x50] sm:$0x1] }
 0x16c   : > { %v6578_v37 = vadd.f32 %v2631_v47, %v2014_v63  ;;  %v2803_v63 = vrot.slane %v2801_v41, 4  ;;  %v3640_v55 = vrot.slane %v3638_v18, 5 }
 0x16e   : > { %v2805_v25 = vsel %vm5735_vm7, %v2803_v63, %v2804_v30  ;;  %v3938_v30 = vunpack.c.l.b16 %v3631_v7 }
 0x16f   : > { %v1593_v36 = vpop.f32.mrf.mxu2 }
 0x170   : > { %v1645_v12 = vadd.f32 %v1593_v36, %v1228_v39  ;;  %v1963_v20 = vpop.f32.mrf.mxu3  ;;  %v3656_v39 = vshrl.u32 %v6596_v62, 16 }
 0x171   : > { %v1179_v47 = vpop.f32.mrf.mxu1 }
 0x172   : > { %v2015_v23 = vadd.f32 %v1963_v20, %v1645_v12  ;;  %v2636_v61 = vpop.f32.mrf.mxu0  ;;  %v1229_v27 = vadd.f32 %v1179_v47, %v6029_v60  ;;  %v2802_v60 = vsel %vm5735_vm7, %v5146_v31, %v2801_v41  ;;  %v4259_v47 = vsel %vm5735_vm7, %v4257_v16, %v4258_v21 }
 0x173   : > { %v3658_v15 = vrot.slane %v3656_v39, 4  ;;  %v2898_v18 = vunpack.c.l.b16 %v2802_v60  ;;  %v4353_v63 = vunpack.c.l.b16 %v4259_v47  ;;  %v3662_v16 = vshll.u32 %v5190_v10, 16 }
 0x174   : > { %5162 = vmatmul.msk.bf16.gmra.mxu1 %vm394_vm1, %v2926_v32  ;;  %5291 = vmatmul.msk.bf16.gmra.mxu2 %vm394_vm1, %v5392_v19  ;;  %v6598_v1 = vadd.f32 %v2633_v29, %v2015_v23  ;;  %v3646_v29 = vshll.u32 %v6593_v51, 16  ;;  %v2899_v23 = vunpack.c.l.b16 %v2805_v25  ;;  %v5544_v25 = vld [vmem:[%s5667_s29 + $0x3c] sm:$0xf] }
 0x175   : > { %5308 = vmatmul.msk.bf16.gmra.mxu3 %vm394_vm1, %v3966_v14  ;;  %5341 = vmatmul.msk.bf16.gmra.mxu0 %vm394_vm1, %v4380_v52  ;;  %v3641_v14 = vsel %vm5729_vm6, %v3636_v6, %v3640_v55  ;;  %v4256_v52 = vsel %vm5735_vm7, %v5325_v42, %v4255_v34  ;;  %v5542_v6 = vld [vmem:[%s5667_s29 + $0x40] sm:$0xf]  ;;  %v3659_v42 = vor.u32 %v3658_v15, %v6621_v56  ;;  %v5147_v7 = vrot.slane %v5544_v25, 9 }
 0x176   : > { %v3648_v41 = vrot.slane %v3646_v29, 5  ;;  %v3939_v22 = vunpack.c.l.b16 %v3641_v14  ;;  %v4352_v31 = vunpack.c.l.b16 %v4256_v52  ;;  %v2808_v55 = vrot.slane %v5542_v6, 5 }
 0x177   : > { %v1596_v11 = vpop.f32.mrf.mxu2  ;;  %v2927_v40 = vpack.c.b16 %v2899_v23, %v2898_v18  ;;  %v4262_v29 = vrot.slane %v6596_v62, 5  ;;  %v3660_v52 = vrot.slane %v3659_v42, 4  ;;  %v3664_v47 = vrot.slane %v3662_v16, 5  ;;  %v6642_v23 = vld [vmem:[%s5667_s29 + $0x54] sm:$0xf] }
 0x178   : > { %v1646_v36 = vadd.f32 %v1596_v11, %v1229_v27  ;;  %v1966_v12 = vpop.f32.mrf.mxu3  ;;  %v3649_v27 = vor.u32 %v3648_v41, %v3645_v24  ;;  %v3967_v39 = vpack.c.b16 %v3939_v22, %v3938_v30  ;;  %v5326_v62 = vrot.slane %v6593_v51, 9  ;;  %v6645_v30 = vld [vmem:[%s5667_s29 + $0x58] sm:$0xf] }
 0x179   : > { %v1181_v20 = vpop.f32.mrf.mxu1  ;;  %v4264_v24 = vrot.slane %v4262_v29, 4  ;;  %v4265_v41 = vrot.slane %v5190_v10, 5  ;;  %v3676_v42 = vshll.u32 %v6645_v30, 16 }
 0x17a   : > { %v2016_v32 = vadd.f32 %v1966_v12, %v1646_v36  ;;  %v2638_v19 = vpop.f32.mrf.mxu0  ;;  %v1230_v34 = vadd.f32 %v1181_v20, %v6058_v48  ;;  %v4381_v36 = vpack.c.b16 %v4353_v63, %v4352_v31  ;;  %v5543_v12 = vld [vmem:[%s5667_s29 + $0x44] sm:$0x1]  ;;  %v3650_v14 = vrot.slane %v3649_v27, 4 }
 0x17b   : > { %v2811_v60 = vrot.slane %v5543_v12, 5  ;;  %v2809_v31 = vsel %vm5735_vm7, %v5147_v7, %v2808_v55  ;;  %v3670_v27 = vshll.u32 %v6642_v23, 16 }
 0x17c   : > { %v6624_v54 = vadd.f32 %v2636_v61, %v2016_v32  ;;  %v5393_v61 = vld [vmem:[%s5667_s29 + $0x3c] sm:$0xff]  ;;  %v2810_v32 = vrot.slane %v2808_v55, 4  ;;  %v3667_v55 = vshrl.u32 %v6642_v23, 16 }
 0x17e   : > { %v2812_v51 = vsel %vm5735_vm7, %v2810_v32, %v2811_v60  ;;  %v3669_v12 = vrot.slane %v3667_v55, 4  ;;  %v3672_v60 = vrot.slane %v3670_v27, 5  ;;  %v5193_v32 = vld [vmem:[%s5667_s29 + $0x5c] sm:$0x1]  ;;  %v6679_v27 = vld [vmem:[%s5667_s29 + $0x60] sm:$0xf] }
 0x17f   : > { %v1598_v57 = vpop.f32.mrf.mxu2 }
 0x180   : > { %v1647_v21 = vadd.f32 %v1598_v57, %v1230_v34  ;;  %v1968_v11 = vpop.f32.mrf.mxu3  ;;  %v4263_v34 = vsel %vm5735_vm7, %v5326_v62, %v4262_v29  ;;  %v4266_v57 = vsel %vm5735_vm7, %v4264_v24, %v4265_v41  ;;  %v5394_v24 = vld [vmem:[%s5667_s29 + $0x48] sm:$0xff] }
 0x181   : > { %v1184_v2 = vpop.f32.mrf.mxu1 }
 0x182   : > { %v2017_v48 = vadd.f32 %v1968_v11, %v1647_v21  ;;  %v2641_v20 = vpop.f32.mrf.mxu0  ;;  %v1231_v18 = vadd.f32 %v1184_v2, %v6090_v33  ;;  %v3665_v33 = vsel %vm5729_vm6, %v3660_v52, %v3664_v47  ;;  %v2900_v11 = vunpack.c.l.b16 %v2809_v31 }
 0x183   : > { %v3941_v29 = vunpack.c.l.b16 %v3665_v33  ;;  %v4354_v2 = vunpack.c.l.b16 %v4263_v34  ;;  %v4269_v33 = vrot.slane %v6645_v30, 5  ;;  %v5546_v34 = vld [vmem:[%s5667_s29 + $0x50] sm:$0x1] }
 0x184   : > { %5163 = vmatmul.msk.bf16.gmra.mxu1 %vm394_vm1, %v2927_v40  ;;  %5292 = vmatmul.msk.bf16.gmra.mxu2 %vm394_vm1, %v5393_v61  ;;  %v6636_v15 = vadd.f32 %v2638_v19, %v2017_v48  ;;  %v3655_v19 = vsel %vm5729_vm6, %v3650_v14, %v6621_v56  ;;  %v3680_v56 = vshrl.u32 %v6645_v30, 16  ;;  %v2901_v40 = vunpack.c.l.b16 %v2812_v51 }
 0x185   : > { %5309 = vmatmul.msk.bf16.gmra.mxu3 %vm394_vm1, %v3967_v39  ;;  %5342 = vmatmul.msk.bf16.gmra.mxu0 %vm394_vm1, %v4381_v36  ;;  %v3940_v61 = vunpack.c.l.b16 %v3655_v19  ;;  %v4355_v39 = vunpack.c.l.b16 %v4266_v57  ;;  %v6666_v48 = vrot.slane %v3676_v42, 5  ;;  %v3673_v51 = vor.u32 %v3672_v60, %v3669_v12  ;;  %v6682_v42 = vld [vmem:[%s5667_s29 + $0x64] sm:$0xf] }
 0x186   : > { %v3682_v25 = vrot.slane %v3680_v56, 4  ;;  %v2928_v62 = vpack.c.b16 %v2901_v40, %v2900_v11  ;;  %v2818_v57 = vrot.slane %v5546_v34, 5  ;;  %v3691_v60 = vshrl.u32 %v6679_v27, 16 }
 0x187   : > { %v1601_v22 = vpop.f32.mrf.mxu2  ;;  %v3968_v41 = vpack.c.b16 %v3941_v29, %v3940_v61  ;;  %v3674_v30 = vrot.slane %v3673_v51, 4  ;;  %v5327_v29 = vrot.slane %v6642_v23, 9 }
 0x188   : > { %v1648_v10 = vadd.f32 %v1601_v22, %v1231_v18  ;;  %v1971_v63 = vpop.f32.mrf.mxu3  ;;  %v4382_v18 = vpack.c.b16 %v4355_v39, %v4354_v2  ;;  %v5545_v22 = vld [vmem:[%s5667_s29 + $0x4c] sm:$0xf]  ;;  %v3683_v19 = vor.u32 %v3682_v25, %v6666_v48  ;;  %v4271_v2 = vrot.slane %v4269_v33, 4 }
 0x189   : > { %v1186_v6 = vpop.f32.mrf.mxu1  ;;  %v2815_v31 = vrot.slane %v5545_v22, 5  ;;  %v4272_v39 = vrot.slane %v5193_v32, 5  ;;  %v3700_v25 = vshll.u32 %v6682_v42, 16  ;;  %v3693_v22 = vrot.slane %v3691_v60, 4 }
 0x18a   : > { %v2018_v16 = vadd.f32 %v1971_v63, %v1648_v10  ;;  %v2643_v21 = vpop.f32.mrf.mxu0  ;;  %v1232_v7 = vadd.f32 %v1186_v6, %v6115_v53  ;;  %v3686_v10 = vshll.u32 %v5193_v32, 16  ;;  %v5547_v6 = vld [vmem:[%s5667_s29 + $0x48] sm:$0xf]  ;;  %v3684_v11 = vrot.slane %v3683_v19, 4 }
 0x18b   : > { %v5148_v55 = vrot.slane %v5547_v6, 9  ;;  %v3679_v32 = vsel %vm5729_vm6, %v3674_v30, %v6666_v48  ;;  %v6707_v51 = vrot.slane %v3700_v25, 5  ;;  %v5196_v48 = vld [vmem:[%s5667_s29 + $0x68] sm:$0x1] }
 0x18c   : > { %v6664_v36 = vadd.f32 %v2641_v20, %v2018_v16  ;;  %v2817_v16 = vrot.slane %v2815_v31, 4  ;;  %v3688_v40 = vrot.slane %v3686_v10, 5 }
 0x18e   : > { %v2819_v23 = vsel %vm5735_vm7, %v2817_v16, %v2818_v57  ;;  %v3942_v57 = vunpack.c.l.b16 %v3679_v32 }
 0x18f   : > { %v1603_v14 = vpop.f32.mrf.mxu2 }
 0x190   : > { %v1649_v52 = vadd.f32 %v1603_v14, %v1232_v7  ;;  %v1973_v47 = vpop.f32.mrf.mxu3  ;;  %v3704_v7 = vshrl.u32 %v6682_v42, 16 }
 0x191   : > { %v1189_v20 = vpop.f32.mrf.mxu1 }
 0x192   : > { %v2019_v53 = vadd.f32 %v1973_v47, %v1649_v52  ;;  %v2646_v63 = vpop.f32.mrf.mxu0  ;;  %v1233_v61 = vadd.f32 %v1189_v20, %v5930_v45  ;;  %v2816_v45 = vsel %vm5735_vm7, %v5148_v55, %v2815_v31  ;;  %v4273_v20 = vsel %vm5735_vm7, %v4271_v2, %v4272_v39 }
 0x193   : > { %v3706_v19 = vrot.slane %v3704_v7, 4  ;;  %v2902_v10 = vunpack.c.l.b16 %v2816_v45  ;;  %v4357_v16 = vunpack.c.l.b16 %v4273_v20  ;;  %v3710_v2 = vshll.u32 %v5196_v48, 16 }
 0x194   : > { %5164 = vmatmul.msk.bf16.gmra.mxu1 %vm394_vm1, %v2928_v62  ;;  %5293 = vmatmul.msk.bf16.gmra.mxu2 %vm394_vm1, %v5394_v24  ;;  %v6684_v56 = vadd.f32 %v2643_v21, %v2019_v53  ;;  %v3694_v21 = vshll.u32 %v6679_v27, 16  ;;  %v2903_v53 = vunpack.c.l.b16 %v2819_v23  ;;  %v5550_v23 = vld [vmem:[%s5667_s29 + $0x54] sm:$0xf] }
 0x195   : > { %5310 = vmatmul.msk.bf16.gmra.mxu3 %vm394_vm1, %v3968_v41  ;;  %5343 = vmatmul.msk.bf16.gmra.mxu0 %vm394_vm1, %v4382_v18  ;;  %v3689_v41 = vsel %vm5729_vm6, %v3684_v11, %v3688_v40  ;;  %v4270_v18 = vsel %vm5735_vm7, %v5327_v29, %v4269_v33  ;;  %v5548_v11 = vld [vmem:[%s5667_s29 + $0x58] sm:$0xf]  ;;  %v3707_v29 = vor.u32 %v3706_v19, %v6707_v51  ;;  %v5149_v32 = vrot.slane %v5550_v23, 9 }
 0x196   : > { %v3696_v31 = vrot.slane %v3694_v21, 5  ;;  %v3943_v6 = vunpack.c.l.b16 %v3689_v41  ;;  %v4356_v55 = vunpack.c.l.b16 %v4270_v18  ;;  %v2822_v40 = vrot.slane %v5548_v11, 5 }
 0x197   : > { %v1606_v12 = vpop.f32.mrf.mxu2  ;;  %v2929_v60 = vpack.c.b16 %v2903_v53, %v2902_v10  ;;  %v4276_v21 = vrot.slane %v6682_v42, 5  ;;  %v3708_v18 = vrot.slane %v3707_v29, 4  ;;  %v3712_v20 = vrot.slane %v3710_v2, 5  ;;  %v6728_v53 = vld [vmem:[%s5667_s29 + $0x6c] sm:$0xf] }
 0x198   : > { %v1650_v14 = vadd.f32 %v1606_v12, %v1233_v61  ;;  %v1976_v52 = vpop.f32.mrf.mxu3  ;;  %v3697_v61 = vor.u32 %v3696_v31, %v3693_v22  ;;  %v3969_v7 = vpack.c.b16 %v3943_v6, %v3942_v57  ;;  %v5328_v42 = vrot.slane %v6679_v27, 9  ;;  %v6731_v57 = vld [vmem:[%s5667_s29 + $0x70] sm:$0xf] }
 0x199   : > { %v1191_v47 = vpop.f32.mrf.mxu1  ;;  %v4278_v22 = vrot.slane %v4276_v21, 4  ;;  %v4279_v31 = vrot.slane %v5196_v48, 5  ;;  %v3724_v29 = vshll.u32 %v6731_v57, 16 }
 0x19a   : > { %v2020_v62 = vadd.f32 %v1976_v52, %v1650_v14  ;;  %v2648_v24 = vpop.f32.mrf.mxu0  ;;  %v1234_v33 = vadd.f32 %v1191_v47, %v5948_v13  ;;  %v4383_v14 = vpack.c.b16 %v4357_v16, %v4356_v55  ;;  %v5549_v52 = vld [vmem:[%s5667_s29 + $0x5c] sm:$0x1]  ;;  %v3698_v41 = vrot.slane %v3697_v61, 4 }
 0x19b   : > { %v2825_v45 = vrot.slane %v5549_v52, 5  ;;  %v2823_v55 = vsel %vm5735_vm7, %v5149_v32, %v2822_v40  ;;  %v3718_v61 = vshll.u32 %v6728_v53, 16  ;;  %v7208_v32 = vld [vmem:[#allocation3_spill] sm:$0xff] }
 0x19c   : > { %v6710_v34 = vadd.f32 %v2646_v63, %v2020_v62  ;;  %v5395_v63 = vld [vmem:[%s5667_s29 + $0x54] sm:$0xff]  ;;  %v2824_v62 = vrot.slane %v2822_v40, 4  ;;  %v3715_v40 = vshrl.u32 %v6728_v53, 16 }
 0x19e   : > { %v2826_v27 = vsel %vm5735_vm7, %v2824_v62, %v2825_v45  ;;  %v3717_v52 = vrot.slane %v3715_v40, 4  ;;  %v3720_v45 = vrot.slane %v3718_v61, 5  ;;  %v5553_v61 = vld [vmem:[%s5667_s29 + $0x60] sm:$0xf] }
 0x19f   : > { %v1608_v30 = vpop.f32.mrf.mxu2 }
 0x1a0   : > { %v1651_v39 = vadd.f32 %v1608_v30, %v1234_v33  ;;  %v1978_v12 = vpop.f32.mrf.mxu3  ;;  %v4277_v33 = vsel %vm5735_vm7, %v5328_v42, %v4276_v21  ;;  %v4280_v30 = vsel %vm5735_vm7, %v4278_v22, %v4279_v31  ;;  %v5396_v31 = vld [vmem:[%s5667_s29 + $0x60] sm:$0xff] }
 0x1a1   : > { %v1194_v25 = vpop.f32.mrf.mxu1 }
 0x1a2   : > { %v2021_v13 = vadd.f32 %v1978_v12, %v1651_v39  ;;  %v2651_v47 = vpop.f32.mrf.mxu0  ;;  %v1235_v10 = vadd.f32 %v1194_v25, %v5976_v49  ;;  %v3713_v49 = vsel %vm5729_vm6, %v3708_v18, %v3712_v20  ;;  %v2904_v12 = vunpack.c.l.b16 %v2823_v55  ;;  %v5551_v55 = vld [vmem:[%s5667_s29 + $0x64] sm:$0xf] }
 0x1a3   : > { %v3945_v21 = vunpack.c.l.b16 %v3713_v49  ;;  %v4358_v25 = vunpack.c.l.b16 %v4277_v33 }
 0x1a4   : > { %5165 = vmatmul.msk.bf16.gmra.mxu1 %vm394_vm1, %v2929_v60  ;;  %5294 = vmatmul.msk.bf16.gmra.mxu2 %vm394_vm1, %v5395_v63  ;;  %v6722_v19 = vadd.f32 %v2648_v24, %v2021_v13  ;;  %v3703_v24 = vsel %vm5729_vm6, %v3698_v41, %v6707_v51  ;;  %v3728_v51 = vshrl.u32 %v6731_v57, 16  ;;  %v2905_v60 = vunpack.c.l.b16 %v2826_v27  ;;  %v5199_v41 = vld [vmem:[%s5667_s29 + $0x74] sm:$0x1] }
 0x1a5   : > { %5311 = vmatmul.msk.bf16.gmra.mxu3 %vm394_vm1, %v3969_v7  ;;  %5344 = vmatmul.msk.bf16.gmra.mxu0 %vm394_vm1, %v4383_v14  ;;  %v3944_v63 = vunpack.c.l.b16 %v3703_v24  ;;  %v4359_v7 = vunpack.c.l.b16 %v4280_v30  ;;  %v6752_v13 = vrot.slane %v3724_v29, 5  ;;  %v2829_v27 = vrot.slane %v5551_v55, 5 }
 0x1a6   : > { %v3730_v23 = vrot.slane %v3728_v51, 4  ;;  %v2930_v22 = vpack.c.b16 %v2905_v60, %v2904_v12  ;;  %v3721_v24 = vor.u32 %v3720_v45, %v3717_v52  ;;  %v4283_v30 = vrot.slane %v6731_v57, 5  ;;  %v6765_v51 = vld [vmem:[%s5667_s29 + $0x78] sm:$0xf] }
 0x1a7   : > { %v1611_v6 = vpop.f32.mrf.mxu2  ;;  %v5150_v29 = vrot.slane %v5553_v61, 9  ;;  %v2831_v60 = vrot.slane %v2829_v27, 4  ;;  %v5329_v52 = vrot.slane %v6728_v53, 9 }
 0x1a8   : > { %v1652_v48 = vadd.f32 %v1611_v6, %v1235_v10  ;;  %v1981_v16 = vpop.f32.mrf.mxu3  ;;  %v3970_v10 = vpack.c.b16 %v3945_v21, %v3944_v63  ;;  %v4384_v6 = vpack.c.b16 %v4359_v7, %v4358_v25  ;;  %v3722_v57 = vrot.slane %v3721_v24, 4  ;;  %v7209_v25 = vld [vmem:[#allocation4_spill] sm:$0xff] }
 0x1a9   : > { %v1196_v11 = vpop.f32.mrf.mxu1  ;;  %v4285_v45 = vrot.slane %v4283_v30, 4  ;;  %v4284_v24 = vsel %vm5735_vm7, %v5329_v52, %v4283_v30  ;;  %v7210_v30 = vld [vmem:[#allocation5_spill] sm:$0xff] }
 0x1aa   : > { %v2022_v2 = vadd.f32 %v1981_v16, %v1652_v48  ;;  %v2653_v39 = vpop.f32.mrf.mxu0  ;;  %v1236_v62 = vadd.f32 %v1196_v11, %v7208_v32  ;;  %v3731_v48 = vor.u32 %v3730_v23, %v6752_v13  ;;  %v3734_v16 = vshll.u32 %v5199_v41, 16  ;;  %v5552_v11 = vld [vmem:[%s5667_s29 + $0x68] sm:$0x1]  ;;  %v5554_v52 = vld [vmem:[%s5667_s29 + $0x70] sm:$0xf] }
 0x1ab   : > { %v2832_v40 = vrot.slane %v5552_v11, 5  ;;  %v4286_v23 = vrot.slane %v5199_v41, 5  ;;  %v3727_v41 = vsel %vm5729_vm6, %v3722_v57, %v6752_v13  ;;  %v5202_v13 = vld [vmem:[%s5667_s29 + $0x80] sm:$0x1] }
 0x1ac   : > { %v6750_v14 = vadd.f32 %v2651_v47, %v2022_v2  ;;  %v6768_v2 = vld [vmem:[%s5667_s29 + $0x7c] sm:$0xf]  ;;  %v3732_v63 = vrot.slane %v3731_v48, 4  ;;  %v3736_v21 = vrot.slane %v3734_v16, 5 }
 0x1ad   : > { %v2833_v53 = vsel %vm5735_vm7, %v2831_v60, %v2832_v40  ;;  %v4287_v48 = vsel %vm5735_vm7, %v4285_v45, %v4286_v23  ;;  %v3946_v60 = vunpack.c.l.b16 %v3727_v41  ;;  %v2836_v45 = vrot.slane %v5554_v52, 5 }
 0x1ae   : > { %v3737_v55 = vsel %vm5729_vm6, %v3732_v63, %v3736_v21  ;;  %v2907_v61 = vunpack.c.l.b16 %v2833_v53  ;;  %v4360_v63 = vunpack.c.l.b16 %v4284_v24  ;;  %v4361_v21 = vunpack.c.l.b16 %v4287_v48  ;;  %v5556_v24 = vld [vmem:[%s5667_s29 + $0x74] sm:$0x1] }
 0x1af   : > { %v1613_v18 = vpop.f32.mrf.mxu2  ;;  %v3947_v57 = vunpack.c.l.b16 %v3737_v55  ;;  %v2839_v48 = vrot.slane %v5556_v24, 5 }
 0x1b0   : > { %v1653_v20 = vadd.f32 %v1613_v18, %v1236_v62  ;;  %v1983_v42 = vpop.f32.mrf.mxu3  ;;  %v3739_v62 = vshrl.u32 %v6765_v51, 16  ;;  %v3748_v18 = vshll.u32 %v6768_v2, 16  ;;  %v4385_v53 = vpack.c.b16 %v4361_v21, %v4360_v63  ;;  %v6814_v21 = vld [vmem:[%s5667_s29 + $0x84] sm:$0xf] }
 0x1b1   : > { %v1199_v47 = vpop.f32.mrf.mxu1 }
 0x1b2   : > { %v2023_v49 = vadd.f32 %v1983_v42, %v1653_v20  ;;  %v2656_v33 = vpop.f32.mrf.mxu0  ;;  %v1237_v7 = vadd.f32 %v1199_v47, %v7209_v25  ;;  %v3752_v20 = vshrl.u32 %v6768_v2, 16 }
 0x1b4   : > { %5166 = vmatmul.msk.bf16.gmra.mxu1 %vm394_vm1, %v2930_v22  ;;  %5295 = vmatmul.msk.bf16.gmra.mxu2 %vm394_vm1, %v5396_v31  ;;  %v6770_v12 = vadd.f32 %v2653_v39, %v2023_v49  ;;  %v3742_v39 = vshll.u32 %v6765_v51, 16  ;;  %v6793_v49 = vrot.slane %v3748_v18, 5  ;;  %v3754_v11 = vrot.slane %v3752_v20, 4 }
 0x1b5   : > { %5312 = vmatmul.msk.bf16.gmra.mxu3 %vm394_vm1, %v3970_v10  ;;  %5345 = vmatmul.msk.bf16.gmra.mxu0 %vm394_vm1, %v4384_v6  ;;  %v2830_v10 = vsel %vm5735_vm7, %v5150_v29, %v2829_v27  ;;  %v3741_v27 = vrot.slane %v3739_v62, 4  ;;  %v3758_v62 = vshll.u32 %v5202_v13, 16 }
 0x1b6   : > { %v3744_v16 = vrot.slane %v3742_v39, 5  ;;  %v2906_v40 = vunpack.c.l.b16 %v2830_v10  ;;  %v3971_v10 = vpack.c.b16 %v3947_v57, %v3946_v60  ;;  %v7211_v57 = vld [vmem:[#allocation6_spill] sm:$0xff] }
 0x1b7   : > { %v1616_v32 = vpop.f32.mrf.mxu2 }
 0x1b8   : > { %v1654_v42 = vadd.f32 %v1616_v32, %v1237_v7  ;;  %v1986_v22 = vpop.f32.mrf.mxu3  ;;  %v3745_v23 = vor.u32 %v3744_v16, %v3741_v27  ;;  %v3755_v32 = vor.u32 %v3754_v11, %v6793_v49  ;;  %v2931_v20 = vpack.c.b16 %v2907_v61, %v2906_v40 }
 0x1b9   : > { %v1201_v31 = vpop.f32.mrf.mxu1  ;;  %v2838_v27 = vrot.slane %v2836_v45, 4  ;;  %v4293_v61 = vrot.slane %v5202_v13, 5 }
 0x1ba   : > { %v2024_v6 = vadd.f32 %v1986_v22, %v1654_v42  ;;  %v2658_v47 = vpop.f32.mrf.mxu0  ;;  %v1238_v25 = vadd.f32 %v1201_v31, %v7210_v30  ;;  %v4290_v42 = vrot.slane %v6768_v2, 5  ;;  %v3746_v16 = vrot.slane %v3745_v23, 4 }
 0x1bb   : > { %v3756_v11 = vrot.slane %v3755_v32, 4  ;;  %v3760_v30 = vrot.slane %v3758_v62, 5  ;;  %v5330_v2 = vrot.slane %v6765_v51, 9  ;;  %v2840_v51 = vsel %vm5735_vm7, %v2838_v27, %v2839_v48 }
 0x1bc   : > { %v6796_v29 = vadd.f32 %v2656_v33, %v2024_v6  ;;  %v5397_v33 = vld [vmem:[%s5667_s29 + $0x6c] sm:$0xff]  ;;  %v4292_v40 = vrot.slane %v4290_v42, 4 }
 0x1bd   : > { %v5555_v6 = vld [vmem:[%s5667_s29 + $0x6c] sm:$0xf]  ;;  %v3761_v32 = vsel %vm5729_vm6, %v3756_v11, %v3760_v30  ;;  %v4291_v62 = vsel %vm5735_vm7, %v5330_v2, %v4290_v42  ;;  %v7213_v2 = vld [vmem:[#allocation7_spill] sm:$0xff] }
 0x1be   : > { %v5151_v55 = vrot.slane %v5555_v6, 9  ;;  %v3949_v42 = vunpack.c.l.b16 %v3761_v32 }
 0x1bf   : > { %v1618_v7 = vpop.f32.mrf.mxu2 }
 0x1c0   : > { %v1655_v39 = vadd.f32 %v1618_v7, %v1238_v25  ;;  %v1988_v18 = vpop.f32.mrf.mxu3  ;;  %v6817_v25 = vld [vmem:[%s5667_s29 + $0x88] sm:$0xf]  ;;  %v2837_v52 = vsel %vm5735_vm7, %v5151_v55, %v2836_v45  ;;  %v3763_v45 = vshrl.u32 %v6814_v21, 16  ;;  %v4362_v55 = vunpack.c.l.b16 %v4291_v62 }
 0x1c1   : > { %v1204_v22 = vpop.f32.mrf.mxu1 }
 0x1c2   : > { %v2025_v41 = vadd.f32 %v1988_v18, %v1655_v39  ;;  %v2661_v31 = vpop.f32.mrf.mxu0  ;;  %v1239_v63 = vadd.f32 %v1204_v22, %v7211_v57  ;;  %v4294_v39 = vsel %vm5735_vm7, %v4292_v40, %v4293_v61  ;;  %v3765_v27 = vrot.slane %v3763_v45, 4  ;;  %v5205_v61 = vld [vmem:[%s5667_s29 + $0x8c] sm:$0x1] }
 0x1c3   : > { %v4363_v24 = vunpack.c.l.b16 %v4294_v39  ;;  %v3782_v45 = vshll.u32 %v5205_v61, 16 }
 0x1c4   : > { %5167 = vmatmul.msk.bf16.gmra.mxu1 %vm394_vm1, %v2931_v20  ;;  %5296 = vmatmul.msk.bf16.gmra.mxu2 %vm394_vm1, %v5397_v33  ;;  %v6808_v60 = vadd.f32 %v2658_v47, %v2025_v41  ;;  %v3751_v47 = vsel %vm5729_vm6, %v3746_v16, %v6793_v49  ;;  %v3766_v20 = vshll.u32 %v6814_v21, 16  ;;  %v3772_v33 = vshll.u32 %v6817_v25, 16 }
 0x1c5   : > { %5313 = vmatmul.msk.bf16.gmra.mxu3 %vm394_vm1, %v3971_v10  ;;  %5346 = vmatmul.msk.bf16.gmra.mxu0 %vm394_vm1, %v4385_v53  ;;  %v3776_v49 = vshrl.u32 %v6817_v25, 16  ;;  %v2908_v53 = vunpack.c.l.b16 %v2837_v52  ;;  %v2909_v41 = vunpack.c.l.b16 %v2840_v51  ;;  %v3948_v6 = vunpack.c.l.b16 %v3751_v47  ;;  %v5398_v51 = vld [vmem:[%s5667_s29 + $0x78] sm:$0xff] }
 0x1c6   : > { %v3768_v16 = vrot.slane %v3766_v20, 5  ;;  %v3774_v11 = vrot.slane %v3772_v33, 5  ;;  %v4386_v32 = vpack.c.b16 %v4363_v24, %v4362_v55  ;;  %v4297_v33 = vrot.slane %v6817_v25, 5  ;;  %v5559_v55 = vld [vmem:[%s5667_s29 + $0x80] sm:$0x1] }
 0x1c7   : > { %v1621_v7 = vpop.f32.mrf.mxu2  ;;  %v3778_v30 = vrot.slane %v3776_v49, 4  ;;  %v2932_v52 = vpack.c.b16 %v2909_v41, %v2908_v53  ;;  %v3972_v47 = vpack.c.b16 %v3949_v42, %v3948_v6  ;;  %v5558_v49 = vld [vmem:[%s5667_s29 + $0x78] sm:$0xf]  ;;  %v6847_v41 = vld [vmem:[%s5667_s29 + $0x90] sm:$0xf]  ;;  %v2846_v24 = vrot.slane %v5559_v55, 5 }
 0x1c8   : > { %v1656_v13 = vadd.f32 %v1621_v7, %v1239_v63  ;;  %v1991_v23 = vpop.f32.mrf.mxu3  ;;  %v3769_v62 = vor.u32 %v3768_v16, %v3765_v27  ;;  %v6850_v6 = vld [vmem:[%s5667_s29 + $0x94] sm:$0xf]  ;;  %v3784_v16 = vrot.slane %v3782_v45, 5 }
 0x1c9   : > { %v1206_v18 = vpop.f32.mrf.mxu1  ;;  %v3779_v39 = vor.u32 %v3778_v30, %v3774_v11 }
 0x1ca   : > { %v2026_v22 = vadd.f32 %v1991_v23, %v1656_v13  ;;  %v2663_v10 = vpop.f32.mrf.mxu0  ;;  %v1240_v40 = vadd.f32 %v1206_v18, %v7213_v2  ;;  %v5557_v13 = vld [vmem:[%s5667_s29 + $0x7c] sm:$0xf]  ;;  %v3770_v25 = vrot.slane %v3769_v62, 4  ;;  %v5331_v2 = vrot.slane %v6814_v21, 9 }
 0x1cb   : > { %v2843_v23 = vrot.slane %v5557_v13, 5  ;;  %v3780_v27 = vrot.slane %v3779_v39, 4 }
 0x1cc   : > { %v6836_v48 = vadd.f32 %v2661_v31, %v2026_v22  ;;  %v5152_v22 = vrot.slane %v5558_v49, 9  ;;  %v4298_v39 = vsel %vm5735_vm7, %v5331_v2, %v4297_v33 }
 0x1cd   : > { %v2845_v53 = vrot.slane %v2843_v23, 4  ;;  %v3785_v62 = vsel %vm5729_vm6, %v3780_v27, %v3784_v16  ;;  %v4364_v27 = vunpack.c.l.b16 %v4298_v39 }
 0x1ce   : > { %7212 = vst [vmem:[#allocation3_spill] sm:$0xff] %v6836_v48 }
 0x1cf   : > { %v1623_v57 = vpop.f32.mrf.mxu2  ;;  %v2847_v21 = vsel %vm5735_vm7, %v2845_v53, %v2846_v24 }
 0x1d0   : > { %v1657_v63 = vadd.f32 %v1623_v57, %v1240_v40  ;;  %v1993_v7 = vpop.f32.mrf.mxu3  ;;  %v4299_v40 = vrot.slane %v4297_v33, 4  ;;  %v4300_v57 = vrot.slane %v5205_v61, 5  ;;  %v2911_v24 = vunpack.c.l.b16 %v2847_v21  ;;  %v5560_v33 = vld [vmem:[%s5667_s29 + $0x88] sm:$0xf] }
 0x1d1   : > { %v3000_v31 = vpop.f32.mrf.mxu1  ;;  %v2850_v2 = vrot.slane %v5560_v33, 5 }
 0x1d2   : > { %v2027_v20 = vadd.f32 %v1993_v7, %v1657_v63  ;;  %v4454_v18 = vpop.f32.mrf.mxu0  ;;  %v3080_v30 = vadd.f32 %v3000_v31, %v6176_v5  ;;  %v3787_v7 = vshrl.u32 %v6847_v41, 16  ;;  %v2844_v5 = vsel %vm5735_vm7, %v5152_v22, %v2843_v23 }
 0x1d3   : > { %v3775_v31 = vsel %vm5729_vm6, %v3770_v25, %v3774_v11  ;;  %v4301_v45 = vsel %vm5735_vm7, %v4299_v40, %v4300_v57  ;;  %v2910_v55 = vunpack.c.l.b16 %v2844_v5  ;;  %v3951_v25 = vunpack.c.l.b16 %v3785_v62  ;;  %v5399_v5 = vld [vmem:[%s5667_s29 + $0x84] sm:$0xff] }
 0x1d4   : > { %5168 = vmatmul.msk.bf16.gmra.mxu1 %vm394_vm1, %v2932_v52  ;;  %5297 = vmatmul.msk.bf16.gmra.mxu2 %vm394_vm1, %v5398_v51  ;;  %v6852_v42 = vadd.f32 %v2663_v10, %v2027_v20  ;;  %v3790_v10 = vshll.u32 %v6847_v41, 16  ;;  %v3796_v52 = vshll.u32 %v6850_v6, 16  ;;  %v3800_v51 = vshrl.u32 %v6850_v6, 16 }
 0x1d5   : > { %5314 = vmatmul.msk.bf16.gmra.mxu3 %vm394_vm1, %v3972_v47  ;;  %5347 = vmatmul.msk.bf16.gmra.mxu0 %vm394_vm1, %v4386_v32  ;;  %v3789_v20 = vrot.slane %v3787_v7, 4  ;;  %v3950_v11 = vunpack.c.l.b16 %v3775_v31  ;;  %v4365_v16 = vunpack.c.l.b16 %v4301_v45 }
 0x1d6   : > { %7214 = vst [vmem:[#allocation4_spill] sm:$0xff] %v6852_v42  ;;  %v3792_v49 = vrot.slane %v3790_v10, 5  ;;  %v6875_v23 = vrot.slane %v3796_v52, 5  ;;  %v3802_v22 = vrot.slane %v3800_v51, 4  ;;  %v6884_v52 = vld [vmem:[%s7194_s2] ss:$0 sm:$0xff] }
 0x1d7   : > { %v3370_v63 = vpop.f32.mrf.mxu2  ;;  %v3973_v31 = vpack.c.b16 %v3951_v25, %v3950_v11  ;;  %v4387_v62 = vpack.c.b16 %v4365_v16, %v4364_v27  ;;  %v6902_v16 = vld [vmem:[%s5667_s29 + $0x9c] sm:$0xf] }
 0x1d8   : > { %v3450_v47 = vadd.f32 %v3370_v63, %v3080_v30  ;;  %v4040_v13 = vpop.f32.mrf.mxu3  ;;  %v5208_v30 = vld [vmem:[%s5667_s29 + $0x98] sm:$0x1]  ;;  %v7215_v63 = vld [vmem:[#allocation8_spill] sm:$0xff]  ;;  %v3793_v40 = vor.u32 %v3792_v49, %v3789_v20  ;;  %v3803_v57 = vor.u32 %v3802_v22, %v6875_v23  ;;  %v5561_v20 = vld [vmem:[%s5667_s29 + $0x84] sm:$0xf] }
 0x1d9   : > { %v3002_v32 = vpop.f32.mrf.mxu1  ;;  %v3806_v7 = vshll.u32 %v5208_v30, 16  ;;  %v5153_v49 = vrot.slane %v5561_v20, 9  ;;  %v5562_v22 = vld [vmem:[%s5667_s29 + $0x8c] sm:$0x1]  ;;  %v4307_v11 = vrot.slane %v5208_v30, 5 }
 0x1da   : > { %v4456_v61 = vpop.f32.mrf.mxu0  ;;  %v4120_v53 = vadd.f32 %v4040_v13, %v3450_v47  ;;  %v3081_v42 = vadd.f32 %v3002_v32, %v7215_v63  ;;  %v2933_v13 = vpack.c.b16 %v2911_v24, %v2910_v55  ;;  %v4304_v32 = vrot.slane %v6850_v6, 5 }
 0x1db   : > { %v3794_v63 = vrot.slane %v3793_v40, 4  ;;  %v3804_v33 = vrot.slane %v3803_v57, 4 }
 0x1dc   : > { %v4534_v10 = vadd.f32 %v4454_v18, %v4120_v53  ;;  %v2852_v18 = vrot.slane %v2850_v2, 4  ;;  %v2853_v53 = vrot.slane %v5562_v22, 5  ;;  %v4306_v24 = vrot.slane %v4304_v32, 4 }
 0x1dd   : > { %v3799_v57 = vsel %vm5729_vm6, %v3794_v63, %v6875_v23 }
 0x1de   : > { %v4634_v6 = vadd.f32 %v6884_v52, %v4534_v10  ;;  %v2854_v30 = vsel %vm5735_vm7, %v2852_v18, %v2853_v53  ;;  %v3952_v18 = vunpack.c.l.b16 %v3799_v57 }
 0x1df   : > { %v3372_v48 = vpop.f32.mrf.mxu2 }
 0x1e0   : > { %v3451_v51 = vadd.f32 %v3372_v48, %v3081_v42  ;;  %v4042_v47 = vpop.f32.mrf.mxu3  ;;  %v3808_v48 = vrot.slane %v3806_v7, 5  ;;  %v5332_v42 = vrot.slane %v6847_v41, 9  ;;  %v2851_v41 = vsel %vm5735_vm7, %v5153_v49, %v2850_v2 }
 0x1e1   : > { %v3005_v21 = vpop.f32.mrf.mxu1  ;;  %v4666_v10 = vmax.f32 %v4634_v6, 0.0  ;;  %v2912_v20 = vunpack.c.l.b16 %v2851_v41  ;;  %v2913_v49 = vunpack.c.l.b16 %v2854_v30 }
 0x1e2   : > { %v4121_v39 = vadd.f32 %v4042_v47, %v3451_v51  ;;  %v4459_v45 = vpop.f32.mrf.mxu0  ;;  %v3082_v27 = vadd.f32 %v3005_v21, %v6233_v46  ;;  %v3809_v7 = vsel %vm5729_vm6, %v3804_v33, %v3808_v48  ;;  %v4305_v46 = vsel %vm5735_vm7, %v5332_v42, %v4304_v32 }
 0x1e3   : > { %v3814_v21 = vshll.u32 %v6902_v16, 16  ;;  %v3953_v53 = vunpack.c.l.b16 %v3809_v7  ;;  %v4366_v63 = vunpack.c.l.b16 %v4305_v46  ;;  %v5563_v7 = vld [vmem:[%s5667_s29 + $0x94] sm:$0xf] }
 0x1e4   : > { %v4535_v55 = vadd.f32 %v4456_v61, %v4121_v39  ;;  %5169 = vmatmul.msk.bf16.gmra.mxu1 %vm394_vm1, %v2933_v13  ;;  %5298 = vmatmul.msk.bf16.gmra.mxu2 %vm394_vm1, %v5399_v5  ;;  %v6905_v61 = vld [vmem:[%s5667_s29 + $0xa0] sm:$0xf]  ;;  %v4308_v13 = vsel %vm5735_vm7, %v4306_v24, %v4307_v11  ;;  %v3811_v5 = vshrl.u32 %v6902_v16, 16  ;;  %v7216_v24 = vld [vmem:[#allocation9_spill] sm:$0xff] }
 0x1e5   : > { %5315 = vmatmul.msk.bf16.gmra.mxu3 %vm394_vm1, %v3973_v31  ;;  %5348 = vmatmul.msk.bf16.gmra.mxu0 %vm394_vm1, %v4387_v62  ;;  %v3820_v32 = vshll.u32 %v6905_v61, 16  ;;  %v3824_v31 = vshrl.u32 %v6905_v61, 16  ;;  %v4367_v33 = vunpack.c.l.b16 %v4308_v13  ;;  %v3816_v42 = vrot.slane %v3814_v21, 5 }
 0x1e6   : > { %v4635_v25 = vadd.f32 %v6884_v52, %v4535_v55  ;;  %v3813_v48 = vrot.slane %v3811_v5, 4 }
 0x1e7   : > { %v3375_v40 = vpop.f32.mrf.mxu2  ;;  %v6928_v6 = vrot.slane %v3820_v32, 5  ;;  %v3826_v55 = vrot.slane %v3824_v31, 4  ;;  %v4311_v31 = vrot.slane %v6905_v61, 5 }
 0x1e8   : > { %v4667_v2 = vmax.f32 %v4635_v25, 0.0  ;;  %v3452_v51 = vadd.f32 %v3375_v40, %v3082_v27  ;;  %v4045_v47 = vpop.f32.mrf.mxu3  ;;  %v5211_v25 = vld [vmem:[%s5667_s29 + $0xa4] sm:$0x1]  ;;  %v2934_v40 = vpack.c.b16 %v2913_v49, %v2912_v20  ;;  %v3817_v13 = vor.u32 %v3816_v42, %v3813_v48 }
 0x1e9   : > { %v3007_v23 = vpop.f32.mrf.mxu1  ;;  %v3827_v5 = vor.u32 %v3826_v55, %v6928_v6 }
 0x1ea   : > { %v5409_v62 = vpack.c.bf16 %v4667_v2, %v4666_v10  ;;  %v4461_v39 = vpop.f32.mrf.mxu0  ;;  %v4122_v22 = vadd.f32 %v4045_v47, %v3452_v51  ;;  %v3083_v11 = vadd.f32 %v3007_v23, %v7216_v24  ;;  %v5400_v10 = vld [vmem:[%s5667_s29 + $0x90] sm:$0xff]  ;;  %v3974_v2 = vpack.c.b16 %v3953_v53, %v3952_v18 }
 0x1eb   : > { %v2857_v51 = vrot.slane %v5563_v7, 5  ;;  %v4388_v47 = vpack.c.b16 %v4367_v33, %v4366_v63  ;;  %v3830_v23 = vshll.u32 %v5211_v25, 16  ;;  %v6942_v63 = vld [vmem:[%s5667_s29 + $0xa8] sm:$0xf]  ;;  %v6945_v33 = vld [vmem:[%s5667_s29 + $0xac] sm:$0xf] }
 0x1ec   : > { %5410 = vst [vmem:[%s6921_s19] sm:$0xff] %v5409_v62   ;;  %v4536_v41 = vadd.f32 %v4459_v45, %v4122_v22  ;;  %v5564_v45 = vld [vmem:[%s5667_s29 + $0x90] sm:$0xf]  ;;  %v5565_v22 = vld [vmem:[%s5667_s29 + $0x98] sm:$0x1]  ;;  %v3818_v61 = vrot.slane %v3817_v13, 4  ;;  %v3828_v48 = vrot.slane %v3827_v5, 4 }
 0x1ed   : > { %v5154_v62 = vrot.slane %v5564_v45, 9  ;;  %v2859_v18 = vrot.slane %v2857_v51, 4  ;;  %v2860_v53 = vrot.slane %v5565_v22, 5  ;;  %v3832_v42 = vrot.slane %v3830_v23, 5 }
 0x1ee   : > { %v4636_v20 = vadd.f32 %v6884_v52, %v4536_v41  ;;  %v3835_v41 = vshrl.u32 %v6942_v63, 16 }
 0x1ef   : > { %v3377_v27 = vpop.f32.mrf.mxu2 }
 0x1f0   : > { %v3453_v30 = vadd.f32 %v3377_v27, %v3083_v11  ;;  %v4047_v57 = vpop.f32.mrf.mxu3  ;;  %v4313_v11 = vrot.slane %v4311_v31, 4  ;;  %v4314_v27 = vrot.slane %v5211_v25, 5  ;;  %v2861_v25 = vsel %vm5735_vm7, %v2859_v18, %v2860_v53 }
 0x1f1   : > { %v3010_v46 = vpop.f32.mrf.mxu1  ;;  %v2915_v53 = vunpack.c.l.b16 %v2861_v25 }
 0x1f2   : > { %v4123_v21 = vadd.f32 %v4047_v57, %v3453_v30  ;;  %v4464_v32 = vpop.f32.mrf.mxu0  ;;  %v3084_v24 = vadd.f32 %v3010_v46, %v6280_v3  ;;  %v3838_v30 = vshll.u32 %v6942_v63, 16  ;;  %v3844_v57 = vshll.u32 %v6945_v33, 16 }
 0x1f3   : > { %v2858_v3 = vsel %vm5735_vm7, %v5154_v62, %v2857_v51  ;;  %v3823_v46 = vsel %vm5729_vm6, %v3818_v61, %v6928_v6  ;;  %v4315_v51 = vsel %vm5735_vm7, %v4313_v11, %v4314_v27  ;;  %v3837_v62 = vrot.slane %v3835_v41, 4  ;;  %v5214_v61 = vld [vmem:[%s5667_s29 + $0xb0] sm:$0x1] }
 0x1f4   : > { %v4537_v49 = vadd.f32 %v4461_v39, %v4123_v21  ;;  %5170 = vmatmul.msk.bf16.gmra.mxu1 %vm394_vm1, %v2934_v40  ;;  %5299 = vmatmul.msk.bf16.gmra.mxu2 %vm394_vm1, %v5400_v10  ;;  %v5333_v39 = vrot.slane %v6902_v16, 9  ;;  %v3848_v10 = vshrl.u32 %v6945_v33, 16  ;;  %v3833_v21 = vsel %vm5729_vm6, %v3828_v48, %v3832_v42 }
 0x1f5   : > { %5316 = vmatmul.msk.bf16.gmra.mxu3 %vm394_vm1, %v3974_v2  ;;  %5349 = vmatmul.msk.bf16.gmra.mxu0 %vm394_vm1, %v4388_v47  ;;  %v4668_v2 = vmax.f32 %v4636_v20, 0.0  ;;  %v3840_v20 = vrot.slane %v3838_v30, 5  ;;  %v2914_v6 = vunpack.c.l.b16 %v2858_v3  ;;  %v3955_v48 = vunpack.c.l.b16 %v3833_v21 }
 0x1f6   : > { %v4637_v55 = vadd.f32 %v6884_v52, %v4537_v49  ;;  %v4312_v45 = vsel %vm5735_vm7, %v5333_v39, %v4311_v31  ;;  %v6969_v49 = vrot.slane %v3844_v57, 5  ;;  %v3850_v18 = vrot.slane %v3848_v10, 4  ;;  %v5566_v39 = vld [vmem:[%s5667_s29 + $0xa0] sm:$0xf] }
 0x1f7   : > { %v3380_v40 = vpop.f32.mrf.mxu2  ;;  %v4368_v42 = vunpack.c.l.b16 %v4312_v45  ;;  %v3841_v27 = vor.u32 %v3840_v20, %v3837_v62  ;;  %v3854_v30 = vshll.u32 %v5214_v61, 16 }
 0x1f8   : > { %v4669_v7 = vmax.f32 %v4637_v55, 0.0  ;;  %v3454_v47 = vadd.f32 %v3380_v40, %v3084_v24  ;;  %v4050_v16 = vpop.f32.mrf.mxu3  ;;  %v3954_v55 = vunpack.c.l.b16 %v3823_v46  ;;  %v4369_v24 = vunpack.c.l.b16 %v4315_v51  ;;  %v5568_v51 = vld [vmem:[%s5667_s29 + $0xa4] sm:$0x1] }
 0x1f9   : > { %v3012_v13 = vpop.f32.mrf.mxu1  ;;  %v2864_v40 = vrot.slane %v5566_v39, 5  ;;  %v3851_v41 = vor.u32 %v3850_v18, %v6969_v49  ;;  %v2867_v62 = vrot.slane %v5568_v51, 5  ;;  %v3842_v20 = vrot.slane %v3841_v27, 4 }
 0x1fa   : > { %v5414_v5 = vpack.c.bf16 %v4669_v7, %v4668_v2  ;;  %v4466_v23 = vpop.f32.mrf.mxu0  ;;  %v4124_v22 = vadd.f32 %v4050_v16, %v3454_v47  ;;  %v3085_v31 = vadd.f32 %v3012_v13, %v6282_v28  ;;  %v2935_v7 = vpack.c.b16 %v2915_v53, %v2914_v6  ;;  %v5401_v47 = vld [vmem:[%s5667_s29 + $0x9c] sm:$0xff] }
 0x1fb   : > { %v4318_v16 = vrot.slane %v6945_v33, 5  ;;  %v3975_v25 = vpack.c.b16 %v3955_v48, %v3954_v55  ;;  %v4389_v46 = vpack.c.b16 %v4369_v24, %v4368_v42  ;;  %v2866_v45 = vrot.slane %v2864_v40, 4  ;;  %v6991_v24 = vld [vmem:[%s5667_s29 + $0xb4] sm:$0xf] }
 0x1fc   : > { %5486 = vst [vmem:[%s6921_s19 + $0x8] sm:$0xff] %v5414_v5   ;;  %v4538_v57 = vadd.f32 %v4464_v32, %v4124_v22  ;;  %v5567_v5 = vld [vmem:[%s5667_s29 + $0x9c] sm:$0xf]  ;;  %v3852_v32 = vrot.slane %v3851_v41, 4  ;;  %v3856_v18 = vrot.slane %v3854_v30, 5  ;;  %v5334_v22 = vrot.slane %v6942_v63, 9 }
 0x1fd   : > { %v5155_v21 = vrot.slane %v5567_v5, 9  ;;  %v4320_v53 = vrot.slane %v4318_v16, 4  ;;  %v4321_v55 = vrot.slane %v5214_v61, 5  ;;  %v2868_v39 = vsel %vm5735_vm7, %v2866_v45, %v2867_v62 }
 0x1fe   : > { %v4638_v6 = vadd.f32 %v6884_v52, %v4538_v57  ;;  %v3847_v61 = vsel %vm5729_vm6, %v3842_v20, %v6969_v49 }
 0x1ff   : > { %v3382_v11 = vpop.f32.mrf.mxu2  ;;  %v2865_v63 = vsel %vm5735_vm7, %v5155_v21, %v2864_v40  ;;  %v4322_v57 = vsel %vm5735_vm7, %v4320_v53, %v4321_v55 }
 0x200   : > { %v3455_v10 = vadd.f32 %v3382_v11, %v3085_v31  ;;  %v4052_v2 = vpop.f32.mrf.mxu3  ;;  %v3857_v11 = vsel %vm5729_vm6, %v3852_v32, %v3856_v18  ;;  %v4670_v40 = vmax.f32 %v4638_v6, 0.0  ;;  %v4371_v51 = vunpack.c.l.b16 %v4322_v57  ;;  %v5217_v6 = vld [vmem:[%s5667_s29 + $0xbc] sm:$0x1] }
 0x201   : > { %v3015_v3 = vpop.f32.mrf.mxu1  ;;  %v3957_v21 = vunpack.c.l.b16 %v3857_v11 }
 0x202   : > { %v4125_v28 = vadd.f32 %v4052_v2, %v3455_v10  ;;  %v4469_v13 = vpop.f32.mrf.mxu0  ;;  %v3086_v42 = vadd.f32 %v3015_v3, %v6331_v0  ;;  %v4319_v0 = vsel %vm5735_vm7, %v5334_v22, %v4318_v16  ;;  %v3859_v2 = vshrl.u32 %v6991_v24, 16 }
 0x203   : > { %v4370_v45 = vunpack.c.l.b16 %v4319_v0 }
 0x204   : > { %v4539_v33 = vadd.f32 %v4466_v23, %v4125_v28  ;;  %5171 = vmatmul.msk.bf16.gmra.mxu1 %vm394_vm1, %v2935_v7  ;;  %5300 = vmatmul.msk.bf16.gmra.mxu2 %vm394_vm1, %v5401_v47  ;;  %v6994_v23 = vld [vmem:[%s5667_s29 + $0xb8] sm:$0xf]  ;;  %v3862_v7 = vshll.u32 %v6991_v24, 16  ;;  %v3956_v28 = vunpack.c.l.b16 %v3847_v61  ;;  %v3861_v62 = vrot.slane %v3859_v2, 4 }
 0x205   : > { %5317 = vmatmul.msk.bf16.gmra.mxu3 %vm394_vm1, %v3975_v25  ;;  %5350 = vmatmul.msk.bf16.gmra.mxu0 %vm394_vm1, %v4389_v46  ;;  %v3868_v49 = vshll.u32 %v6994_v23, 16  ;;  %v3872_v47 = vshrl.u32 %v6994_v23, 16  ;;  %v2916_v25 = vunpack.c.l.b16 %v2865_v63  ;;  %v2917_v46 = vunpack.c.l.b16 %v2868_v39  ;;  %v5402_v63 = vld [vmem:[%s5667_s29 + $0xa8] sm:$0xff] }
 0x206   : > { %v4639_v48 = vadd.f32 %v6884_v52, %v4539_v33  ;;  %v3864_v20 = vrot.slane %v3862_v7, 5  ;;  %v5569_v39 = vld [vmem:[%s5667_s29 + $0xac] sm:$0xf]  ;;  %v4390_v0 = vpack.c.b16 %v4371_v51, %v4370_v45  ;;  %v4325_v57 = vrot.slane %v6994_v23, 5 }
 0x207   : > { %v3385_v31 = vpop.f32.mrf.mxu2  ;;  %v7012_v32 = vrot.slane %v3868_v49, 5  ;;  %v3874_v18 = vrot.slane %v3872_v47, 4  ;;  %v2936_v53 = vpack.c.b16 %v2917_v46, %v2916_v25  ;;  %v2871_v61 = vrot.slane %v5569_v39, 5  ;;  %v5571_v47 = vld [vmem:[%s5667_s29 + $0xb0] sm:$0x1] }
 0x208   : > { %v4671_v27 = vmax.f32 %v4639_v48, 0.0  ;;  %v3456_v41 = vadd.f32 %v3385_v31, %v3086_v42  ;;  %v4055_v30 = vpop.f32.mrf.mxu3  ;;  %v3976_v31 = vpack.c.b16 %v3957_v21, %v3956_v28  ;;  %v7026_v25 = vld [vmem:[%s5667_s29 + $0xc0] sm:$0xf]  ;;  %v7029_v46 = vld [vmem:[%s5667_s29 + $0xc4] sm:$0xf]  ;;  %v4327_v51 = vrot.slane %v4325_v57, 4 }
 0x209   : > { %v3017_v10 = vpop.f32.mrf.mxu1  ;;  %v2873_v49 = vrot.slane %v2871_v61, 4 }
 0x20a   : > { %v5419_v3 = vpack.c.bf16 %v4671_v27, %v4670_v40  ;;  %v4471_v16 = vpop.f32.mrf.mxu0  ;;  %v4126_v5 = vadd.f32 %v4055_v30, %v3456_v41  ;;  %v3087_v22 = vadd.f32 %v3017_v10, %v6333_v17  ;;  %v3865_v40 = vor.u32 %v3864_v20, %v3861_v62 }
 0x20b   : > { %v3875_v27 = vor.u32 %v3874_v18, %v7012_v32  ;;  %v3878_v17 = vshll.u32 %v5217_v6, 16  ;;  %v4328_v62 = vrot.slane %v5217_v6, 5  ;;  %v3883_v18 = vshrl.u32 %v7026_v25, 16 }
 0x20c   : > { %5487 = vst [vmem:[%s6921_s19 + $0x10] sm:$0xff] %v5419_v3   ;;  %v4540_v55 = vadd.f32 %v4469_v13, %v4126_v5  ;;  %v5570_v13 = vld [vmem:[%s5667_s29 + $0xa8] sm:$0xf]  ;;  %v2874_v3 = vrot.slane %v5571_v47, 5  ;;  %v3866_v23 = vrot.slane %v3865_v40, 4 }
 0x20d   : > { %v5156_v10 = vrot.slane %v5570_v13, 9  ;;  %v3876_v28 = vrot.slane %v3875_v27, 4  ;;  %v3880_v5 = vrot.slane %v3878_v17, 5  ;;  %v3885_v27 = vrot.slane %v3883_v18, 4 }
 0x20e   : > { %v4640_v2 = vadd.f32 %v6884_v52, %v4540_v55  ;;  %v2875_v6 = vsel %vm5735_vm7, %v2873_v49, %v2874_v3 }
 0x20f   : > { %v3387_v33 = vpop.f32.mrf.mxu2 }
 0x210   : > { %v3457_v48 = vadd.f32 %v3387_v33, %v3087_v22  ;;  %v4057_v42 = vpop.f32.mrf.mxu3  ;;  %v3886_v22 = vshll.u32 %v7026_v25, 16  ;;  %v3892_v33 = vshll.u32 %v7029_v46, 16  ;;  %v4672_v55 = vmax.f32 %v4640_v2, 0.0 }
 0x211   : > { %v3020_v11 = vpop.f32.mrf.mxu1  ;;  %v2919_v2 = vunpack.c.l.b16 %v2875_v6  ;;  %v5573_v6 = vld [vmem:[%s5667_s29 + $0xb4] sm:$0xf] }
 0x212   : > { %v4127_v41 = vadd.f32 %v4057_v42, %v3457_v48  ;;  %v4474_v30 = vpop.f32.mrf.mxu0  ;;  %v3088_v45 = vadd.f32 %v3020_v11, %v6374_v43  ;;  %v2872_v43 = vsel %vm5735_vm7, %v5156_v10, %v2871_v61  ;;  %v4329_v61 = vsel %vm5735_vm7, %v4327_v51, %v4328_v62 }
 0x213   : > { %v3888_v17 = vrot.slane %v3886_v22, 5 }
 0x214   : > { %v4541_v7 = vadd.f32 %v4471_v16, %v4127_v41  ;;  %5172 = vmatmul.msk.bf16.gmra.mxu1 %vm394_vm1, %v2936_v53  ;;  %5301 = vmatmul.msk.bf16.gmra.mxu2 %vm394_vm1, %v5402_v63  ;;  %v5335_v16 = vrot.slane %v6991_v24, 9  ;;  %v3896_v53 = vshrl.u32 %v7029_v46, 16  ;;  %v7053_v41 = vrot.slane %v3892_v33, 5 }
 0x215   : > { %5318 = vmatmul.msk.bf16.gmra.mxu3 %vm394_vm1, %v3976_v31  ;;  %5351 = vmatmul.msk.bf16.gmra.mxu0 %vm394_vm1, %v4390_v0  ;;  %v3871_v31 = vsel %vm5729_vm6, %v3866_v23, %v7012_v32  ;;  %v3881_v0 = vsel %vm5729_vm6, %v3876_v28, %v3880_v5  ;;  %v2918_v32 = vunpack.c.l.b16 %v2872_v43  ;;  %v4373_v23 = vunpack.c.l.b16 %v4329_v61  ;;  %v5572_v5 = vld [vmem:[%s5667_s29 + $0xb8] sm:$0xf] }
 0x216   : > { %v4641_v21 = vadd.f32 %v6884_v52, %v4541_v7  ;;  %v4326_v40 = vsel %vm5735_vm7, %v5335_v16, %v4325_v57  ;;  %v3898_v13 = vrot.slane %v3896_v53, 4  ;;  %v5220_v7 = vld [vmem:[%s5667_s29 + $0xc8] sm:$0x1]  ;;  %v3958_v49 = vunpack.c.l.b16 %v3871_v31  ;;  %v7217_v57 = vld [vmem:[#allocation10_spill] sm:$0xff] }
 0x217   : > { %v3390_v20 = vpop.f32.mrf.mxu2  ;;  %v3959_v47 = vunpack.c.l.b16 %v3881_v0  ;;  %v4372_v3 = vunpack.c.l.b16 %v4326_v40  ;;  %v2878_v16 = vrot.slane %v5572_v5, 5  ;;  %v3902_v62 = vshll.u32 %v5220_v7, 16  ;;  %v5403_v53 = vld [vmem:[%s5667_s29 + $0xb4] sm:$0xff]  ;;  %v5574_v0 = vld [vmem:[%s5667_s29 + $0xbc] sm:$0x1] }
 0x218   : > { %v4673_v48 = vmax.f32 %v4641_v21, 0.0  ;;  %v3458_v42 = vadd.f32 %v3390_v20, %v3088_v45  ;;  %v4060_v24 = vpop.f32.mrf.mxu3  ;;  %v3889_v45 = vor.u32 %v3888_v17, %v3885_v27  ;;  %v3899_v51 = vor.u32 %v3898_v13, %v7053_v41 }
 0x219   : > { %v3022_v63 = vpop.f32.mrf.mxu1  ;;  %v2937_v33 = vpack.c.b16 %v2919_v2, %v2918_v32  ;;  %v5157_v31 = vrot.slane %v5573_v6, 9  ;;  %v2881_v40 = vrot.slane %v5574_v0, 5  ;;  %v3904_v27 = vrot.slane %v3902_v62, 5 }
 0x21a   : > { %v5424_v39 = vpack.c.bf16 %v4673_v48, %v4672_v55  ;;  %v4476_v11 = vpop.f32.mrf.mxu0  ;;  %v4128_v10 = vadd.f32 %v4060_v24, %v3458_v42  ;;  %v3089_v28 = vadd.f32 %v3022_v63, %v7217_v57  ;;  %v4332_v55 = vrot.slane %v7029_v46, 5 }
 0x21b   : > { %v3977_v42 = vpack.c.b16 %v3959_v47, %v3958_v49  ;;  %v4391_v24 = vpack.c.b16 %v4373_v23, %v4372_v3  ;;  %v3890_v61 = vrot.slane %v3889_v45, 4  ;;  %v5336_v17 = vrot.slane %v7026_v25, 9  ;;  %v7075_v47 = vld [vmem:[%s5667_s29 + $0xcc] sm:$0xf] }
 0x21c   : > { %5488 = vst [vmem:[%s6921_s19 + $0x18] sm:$0xff] %v5424_v39   ;;  %v4542_v20 = vadd.f32 %v4474_v30, %v4128_v10  ;;  %v2880_v39 = vrot.slane %v2878_v16, 4  ;;  %v3900_v30 = vrot.slane %v3899_v51, 4  ;;  %v4334_v10 = vrot.slane %v4332_v55, 4 }
 0x21d   : > { %v4335_v32 = vrot.slane %v5220_v7, 5  ;;  %v2879_v25 = vsel %vm5735_vm7, %v5157_v31, %v2878_v16  ;;  %v3895_v7 = vsel %vm5729_vm6, %v3890_v61, %v7053_v41  ;;  %v3907_v62 = vshrl.u32 %v7075_v47, 16 }
 0x21e   : > { %v4642_v13 = vadd.f32 %v6884_v52, %v4542_v20  ;;  %v2882_v23 = vsel %vm5735_vm7, %v2880_v39, %v2881_v40  ;;  %v3905_v57 = vsel %vm5729_vm6, %v3900_v30, %v3904_v27  ;;  %v3910_v20 = vshll.u32 %v7075_v47, 16  ;;  %v5223_v30 = vld [vmem:[%s5667_s29 + $0xd4] sm:$0x1] }
 0x21f   : > { %v3392_v21 = vpop.f32.mrf.mxu2  ;;  %v4336_v45 = vsel %vm5735_vm7, %v4334_v10, %v4335_v32  ;;  %v3909_v31 = vrot.slane %v3907_v62, 4  ;;  %v5404_v32 = vld [vmem:[%s5667_s29 + $0xc0] sm:$0xff]  ;;  %v5577_v62 = vld [vmem:[%s5667_s29 + $0xc8] sm:$0x1] }
 0x220   : > { %v3459_v18 = vadd.f32 %v3392_v21, %v3089_v28  ;;  %v4062_v22 = vpop.f32.mrf.mxu3  ;;  %v4674_v28 = vmax.f32 %v4642_v13, 0.0  ;;  %v4375_v6 = vunpack.c.l.b16 %v4336_v45  ;;  %v3912_v39 = vrot.slane %v3910_v20, 5 }
 0x221   : > { %v3025_v48 = vpop.f32.mrf.mxu1  ;;  %v2888_v20 = vrot.slane %v5577_v62, 5 }
 0x222   : > { %v4129_v63 = vadd.f32 %v4062_v22, %v3459_v18  ;;  %v4479_v43 = vpop.f32.mrf.mxu0  ;;  %v3090_v49 = vadd.f32 %v3025_v48, %v6411_v26  ;;  %v4333_v26 = vsel %vm5735_vm7, %v5336_v17, %v4332_v55  ;;  %v2921_v55 = vunpack.c.l.b16 %v2882_v23 }
 0x223   : > { %v3960_v48 = vunpack.c.l.b16 %v3895_v7  ;;  %v3913_v7 = vor.u32 %v3912_v39, %v3909_v31 }
 0x224   : > { %v4543_v46 = vadd.f32 %v4476_v11, %v4129_v63  ;;  %5173 = vmatmul.msk.bf16.gmra.mxu1 %vm394_vm1, %v2937_v33  ;;  %5302 = vmatmul.msk.bf16.gmra.mxu2 %vm394_vm1, %v5403_v53  ;;  %v7078_v11 = vld [vmem:[%s5667_s29 + $0xd0] sm:$0xf]  ;;  %v2920_v53 = vunpack.c.l.b16 %v2879_v25  ;;  %v4374_v63 = vunpack.c.l.b16 %v4333_v26  ;;  %v3926_v26 = vshll.u32 %v5223_v30, 16 }
 0x225   : > { %5319 = vmatmul.msk.bf16.gmra.mxu3 %vm394_vm1, %v3977_v42  ;;  %5352 = vmatmul.msk.bf16.gmra.mxu0 %vm394_vm1, %v4391_v24  ;;  %v3916_v41 = vshll.u32 %v7078_v11, 16  ;;  %v3920_v18 = vshrl.u32 %v7078_v11, 16  ;;  %v3961_v24 = vunpack.c.l.b16 %v3905_v57 }
 0x226   : > { %v4643_v2 = vadd.f32 %v6884_v52, %v4543_v46  ;;  %v2938_v17 = vpack.c.b16 %v2921_v55, %v2920_v53  ;;  %v4392_v23 = vpack.c.b16 %v4375_v6, %v4374_v63 }
 0x227   : > { %v3395_v3 = vpop.f32.mrf.mxu2  ;;  %v3918_v0 = vrot.slane %v3916_v41, 5  ;;  %v3922_v40 = vrot.slane %v3920_v18, 4  ;;  %v3914_v41 = vrot.slane %v3913_v7, 4 }
 0x228   : > { %v4675_v5 = vmax.f32 %v4643_v2, 0.0  ;;  %v3460_v16 = vadd.f32 %v3395_v3, %v3090_v49  ;;  %v4065_v21 = vpop.f32.mrf.mxu3  ;;  %v3978_v2 = vpack.c.b16 %v3961_v24, %v3960_v48  ;;  %v5575_v49 = vld [vmem:[%s5667_s29 + $0xc4] sm:$0xf]  ;;  %v4342_v48 = vrot.slane %v5223_v30, 5 }
 0x229   : > { %v3027_v51 = vpop.f32.mrf.mxu1  ;;  %v2885_v25 = vrot.slane %v5575_v49, 5  ;;  %v3923_v57 = vor.u32 %v3922_v40, %v3918_v0 }
 0x22a   : > { %v5429_v22 = vpack.c.bf16 %v4675_v5, %v4674_v28  ;;  %v4481_v33 = vpop.f32.mrf.mxu0  ;;  %v4130_v42 = vadd.f32 %v4065_v21, %v3460_v16  ;;  %v3091_v61 = vadd.f32 %v3027_v51, %v6439_v8  ;;  %v4339_v8 = vrot.slane %v7078_v11, 5  ;;  %v5576_v16 = vld [vmem:[%s5667_s29 + $0xc0] sm:$0xf] }
 0x22b   : > { %v5158_v21 = vrot.slane %v5576_v16, 9  ;;  %v2887_v51 = vrot.slane %v2885_v25, 4  ;;  %v3924_v18 = vrot.slane %v3923_v57, 4  ;;  %v5337_v11 = vrot.slane %v7075_v47, 9 }
 0x22c   : > { %5489 = vst [vmem:[%s6921_s19 + $0x20] sm:$0xff] %v5429_v22   ;;  %v4544_v13 = vadd.f32 %v4479_v43, %v4130_v42  ;;  %v3928_v22 = vrot.slane %v3926_v26, 5  ;;  %v4341_v55 = vrot.slane %v4339_v8, 4  ;;  %v3919_v47 = vsel %vm5729_vm6, %v3914_v41, %v3918_v0 }
 0x22d   : > { %v2886_v40 = vsel %vm5735_vm7, %v5158_v21, %v2885_v25 }
 0x22e   : > { %v4644_v43 = vadd.f32 %v6884_v52, %v4544_v13  ;;  %v3929_v30 = vsel %vm5729_vm6, %v3924_v18, %v3928_v22  ;;  %v4343_v13 = vsel %vm5735_vm7, %v4341_v55, %v4342_v48 }
 0x22f   : > { %v3397_v27 = vpop.f32.mrf.mxu2  ;;  %v3963_v49 = vunpack.c.l.b16 %v3929_v30  ;;  %v4377_v0 = vunpack.c.l.b16 %v4343_v13 }
 0x230   : > { %v3461_v46 = vadd.f32 %v3397_v27, %v3091_v61  ;;  %v4067_v10 = vpop.f32.mrf.mxu3  ;;  %v4676_v24 = vmax.f32 %v4644_v43, 0.0  ;;  %v2889_v61 = vsel %vm5735_vm7, %v2887_v51, %v2888_v20 }
 0x231   : > { %v3030_v3 = vpop.f32.mrf.mxu1 }
 0x232   : > { %v4131_v28 = vadd.f32 %v4067_v10, %v3461_v46  ;;  %v4484_v5 = vpop.f32.mrf.mxu0  ;;  %v2922_v10 = vunpack.c.l.b16 %v2886_v40 }
 0x234   : > { %v4545_v45 = vadd.f32 %v4481_v33, %v4131_v28  ;;  %5174 = vmatmul.msk.bf16.gmra.mxu1 %vm394_vm1, %v2938_v17  ;;  %5303 = vmatmul.msk.bf16.gmra.mxu2 %vm394_vm1, %v5404_v32  ;;  %v3092_v33 = vadd.f32 %v3030_v3, %v6464_v35  ;;  %v4340_v17 = vsel %vm5735_vm7, %v5337_v11, %v4339_v8  ;;  %v2923_v32 = vunpack.c.l.b16 %v2889_v61  ;;  %v5405_v28 = vld [vmem:[%s5667_s29 + $0xcc] sm:$0xff] }
 0x235   : > { %5320 = vmatmul.msk.bf16.gmra.mxu3 %vm394_vm1, %v3978_v2  ;;  %5353 = vmatmul.msk.bf16.gmra.mxu0 %vm394_vm1, %v4392_v23  ;;  %v3962_v2 = vunpack.c.l.b16 %v3919_v47  ;;  %v4376_v25 = vunpack.c.l.b16 %v4340_v17 }
 0x236   : > { %v4645_v53 = vadd.f32 %v6884_v52, %v4545_v45  ;;  %v2939_v26 = vpack.c.b16 %v2923_v32, %v2922_v10 }
 0x237   : > { %v3400_v42 = vpop.f32.mrf.mxu2  ;;  %v3979_v9 = vpack.c.b16 %v3963_v49, %v3962_v2  ;;  %v4393_v16 = vpack.c.b16 %v4377_v0, %v4376_v25 }
 0x238   : > { %v4677_v63 = vmax.f32 %v4645_v53, 0.0  ;;  %v3462_v6 = vadd.f32 %v3400_v42, %v3092_v33  ;;  %v4070_v31 = vpop.f32.mrf.mxu3 }
 0x239   : > { %v3032_v39 = vpop.f32.mrf.mxu1 }
 0x23a   : > { %v5434_v27 = vpack.c.bf16 %v4677_v63, %v4676_v24  ;;  %v4486_v35 = vpop.f32.mrf.mxu0  ;;  %v4132_v46 = vadd.f32 %v4070_v31, %v3462_v6  ;;  %v3093_v3 = vadd.f32 %v3032_v39, %v6472_v50 }
 0x23c   : > { %5490 = vst [vmem:[%s6921_s19 + $0x28] sm:$0xff] %v5434_v27   ;;  %v4546_v4 = vadd.f32 %v4484_v5, %v4132_v46 }
 0x23e   : > { %v4646_v45 = vadd.f32 %v6884_v52, %v4546_v4 }
 0x23f   : > { %v3402_v23 = vpop.f32.mrf.mxu2 }
 0x240   : > { %v3463_v7 = vadd.f32 %v3402_v23, %v3093_v3  ;;  %v4072_v57 = vpop.f32.mrf.mxu3  ;;  %v4678_v20 = vmax.f32 %v4646_v45, 0.0 }
 0x241   : > { %v3035_v8 = vpop.f32.mrf.mxu1 }
 0x242   : > { %v4133_v21 = vadd.f32 %v4072_v57, %v3463_v7  ;;  %v4489_v43 = vpop.f32.mrf.mxu0  ;;  %v3094_v5 = vadd.f32 %v3035_v8, %v6495_v38 }
 0x244   : > { %v4547_v51 = vadd.f32 %v4486_v35, %v4133_v21  ;;  %5175 = vmatmul.msk.bf16.gmra.mxu1 %vm394_vm1, %v2939_v26  ;;  %5304 = vmatmul.msk.bf16.gmra.mxu2 %vm394_vm1, %v5405_v28 }
 0x245   : > { %5321 = vmatmul.msk.bf16.gmra.mxu3 %vm394_vm1, %v3979_v9  ;;  %5354 = vmatmul.msk.bf16.gmra.mxu0 %vm394_vm1, %v4393_v16 }
 0x246   : > { %v4647_v50 = vadd.f32 %v6884_v52, %v4547_v51 }
 0x247   : > { %v3405_v62 = vpop.f32.mrf.mxu2 }
 0x248   : > { %v4679_v41 = vmax.f32 %v4647_v50, 0.0  ;;  %v3464_v18 = vadd.f32 %v3405_v62, %v3094_v5  ;;  %v4075_v22 = vpop.f32.mrf.mxu3 }
 0x249   : > { %v3037_v11 = vpop.f32.mrf.mxu1 }
 0x24a   : > { %v5439_v53 = vpack.c.bf16 %v4679_v41, %v4678_v20  ;;  %v4491_v33 = vpop.f32.mrf.mxu0  ;;  %v4134_v55 = vadd.f32 %v4075_v22, %v3464_v18  ;;  %v3095_v48 = vadd.f32 %v3037_v11, %v6513_v59 }
 0x24c   : > { %5491 = vst [vmem:[%s6921_s19 + $0x30] sm:$0xff] %v5439_v53   ;;  %v4548_v24 = vadd.f32 %v4489_v43, %v4134_v55 }
 0x24e   : > { %v4648_v40 = vadd.f32 %v6884_v52, %v4548_v24 }
 0x24f   : > { %v3407_v42 = vpop.f32.mrf.mxu2 }
 0x250   : > { %v3465_v63 = vadd.f32 %v3407_v42, %v3095_v48  ;;  %v4077_v6 = vpop.f32.mrf.mxu3  ;;  %v4680_v30 = vmax.f32 %v4648_v40, 0.0 }
 0x251   : > { %v3040_v31 = vpop.f32.mrf.mxu1 }
 0x252   : > { %v4135_v39 = vadd.f32 %v4077_v6, %v3465_v63  ;;  %v4494_v38 = vpop.f32.mrf.mxu0  ;;  %v3096_v27 = vadd.f32 %v3040_v31, %v6538_v58 }
 0x254   : > { %v4549_v61 = vadd.f32 %v4491_v33, %v4135_v39 }
 0x256   : > { %v4649_v47 = vadd.f32 %v6884_v52, %v4549_v61 }
 0x257   : > { %v3410_v35 = vpop.f32.mrf.mxu2 }
 0x258   : > { %v4681_v17 = vmax.f32 %v4649_v47, 0.0  ;;  %v3466_v13 = vadd.f32 %v3410_v35, %v3096_v27  ;;  %v4080_v59 = vpop.f32.mrf.mxu3 }
 0x259   : > { %v3042_v46 = vpop.f32.mrf.mxu1 }
 0x25a   : > { %v5444_v10 = vpack.c.bf16 %v4681_v17, %v4680_v30  ;;  %v4496_v32 = vpop.f32.mrf.mxu0  ;;  %v4136_v2 = vadd.f32 %v4080_v59, %v3466_v13  ;;  %v3097_v49 = vadd.f32 %v3042_v46, %v6550_v44 }
 0x25c   : > { %5492 = vst [vmem:[%s6921_s19 + $0x38] sm:$0xff] %v5444_v10   ;;  %v4550_v0 = vadd.f32 %v4494_v38, %v4136_v2 }
 0x25e   : > { %v4650_v57 = vadd.f32 %v6884_v52, %v4550_v0 }
 0x25f   : > { %v3412_v25 = vpop.f32.mrf.mxu2 }
 0x260   : > { %v3467_v3 = vadd.f32 %v3412_v25, %v3097_v49  ;;  %v4082_v23 = vpop.f32.mrf.mxu3  ;;  %v4682_v16 = vmax.f32 %v4650_v57, 0.0 }
 0x261   : > { %v3045_v4 = vpop.f32.mrf.mxu1 }
 0x262   : > { %v4137_v7 = vadd.f32 %v4082_v23, %v3467_v3  ;;  %v4499_v58 = vpop.f32.mrf.mxu0  ;;  %v3098_v8 = vadd.f32 %v3045_v4, %v6578_v37 }
 0x264   : > { %v4551_v26 = vadd.f32 %v4496_v32, %v4137_v7 }
 0x266   : > { %v4651_v28 = vadd.f32 %v6884_v52, %v4551_v26 }
 0x267   : > { %v3415_v9 = vpop.f32.mrf.mxu2 }
 0x268   : > { %v4683_v21 = vmax.f32 %v4651_v28, 0.0  ;;  %v3468_v43 = vadd.f32 %v3415_v9, %v3098_v8  ;;  %v4085_v44 = vpop.f32.mrf.mxu3 }
 0x269   : > { %v3047_v45 = vpop.f32.mrf.mxu1 }
 0x26a   : > { %v5449_v51 = vpack.c.bf16 %v4683_v21, %v4682_v16  ;;  %v4501_v50 = vpop.f32.mrf.mxu0  ;;  %v4138_v5 = vadd.f32 %v4085_v44, %v3468_v43  ;;  %v3099_v62 = vadd.f32 %v3047_v45, %v6598_v1  ;;  %v7158_v21 = vld [vmem:[%s7194_s2] ss:$0 sm:$0xff] }
 0x26c   : > { %5493 = vst [vmem:[%s6921_s19 + $0x40] sm:$0xff] %v5449_v51   ;;  %v4552_v41 = vadd.f32 %v4499_v58, %v4138_v5 }
 0x26e   : > { %v4652_v33 = vadd.f32 %v6884_v52, %v4552_v41 }
 0x26f   : > { %v3417_v20 = vpop.f32.mrf.mxu2 }
 0x270   : > { %v3469_v18 = vadd.f32 %v3417_v20, %v3099_v62  ;;  %v4087_v22 = vpop.f32.mrf.mxu3  ;;  %v4684_v63 = vmax.f32 %v4652_v33, 0.0 }
 0x271   : > { %v3050_v11 = vpop.f32.mrf.mxu1 }
 0x272   : > { %v4139_v53 = vadd.f32 %v4087_v22, %v3469_v18  ;;  %v4504_v37 = vpop.f32.mrf.mxu0  ;;  %v3100_v42 = vadd.f32 %v3050_v11, %v6624_v54 }
 0x274   : > { %v4553_v55 = vadd.f32 %v4501_v50, %v4139_v53 }
 0x276   : > { %v4653_v48 = vadd.f32 %v6884_v52, %v4553_v55 }
 0x277   : > { %v3420_v24 = vpop.f32.mrf.mxu2 }
 0x278   : > { %v4685_v6 = vmax.f32 %v4653_v48, 0.0  ;;  %v3470_v31 = vadd.f32 %v3420_v24, %v3100_v42  ;;  %v4090_v1 = vpop.f32.mrf.mxu3 }
 0x279   : > { %v3052_v39 = vpop.f32.mrf.mxu1 }
 0x27a   : > { %v5454_v38 = vpack.c.bf16 %v4685_v6, %v4684_v63  ;;  %v4506_v40 = vpop.f32.mrf.mxu0  ;;  %v4140_v61 = vadd.f32 %v4090_v1, %v3470_v31  ;;  %v3101_v47 = vadd.f32 %v3052_v39, %v6636_v15 }
 0x27c   : > { %5494 = vst [vmem:[%s6921_s19 + $0x48] sm:$0xff] %v5454_v38   ;;  %v4554_v35 = vadd.f32 %v4504_v37, %v4140_v61 }
 0x27e   : > { %v4654_v46 = vadd.f32 %v6884_v52, %v4554_v35 }
 0x27f   : > { %v3422_v27 = vpop.f32.mrf.mxu2 }
 0x280   : > { %v3471_v30 = vadd.f32 %v3422_v27, %v3101_v47  ;;  %v4092_v17 = vpop.f32.mrf.mxu3  ;;  %v4686_v25 = vmax.f32 %v4654_v46, 0.0 }
 0x281   : > { %v3055_v13 = vpop.f32.mrf.mxu1 }
 0x282   : > { %v4141_v59 = vadd.f32 %v4092_v17, %v3471_v30  ;;  %v4509_v54 = vpop.f32.mrf.mxu0  ;;  %v3102_v2 = vadd.f32 %v3055_v13, %v6664_v36 }
 0x284   : > { %v4555_v10 = vadd.f32 %v4506_v40, %v4141_v59 }
 0x286   : > { %v4655_v32 = vadd.f32 %v6884_v52, %v4555_v10 }
 0x287   : > { %v3425_v49 = vpop.f32.mrf.mxu2 }
 0x288   : > { %v4687_v0 = vmax.f32 %v4655_v32, 0.0  ;;  %v3472_v3 = vadd.f32 %v3425_v49, %v3102_v2  ;;  %v4095_v15 = vpop.f32.mrf.mxu3 }
 0x289   : > { %v3057_v23 = vpop.f32.mrf.mxu1 }
 0x28a   : > { %v5459_v4 = vpack.c.bf16 %v4687_v0, %v4686_v25  ;;  %v4511_v7 = vpop.f32.mrf.mxu0  ;;  %v4142_v58 = vadd.f32 %v4095_v15, %v3472_v3  ;;  %v3103_v57 = vadd.f32 %v3057_v23, %v6684_v56 }
 0x28c   : > { %5495 = vst [vmem:[%s6921_s19 + $0x50] sm:$0xff] %v5459_v4   ;;  %v4556_v28 = vadd.f32 %v4509_v54, %v4142_v58 }
 0x28e   : > { %v4656_v43 = vadd.f32 %v7158_v21, %v4556_v28 }
 0x28f   : > { %v3427_v26 = vpop.f32.mrf.mxu2 }
 0x290   : > { %v3473_v8 = vadd.f32 %v3427_v26, %v3103_v57  ;;  %v4097_v9 = vpop.f32.mrf.mxu3  ;;  %v4688_v50 = vmax.f32 %v4656_v43, 0.0 }
 0x291   : > { %v3060_v16 = vpop.f32.mrf.mxu1 }
 0x292   : > { %v4143_v52 = vadd.f32 %v4097_v9, %v3473_v8  ;;  %v4514_v36 = vpop.f32.mrf.mxu0  ;;  %v3104_v56 = vadd.f32 %v3060_v16, %v6710_v34 }
 0x294   : > { %v4557_v44 = vadd.f32 %v4511_v7, %v4143_v52 }
 0x296   : > { %v4657_v45 = vadd.f32 %v7158_v21, %v4557_v44 }
 0x297   : > { %v3430_v51 = vpop.f32.mrf.mxu2 }
 0x298   : > { %v4689_v5 = vmax.f32 %v4657_v45, 0.0  ;;  %v3474_v62 = vadd.f32 %v3430_v51, %v3104_v56  ;;  %v4100_v20 = vpop.f32.mrf.mxu3  ;;  %v7218_v56 = vld [vmem:[#allocation3_spill] sm:$0xff] }
 0x299   : > { %v3062_v41 = vpop.f32.mrf.mxu1 }
 0x29a   : > { %v5464_v18 = vpack.c.bf16 %v4689_v5, %v4688_v50  ;;  %v4516_v22 = vpop.f32.mrf.mxu0  ;;  %v4144_v11 = vadd.f32 %v4100_v20, %v3474_v62  ;;  %v3105_v53 = vadd.f32 %v3062_v41, %v6722_v19 }
 0x29c   : > { %5496 = vst [vmem:[%s6921_s19 + $0x58] sm:$0xff] %v5464_v18   ;;  %v4558_v33 = vadd.f32 %v4514_v36, %v4144_v11 }
 0x29e   : > { %v4658_v63 = vadd.f32 %v7158_v21, %v4558_v33 }
 0x29f   : > { %v3432_v37 = vpop.f32.mrf.mxu2 }
 0x2a0   : > { %v3475_v55 = vadd.f32 %v3432_v37, %v3105_v53  ;;  %v4102_v48 = vpop.f32.mrf.mxu3  ;;  %v4690_v38 = vmax.f32 %v4658_v63, 0.0  ;;  %v7219_v53 = vld [vmem:[#allocation4_spill] sm:$0xff] }
 0x2a1   : > { %v3065_v42 = vpop.f32.mrf.mxu1 }
 0x2a2   : > { %v4145_v24 = vadd.f32 %v4102_v48, %v3475_v55  ;;  %v4519_v34 = vpop.f32.mrf.mxu0  ;;  %v3106_v1 = vadd.f32 %v3065_v42, %v6750_v14 }
 0x2a4   : > { %v4559_v6 = vadd.f32 %v4516_v22, %v4145_v24 }
 0x2a6   : > { %v4659_v31 = vadd.f32 %v7158_v21, %v4559_v6 }
 0x2a7   : > { %v3435_v39 = vpop.f32.mrf.mxu2 }
 0x2a8   : > { %v4691_v40 = vmax.f32 %v4659_v31, 0.0  ;;  %v3476_v61 = vadd.f32 %v3435_v39, %v3106_v1  ;;  %v4105_v19 = vpop.f32.mrf.mxu3 }
 0x2a9   : > { %v3067_v47 = vpop.f32.mrf.mxu1 }
 0x2aa   : > { %v5469_v27 = vpack.c.bf16 %v4691_v40, %v4690_v38  ;;  %v4521_v35 = vpop.f32.mrf.mxu0  ;;  %v4146_v30 = vadd.f32 %v4105_v19, %v3476_v61  ;;  %v3107_v17 = vadd.f32 %v3067_v47, %v6770_v12 }
 0x2ac   : > { %5497 = vst [vmem:[%s6921_s19 + $0x60] sm:$0xff] %v5469_v27   ;;  %v4560_v59 = vadd.f32 %v4519_v34, %v4146_v30 }
 0x2ae   : > { %v4660_v14 = vadd.f32 %v7158_v21, %v4560_v59 }
 0x2af   : > { %v3437_v13 = vpop.f32.mrf.mxu2 }
 0x2b0   : > { %v3477_v54 = vadd.f32 %v3437_v13, %v3107_v17  ;;  %v4107_v46 = vpop.f32.mrf.mxu3  ;;  %v4692_v15 = vmax.f32 %v4660_v14, 0.0 }
 0x2b1   : > { %v3070_v10 = vpop.f32.mrf.mxu1 }
 0x2b2   : > { %v4147_v32 = vadd.f32 %v4107_v46, %v3477_v54  ;;  %v4524_v49 = vpop.f32.mrf.mxu0  ;;  %v3108_v0 = vadd.f32 %v3070_v10, %v6796_v29 }
 0x2b4   : > { %v4561_v2 = vadd.f32 %v4521_v35, %v4147_v32 }
 0x2b6   : > { %v4661_v25 = vadd.f32 %v7158_v21, %v4561_v2 }
 0x2b7   : > { %v3440_v3 = vpop.f32.mrf.mxu2 }
 0x2b8   : > { %v4693_v23 = vmax.f32 %v4661_v25, 0.0  ;;  %v3478_v4 = vadd.f32 %v3440_v3, %v3108_v0  ;;  %v4110_v12 = vpop.f32.mrf.mxu3 }
 0x2b9   : > { %v3072_v7 = vpop.f32.mrf.mxu1 }
 0x2ba   : > { %v5474_v58 = vpack.c.bf16 %v4693_v23, %v4692_v15  ;;  %v4148_v57 = vadd.f32 %v4110_v12, %v3478_v4  ;;  %v3109_v26 = vadd.f32 %v3072_v7, %v6808_v60  ;;  %v4526_v28 = vpop.f32.mrf.mxu0 }
 0x2bc   : > { %5498 = vst [vmem:[%s6921_s19 + $0x68] sm:$0xff] %v5474_v58   ;;  %v4562_v9 = vadd.f32 %v4524_v49, %v4148_v57 }
 0x2be   : > { %v4662_v29 = vadd.f32 %v7158_v21, %v4562_v9 }
 0x2bf   : > { %v3442_v8 = vpop.f32.mrf.mxu2 }
 0x2c0   : > { %v3479_v16 = vadd.f32 %v3442_v8, %v3109_v26  ;;  %v4112_v52 = vpop.f32.mrf.mxu3  ;;  %v4694_v5 = vmax.f32 %v4662_v29, 0.0 }
 0x2c1   : > { %v3075_v36 = vpop.f32.mrf.mxu1 }
 0x2c2   : > { %v4149_v43 = vadd.f32 %v4112_v52, %v3479_v16  ;;  %v3110_v51 = vadd.f32 %v3075_v36, %v7218_v56  ;;  %v4529_v41 = vpop.f32.mrf.mxu0 }
 0x2c4   : > { %v4563_v44 = vadd.f32 %v4526_v28, %v4149_v43 }
 0x2c6   : > { %v4663_v45 = vadd.f32 %v7158_v21, %v4563_v44 }
 0x2c7   : > { %v3445_v50 = vpop.f32.mrf.mxu2 }
 0x2c8   : > { %v4695_v62 = vmax.f32 %v4663_v45, 0.0  ;;  %v3480_v20 = vadd.f32 %v3445_v50, %v3110_v51  ;;  %v4115_v60 = vpop.f32.mrf.mxu3 }
 0x2c9   : > { %v3077_v22 = vpop.f32.mrf.mxu1 }
 0x2ca   : > { %v5479_v18 = vpack.c.bf16 %v4695_v62, %v4694_v5  ;;  %v4150_v11 = vadd.f32 %v4115_v60, %v3480_v20  ;;  %v3111_v37 = vadd.f32 %v3077_v22, %v7219_v53  ;;  %v4531_v34 = vpop.f32.mrf.mxu0 }
 0x2cc   : > { %5499 = vst [vmem:[%s6921_s19 + $0x70] sm:$0xff] %v5479_v18   ;;  %v4564_v55 = vadd.f32 %v4529_v41, %v4150_v11 }
 0x2ce   : > { %v4664_v63 = vadd.f32 %v7158_v21, %v4564_v55 }
 0x2cf   : > { %v3447_v33 = vpop.f32.mrf.mxu2 }
 0x2d0   : > { %v3481_v48 = vadd.f32 %v3447_v33, %v3111_v37  ;;  %v4117_v42 = vpop.f32.mrf.mxu3  ;;  %v4696_v1 = vmax.f32 %v4664_v63, 0.0 }
 0x2d2   : > { %v4151_v24 = vadd.f32 %v4117_v42, %v3481_v48 }
 0x2d4   : > { %v4565_v6 = vadd.f32 %v4531_v34, %v4151_v24 }
 0x2d6   : > { %v4665_v31 = vadd.f32 %v7158_v21, %v4565_v6 }
 0x2d8   : > { %v4697_v39 = vmax.f32 %v4665_v31, 0.0 }
 0x2da   : > { %v5484_v38 = vpack.c.bf16 %v4697_v39, %v4696_v1 }
 0x2dc   : > { %5500 = vst [vmem:[%s6921_s19 + $0x78] sm:$0xff] %v5484_v38  }
 0x2dd PF: > { %s13_s14 = sadd.s32 1, %s5601_s14   ;;  %s7220_s12 = smov %s5597_s13 }
 0x2de   : > { %p10_p5 = scmp.ge.s32.totalorder %s13_s14, 4   ;;  %s7221_s13 = smov %s7223_s15 }
 0x2e0   :  { %12 = sbr.rel (!%p10_p5) target bundleno = 2 (0x2), region = 73 }

</bundles_post_ra>
